<compile_context>
chip_gen: v7x
topology: tpu7x:2x2x1
jax: 0.10.0
libtpu: 0.0.40
codegen_flags: <defaults>
</compile_context>

<pallas_src>
import numpy as np
import jax
import jax.numpy as jnp
from jax.experimental import pallas as pl
from jax.experimental.pallas import tpu as pltpu

# ------------------------- configuration (small) -----------------------------
DIM = 64                    # channels C
NUM_HEADS = 2
HEAD_DIM = DIM // NUM_HEADS
WINDOW = (4, 4)             # window_size (Wh, Ww)
N = WINDOW[0] * WINDOW[1]   # tokens per window
NW = 4                      # number of distinct windows (mask.shape[0])
BATCH = 8
B_ = BATCH * NW             # num_windows * batch = 32

TB = 8                      # windows per grid step: M = TB*N = 128 MXU rows
                            # (v6e/v7x: TB=16 -> M=256; keep B_//TB >= 2 on v7x)

COMPUTE_DTYPE = jnp.float32  # set to jnp.bfloat16 on v6e/v7x for 2x MXU rate
                             # (f32 accumulation kept via preferred_element_type)


# ------------------------------- Pallas kernel -------------------------------
def window_attention_kernel(x_ref, wqkv_ref, bqkv_ref, scale_ref, bias_ref,
                            wproj_ref, bproj_ref, o_ref):
    # x_ref:    (TB, N, C)        wqkv_ref: (C, 3C)    bqkv_ref: (1, 3C)
    # scale_ref:(H,) in SMEM      bias_ref: (nW, H, N, N)
    # wproj_ref:(C, C)            bproj_ref:(1, C)     o_ref:    (TB, N, C)
    tb, n, c = x_ref.shape
    nw, num_heads, _, _ = bias_ref.shape
    hd = c // num_heads
    m = tb * n

    # ---- fused QKV projection: one (M, C) x (C, 3C) MXU pass -----------------
    x2 = x_ref[...].reshape(m, c).astype(COMPUTE_DTYPE)
    qkv = jnp.dot(x2, wqkv_ref[...].astype(COMPUTE_DTYPE),
                  preferred_element_type=jnp.float32) + bqkv_ref[...]   # (M, 3C)

    # ---- per-block additive bias (rel-pos bias + window mask) ----------------
    # Window index of block element t is t % nw (valid because TB % nW == 0),
    # so the (nW,H,N,N) table is just repeated along the leading dim. Hoisted
    # out of the head loop.
    bias_all = bias_ref[...]                              # (nW, H, N, N)
    reps = tb // nw
    bias_b = bias_all if reps == 1 else jnp.concatenate([bias_all] * reps, axis=0)

    w_proj = wproj_ref[...]                               # (C, C)

    out_acc = None
    for h in range(num_heads):                            # static unroll (H small)
        qh = qkv[:, h * hd:(h + 1) * hd]                  # (M, hd)
        kh = qkv[:, c + h * hd:c + (h + 1) * hd]          # (M, hd)
        vh = qkv[:, 2 * c + h * hd:2 * c + (h + 1) * hd]  # (M, hd)

        # cosine attention: F.normalize(x, eps=1e-12) == x * rsqrt(max(sum x^2, eps^2))
        qn = qh * jax.lax.rsqrt(jnp.maximum(jnp.sum(qh * qh, axis=-1, keepdims=True), 1e-24))
        kn = kh * jax.lax.rsqrt(jnp.maximum(jnp.sum(kh * kh, axis=-1, keepdims=True), 1e-24))

        qn3 = qn.reshape(tb, n, hd)                       # leading-dim split only
        kn3 = kn.reshape(tb, n, hd)
        vh3 = vh.reshape(tb, n, hd)

        attn = jnp.einsum('bqd,bkd->bqk', qn3, kn3,
                          preferred_element_type=jnp.float32)          # (TB, N, N)
        attn = attn * scale_ref[h] + bias_b[:, h]                      # SMEM scalar

        # softmax along last axis (exact reciprocal keeps the 1e-4 check;
        # pl.reciprocal(..., approx=True) would move it to the EUP slot)
        attn = attn - jnp.max(attn, axis=-1, keepdims=True)
        e = jnp.exp(attn)
        p = e * pl.reciprocal(jnp.sum(e, axis=-1, keepdims=True), approx=False)

        ctx = jnp.einsum('bqk,bkd->bqd', p, vh3,
                         preferred_element_type=jnp.float32)           # (TB, N, hd)
        ctx2 = ctx.reshape(m, hd).astype(COMPUTE_DTYPE)

        # fold the head merge into the output projection (no lane-axis concat):
        contrib = jnp.dot(ctx2, w_proj[h * hd:(h + 1) * hd, :].astype(COMPUTE_DTYPE),
                          preferred_element_type=jnp.float32)          # (M, C)
        out_acc = contrib if out_acc is None else out_acc + contrib

    out = out_acc + bproj_ref[...]
    o_ref[...] = out.reshape(tb, n, c).astype(o_ref.dtype)


def window_attention_pallas(x, wqkv, bqkv, scale, bias, wproj, bproj, tb=TB):
    b_, n, c = x.shape
    nw, n_heads, _, _ = bias.shape
    assert b_ % tb == 0 and tb % nw == 0, "need B_ % TB == 0 and TB % nW == 0"
    grid = (b_ // tb,)

    flops = b_ * (2 * n * c * (3 * c)      # fused QKV projection
                  + 2 * n * n * c          # q @ k^T (all heads)
                  + 2 * n * n * c          # attn @ v (all heads)
                  + 2 * n * c * c)         # output projection
    transcendentals = b_ * n_heads * n * n                      # exp in softmax
    bytes_accessed = 4 * (2 * b_ * n * c + wqkv.size + bqkv.size
                          + bias.size + wproj.size + bproj.size + scale.size)

    return pl.pallas_call(
        window_attention_kernel,
        out_shape=jax.ShapeDtypeStruct((b_, n, c), jnp.float32),
        grid_spec=pltpu.PrefetchScalarGridSpec(
            num_scalar_prefetch=0,
            grid=grid,
            in_specs=[
                pl.BlockSpec((tb, n, c), lambda b: (b, 0, 0)),            # x
                pl.BlockSpec((c, 3 * c), lambda b: (0, 0)),               # Wqkv
                pl.BlockSpec((1, 3 * c), lambda b: (0, 0)),               # bqkv
                pl.BlockSpec(memory_space=pltpu.MemorySpace.SMEM),        # scale (H,)
                pl.BlockSpec((nw, n_heads, n, n), lambda b: (0, 0, 0, 0)),# bias+mask
                pl.BlockSpec((c, c), lambda b: (0, 0)),                   # Wproj
                pl.BlockSpec((1, c), lambda b: (0, 0)),                   # bproj
            ],
            out_specs=pl.BlockSpec((tb, n, c), lambda b: (b, 0, 0)),
        ),
        compiler_params=pltpu.CompilerParams(
            dimension_semantics=("parallel",)),
        cost_estimate=pl.CostEstimate(flops=flops,
                                      transcendentals=transcendentals,
                                      bytes_accessed=bytes_accessed),
    )(x, wqkv, bqkv, scale, bias, wproj, bproj)


# ------------------------- plain-JAX glue / param setup ----------------------
def make_relative_tables(window_size, pretrained_window_size=(0, 0)):
    Wh, Ww = window_size
    rch = np.arange(-(Wh - 1), Wh, dtype=np.float32)
    rcw = np.arange(-(Ww - 1), Ww, dtype=np.float32)
    table = np.stack(np.meshgrid(rch, rcw, indexing="ij"))        # (2, 2Wh-1, 2Ww-1)
    table = table.transpose(1, 2, 0)[None].copy()                 # (1, 2Wh-1, 2Ww-1, 2)
    if pretrained_window_size[0] > 0:
        table[..., 0] /= pretrained_window_size[0] - 1
        table[..., 1] /= pretrained_window_size[1] - 1
    else:
        table[..., 0] /= Wh - 1
        table[..., 1] /= Ww - 1
    table *= 8.0
    table = np.sign(table) * np.log2(np.abs(table) + 1.0) / np.log2(8.0)

    coords = np.stack(np.meshgrid(np.arange(Wh), np.arange(Ww), indexing="ij"))
    coords_flat = coords.reshape(2, -1)
    rel = coords_flat[:, :, None] - coords_flat[:, None, :]
    rel = rel.transpose(1, 2, 0).copy()
    rel[:, :, 0] += Wh - 1
    rel[:, :, 1] += Ww - 1
    rel[:, :, 0] *= 2 * Ww - 1
    rel_index = rel.sum(-1)                                        # (N, N)
    return table.astype(np.float32), rel_index.astype(np.int32)


def init_params(key):
    ks = jax.random.split(key, 8)
    return {
        "w_qkv": jax.random.normal(ks[0], (3 * DIM, DIM), jnp.float32) * 0.05,
        "q_bias": jax.random.normal(ks[1], (DIM,), jnp.float32) * 0.05,
        "v_bias": jax.random.normal(ks[2], (DIM,), jnp.float32) * 0.05,
        "w_proj": jax.random.normal(ks[3], (DIM, DIM), jnp.float32) * 0.05,
        "b_proj": jax.random.normal(ks[4], (DIM,), jnp.float32) * 0.05,
        "cpb_w1": jax.random.normal(ks[5], (512, 2), jnp.float32) * 0.05,
        "cpb_b1": jax.random.normal(ks[6], (512,), jnp.float32) * 0.05,
        "cpb_w2": jax.random.normal(ks[7], (NUM_HEADS, 512), jnp.float32) * 0.05,
        # nn.Parameter(torch.log(10 * torch.ones((num_heads, 1, 1))))
        "logit_scale": jnp.log(10.0 * jnp.ones((NUM_HEADS, 1, 1), jnp.float32)),
    }


def relative_position_bias(p, coords_table, rel_index):
    t = jnp.asarray(coords_table)                                  # (1, 2Wh-1, 2Ww-1, 2)
    hdn = jnp.maximum(t @ p["cpb_w1"].T + p["cpb_b1"], 0.0)        # ReLU
    table = (hdn @ p["cpb_w2"].T).reshape(-1, NUM_HEADS)           # ((2Wh-1)(2Ww-1), H)
    bias = table[jnp.asarray(rel_index).reshape(-1)]               # (N*N, H)
    bias = bias.reshape(N, N, NUM_HEADS).transpose(2, 0, 1)        # (H, N, N)
    return 16.0 * jax.nn.sigmoid(bias)


def ref_forward(x, p, rel_bias, mask):
    """Pure-JAX reference mirroring the PyTorch forward exactly."""
    b_, n, c = x.shape
    qkv_bias = jnp.concatenate([p["q_bias"], jnp.zeros_like(p["v_bias"]), p["v_bias"]])
    qkv = x @ p["w_qkv"].T + qkv_bias
    qkv = qkv.reshape(b_, n, 3, NUM_HEADS, -1).transpose(2, 0, 3, 1, 4)
    q, k, v = qkv[0], qkv[1], qkv[2]
    qn = q / jnp.maximum(jnp.linalg.norm(q, axis=-1, keepdims=True), 1e-12)
    kn = k / jnp.maximum(jnp.linalg.norm(k, axis=-1, keepdims=True), 1e-12)
    attn = qn @ jnp.swapaxes(kn, -2, -1)
    logit_scale = jnp.exp(jnp.minimum(p["logit_scale"], jnp.log(1.0 / 0.01)))
    attn = attn * logit_scale
    attn = attn + rel_bias[None]
    nW = mask.shape[0]
    attn = attn.reshape(b_ // nW, nW, NUM_HEADS, n, n) + mask[None, :, None]
    attn = attn.reshape(-1, NUM_HEADS, n, n)
    attn = jax.nn.softmax(attn, axis=-1)
    out = jnp.swapaxes(attn @ v, 1, 2).reshape(b_, n, c)
    return out @ p["w_proj"].T + p["b_proj"]


# ----------------------------------- main -------------------------------------
if __name__ == "__main__":
    key = jax.random.PRNGKey(0)
    kx, kp = jax.random.split(key)
    p = init_params(kp)

    x = jax.random.normal(kx, (B_, N, DIM), jnp.float32)

    # shifted-window style additive masks (0 / -100), shape (nW, N, N)
    mask_np = np.zeros((NW, N, N), np.float32)
    for w in range(1, NW):
        cut = (N * w) // NW
        mask_np[w, :cut, cut:] = -100.0
        mask_np[w, cut:, :cut] = -100.0
    mask = jnp.asarray(mask_np)

    coords_table, rel_index = make_relative_tables(WINDOW)
    rel_bias = relative_position_bias(p, coords_table, rel_index)     # (H, N, N)

    # deduplicated per-window additive bias: (nW, H, N, N) — NOT tiled to B_.
    combined_bias = rel_bias[None, :, :, :] + mask[:, None, :, :]

    # params in "x @ W" orientation; QKV fused into one (C, 3C) weight / (1, 3C) bias.
    wqkv = p["w_qkv"].T                                               # (C, 3C) = [q|k|v]
    bqkv = jnp.concatenate(
        [p["q_bias"], jnp.zeros((DIM,), jnp.float32), p["v_bias"]]).reshape(1, 3 * DIM)
    wproj = p["w_proj"].T                                             # (C, C)
    bproj = p["b_proj"].reshape(1, DIM)
    scale = jnp.exp(jnp.minimum(p["logit_scale"], jnp.log(1.0 / 0.01))).reshape(NUM_HEADS)

    out = window_attention_pallas(x, wqkv, bqkv, scale, combined_bias, wproj, bproj)
    out = jax.block_until_ready(out)

    ref = jax.block_until_ready(ref_forward(x, p, rel_bias, mask))
    np.testing.assert_allclose(np.asarray(out), np.asarray(ref), rtol=1e-4, atol=1e-4)

    # TODO(synk): attn_drop / proj_drop are p=0.0 (eval) and therefore omitted.
    print("KERNEL_OK")
</pallas_src>

<mosaic_0001>
module attributes {stable_mosaic.version = 11 : i64} {
  func.func @window_attention_kernel(%arg0: i32, %arg1: memref<8x16x64xf32, #tpu.memory_space<vmem>>, %arg2: memref<64x192xf32, #tpu.memory_space<vmem>>, %arg3: memref<1x192xf32, #tpu.memory_space<vmem>>, %arg4: memref<2xf32, #tpu.memory_space<smem>>, %arg5: memref<4x2x16x16xf32, #tpu.memory_space<vmem>>, %arg6: memref<64x64xf32, #tpu.memory_space<vmem>>, %arg7: memref<1x64xf32, #tpu.memory_space<vmem>>, %arg8: memref<8x16x64xf32, #tpu.memory_space<vmem>>) attributes {dimension_semantics = [#tpu.dimension_semantics<parallel>], iteration_bounds = array<i64: 4>, scalar_prefetch = 0 : i64, scratch_operands = 0 : i64, tpu.core_type = #tpu.core_type<tc>, window_params = [{transform_indices = @transform_0, window_bounds = array<i64: 8, 16, 64>}, {pipeline_mode = #tpu.pipeline_mode<synchronous>, transform_indices = @transform_1, window_bounds = array<i64: 64, 192>}, {pipeline_mode = #tpu.pipeline_mode<synchronous>, transform_indices = @transform_2, window_bounds = array<i64: 1, 192>}, {transform_indices = @transform_3, window_bounds = array<i64: 2>}, {pipeline_mode = #tpu.pipeline_mode<synchronous>, transform_indices = @transform_4, window_bounds = array<i64: 4, 2, 16, 16>}, {pipeline_mode = #tpu.pipeline_mode<synchronous>, transform_indices = @transform_5, window_bounds = array<i64: 64, 64>}, {pipeline_mode = #tpu.pipeline_mode<synchronous>, transform_indices = @transform_6, window_bounds = array<i64: 1, 64>}, {transform_indices = @transform_7, window_bounds = array<i64: 8, 16, 64>}]} {
    %c0 = arith.constant 0 : index
    %c0_0 = arith.constant 0 : index
    %c0_1 = arith.constant 0 : index
    %0 = vector.load %arg1[%c0, %c0_0, %c0_1] : memref<8x16x64xf32, #tpu.memory_space<vmem>>, vector<8x16x64xf32>
    %1 = vector.shape_cast %0 : vector<8x16x64xf32> to vector<128x64xf32>
    %c0_2 = arith.constant 0 : index
    %c0_3 = arith.constant 0 : index
    %2 = vector.load %arg2[%c0_2, %c0_3] : memref<64x192xf32, #tpu.memory_space<vmem>>, vector<64x192xf32>
    %cst = arith.constant dense<0.000000e+00> : vector<128x192xf32>
    %3 = tpu.matmul %1, %2, %cst {dimension_numbers = #tpu.dot_dimension_numbers<[1], [0], [0], [1], [0, 0, 1, 1], [], []>} : vector<128x64xf32>, vector<64x192xf32>, vector<128x192xf32> -> vector<128x192xf32>
    %c0_4 = arith.constant 0 : index
    %c0_5 = arith.constant 0 : index
    %4 = vector.load %arg3[%c0_4, %c0_5] : memref<1x192xf32, #tpu.memory_space<vmem>>, vector<1x192xf32>
    %5 = vector.broadcast %4 : vector<1x192xf32> to vector<128x192xf32>
    %6 = arith.addf %3, %5 : vector<128x192xf32>
    %c0_6 = arith.constant 0 : index
    %c0_7 = arith.constant 0 : index
    %c0_8 = arith.constant 0 : index
    %c0_9 = arith.constant 0 : index
    %7 = vector.load %arg5[%c0_6, %c0_7, %c0_8, %c0_9] : memref<4x2x16x16xf32, #tpu.memory_space<vmem>>, vector<4x2x16x16xf32>
    %8 = tpu.concatenate %7, %7 in 0 : vector<4x2x16x16xf32>, vector<4x2x16x16xf32> -> vector<8x2x16x16xf32>
    %c0_10 = arith.constant 0 : index
    %c0_11 = arith.constant 0 : index
    %9 = vector.load %arg6[%c0_10, %c0_11] : memref<64x64xf32, #tpu.memory_space<vmem>>, vector<64x64xf32>
    %10 = vector.extract_strided_slice %6 {offsets = [0, 0], sizes = [128, 32], strides = [1, 1]} : vector<128x192xf32> to vector<128x32xf32>
    %11 = vector.extract_strided_slice %6 {offsets = [0, 64], sizes = [128, 32], strides = [1, 1]} : vector<128x192xf32> to vector<128x32xf32>
    %12 = vector.extract_strided_slice %6 {offsets = [0, 128], sizes = [128, 32], strides = [1, 1]} : vector<128x192xf32> to vector<128x32xf32>
    %13 = arith.mulf %10, %10 : vector<128x32xf32>
    %cst_12 = arith.constant dense<0.000000e+00> : vector<128xf32>
    %14 = vector.multi_reduction <add>, %13, %cst_12 [1] : vector<128x32xf32> to vector<128xf32>
    %15 = vector.shape_cast %14 : vector<128xf32> to vector<128x1xf32>
    %cst_13 = arith.constant 1.000000e-24 : f32
    %16 = vector.broadcast %cst_13 : f32 to vector<128x1xf32>
    %17 = arith.maximumf %15, %16 : vector<128x1xf32>
    %18 = math.rsqrt %17 : vector<128x1xf32>
    %19 = vector.broadcast %18 : vector<128x1xf32> to vector<128x32xf32>
    %20 = arith.mulf %10, %19 : vector<128x32xf32>
    %21 = arith.mulf %11, %11 : vector<128x32xf32>
    %cst_14 = arith.constant dense<0.000000e+00> : vector<128xf32>
    %22 = vector.multi_reduction <add>, %21, %cst_14 [1] : vector<128x32xf32> to vector<128xf32>
    %23 = vector.shape_cast %22 : vector<128xf32> to vector<128x1xf32>
    %cst_15 = arith.constant 1.000000e-24 : f32
    %24 = vector.broadcast %cst_15 : f32 to vector<128x1xf32>
    %25 = arith.maximumf %23, %24 : vector<128x1xf32>
    %26 = math.rsqrt %25 : vector<128x1xf32>
    %27 = vector.broadcast %26 : vector<128x1xf32> to vector<128x32xf32>
    %28 = arith.mulf %11, %27 : vector<128x32xf32>
    %29 = vector.shape_cast %20 : vector<128x32xf32> to vector<8x16x32xf32>
    %30 = vector.shape_cast %28 : vector<128x32xf32> to vector<8x16x32xf32>
    %31 = vector.shape_cast %12 : vector<128x32xf32> to vector<8x16x32xf32>
    "tpu.trace_start"() <{level = 10 : i32, message = "bqd,bkd->bqk"}> : () -> ()
    %cst_16 = arith.constant dense<0.000000e+00> : vector<8x16x16xf32>
    %32 = tpu.matmul %29, %30, %cst_16 {dimension_numbers = #tpu.dot_dimension_numbers<[2], [2], [1], [1], [0, 0, 0, 1, 1, 1], [0], [0]>} : vector<8x16x32xf32>, vector<8x16x32xf32>, vector<8x16x16xf32> -> vector<8x16x16xf32>
    "tpu.trace_stop"() : () -> ()
    %c0_17 = arith.constant 0 : index
    %33 = memref.load %arg4[%c0_17] : memref<2xf32, #tpu.memory_space<smem>>
    %34 = vector.broadcast %33 : f32 to vector<8x16x16xf32>
    %35 = arith.mulf %32, %34 : vector<8x16x16xf32>
    %36 = vector.extract_strided_slice %8 {offsets = [0, 0, 0, 0], sizes = [8, 1, 16, 16], strides = [1, 1, 1, 1]} : vector<8x2x16x16xf32> to vector<8x1x16x16xf32>
    %37 = vector.shape_cast %36 : vector<8x1x16x16xf32> to vector<8x16x16xf32>
    %38 = arith.addf %35, %37 : vector<8x16x16xf32>
    %cst_18 = arith.constant dense<0xFF800000> : vector<8x16xf32>
    %39 = vector.multi_reduction <maximumf>, %38, %cst_18 [2] : vector<8x16x16xf32> to vector<8x16xf32>
    %40 = vector.shape_cast %39 : vector<8x16xf32> to vector<8x16x1xf32>
    %41 = vector.broadcast %40 : vector<8x16x1xf32> to vector<8x16x16xf32>
    %42 = arith.subf %38, %41 : vector<8x16x16xf32>
    %43 = math.exp %42 : vector<8x16x16xf32>
    %cst_19 = arith.constant dense<0.000000e+00> : vector<8x16xf32>
    %44 = vector.multi_reduction <add>, %43, %cst_19 [2] : vector<8x16x16xf32> to vector<8x16xf32>
    %45 = vector.shape_cast %44 : vector<8x16xf32> to vector<8x16x1xf32>
    %46 = tpu.reciprocal %45 : vector<8x16x1xf32> -> vector<8x16x1xf32>
    %47 = vector.broadcast %46 : vector<8x16x1xf32> to vector<8x16x16xf32>
    %48 = arith.mulf %43, %47 : vector<8x16x16xf32>
    "tpu.trace_start"() <{level = 10 : i32, message = "bqk,bkd->bqd"}> : () -> ()
    %cst_20 = arith.constant dense<0.000000e+00> : vector<8x16x32xf32>
    %49 = tpu.matmul %48, %31, %cst_20 {dimension_numbers = #tpu.dot_dimension_numbers<[2], [1], [1], [2], [0, 0, 0, 1, 1, 2], [0], [0]>} : vector<8x16x16xf32>, vector<8x16x32xf32>, vector<8x16x32xf32> -> vector<8x16x32xf32>
    "tpu.trace_stop"() : () -> ()
    %50 = vector.shape_cast %49 : vector<8x16x32xf32> to vector<128x32xf32>
    %51 = vector.extract_strided_slice %9 {offsets = [0, 0], sizes = [32, 64], strides = [1, 1]} : vector<64x64xf32> to vector<32x64xf32>
    %cst_21 = arith.constant dense<0.000000e+00> : vector<128x64xf32>
    %52 = tpu.matmul %50, %51, %cst_21 {dimension_numbers = #tpu.dot_dimension_numbers<[1], [0], [0], [1], [0, 0, 1, 1], [], []>} : vector<128x32xf32>, vector<32x64xf32>, vector<128x64xf32> -> vector<128x64xf32>
    %53 = vector.extract_strided_slice %6 {offsets = [0, 32], sizes = [128, 32], strides = [1, 1]} : vector<128x192xf32> to vector<128x32xf32>
    %54 = vector.extract_strided_slice %6 {offsets = [0, 96], sizes = [128, 32], strides = [1, 1]} : vector<128x192xf32> to vector<128x32xf32>
    %55 = vector.extract_strided_slice %6 {offsets = [0, 160], sizes = [128, 32], strides = [1, 1]} : vector<128x192xf32> to vector<128x32xf32>
    %56 = arith.mulf %53, %53 : vector<128x32xf32>
    %cst_22 = arith.constant dense<0.000000e+00> : vector<128xf32>
    %57 = vector.multi_reduction <add>, %56, %cst_22 [1] : vector<128x32xf32> to vector<128xf32>
    %58 = vector.shape_cast %57 : vector<128xf32> to vector<128x1xf32>
    %cst_23 = arith.constant 1.000000e-24 : f32
    %59 = vector.broadcast %cst_23 : f32 to vector<128x1xf32>
    %60 = arith.maximumf %58, %59 : vector<128x1xf32>
    %61 = math.rsqrt %60 : vector<128x1xf32>
    %62 = vector.broadcast %61 : vector<128x1xf32> to vector<128x32xf32>
    %63 = arith.mulf %53, %62 : vector<128x32xf32>
    %64 = arith.mulf %54, %54 : vector<128x32xf32>
    %cst_24 = arith.constant dense<0.000000e+00> : vector<128xf32>
    %65 = vector.multi_reduction <add>, %64, %cst_24 [1] : vector<128x32xf32> to vector<128xf32>
    %66 = vector.shape_cast %65 : vector<128xf32> to vector<128x1xf32>
    %cst_25 = arith.constant 1.000000e-24 : f32
    %67 = vector.broadcast %cst_25 : f32 to vector<128x1xf32>
    %68 = arith.maximumf %66, %67 : vector<128x1xf32>
    %69 = math.rsqrt %68 : vector<128x1xf32>
    %70 = vector.broadcast %69 : vector<128x1xf32> to vector<128x32xf32>
    %71 = arith.mulf %54, %70 : vector<128x32xf32>
    %72 = vector.shape_cast %63 : vector<128x32xf32> to vector<8x16x32xf32>
    %73 = vector.shape_cast %71 : vector<128x32xf32> to vector<8x16x32xf32>
    %74 = vector.shape_cast %55 : vector<128x32xf32> to vector<8x16x32xf32>
    "tpu.trace_start"() <{level = 10 : i32, message = "bqd,bkd->bqk"}> : () -> ()
    %cst_26 = arith.constant dense<0.000000e+00> : vector<8x16x16xf32>
    %75 = tpu.matmul %72, %73, %cst_26 {dimension_numbers = #tpu.dot_dimension_numbers<[2], [2], [1], [1], [0, 0, 0, 1, 1, 1], [0], [0]>} : vector<8x16x32xf32>, vector<8x16x32xf32>, vector<8x16x16xf32> -> vector<8x16x16xf32>
    "tpu.trace_stop"() : () -> ()
    %c1 = arith.constant 1 : index
    %76 = memref.load %arg4[%c1] : memref<2xf32, #tpu.memory_space<smem>>
    %77 = vector.broadcast %76 : f32 to vector<8x16x16xf32>
    %78 = arith.mulf %75, %77 : vector<8x16x16xf32>
    %79 = vector.extract_strided_slice %8 {offsets = [0, 1, 0, 0], sizes = [8, 1, 16, 16], strides = [1, 1, 1, 1]} : vector<8x2x16x16xf32> to vector<8x1x16x16xf32>
    %80 = vector.shape_cast %79 : vector<8x1x16x16xf32> to vector<8x16x16xf32>
    %81 = arith.addf %78, %80 : vector<8x16x16xf32>
    %cst_27 = arith.constant dense<0xFF800000> : vector<8x16xf32>
    %82 = vector.multi_reduction <maximumf>, %81, %cst_27 [2] : vector<8x16x16xf32> to vector<8x16xf32>
    %83 = vector.shape_cast %82 : vector<8x16xf32> to vector<8x16x1xf32>
    %84 = vector.broadcast %83 : vector<8x16x1xf32> to vector<8x16x16xf32>
    %85 = arith.subf %81, %84 : vector<8x16x16xf32>
    %86 = math.exp %85 : vector<8x16x16xf32>
    %cst_28 = arith.constant dense<0.000000e+00> : vector<8x16xf32>
    %87 = vector.multi_reduction <add>, %86, %cst_28 [2] : vector<8x16x16xf32> to vector<8x16xf32>
    %88 = vector.shape_cast %87 : vector<8x16xf32> to vector<8x16x1xf32>
    %89 = tpu.reciprocal %88 : vector<8x16x1xf32> -> vector<8x16x1xf32>
    %90 = vector.broadcast %89 : vector<8x16x1xf32> to vector<8x16x16xf32>
    %91 = arith.mulf %86, %90 : vector<8x16x16xf32>
    "tpu.trace_start"() <{level = 10 : i32, message = "bqk,bkd->bqd"}> : () -> ()
    %cst_29 = arith.constant dense<0.000000e+00> : vector<8x16x32xf32>
    %92 = tpu.matmul %91, %74, %cst_29 {dimension_numbers = #tpu.dot_dimension_numbers<[2], [1], [1], [2], [0, 0, 0, 1, 1, 2], [0], [0]>} : vector<8x16x16xf32>, vector<8x16x32xf32>, vector<8x16x32xf32> -> vector<8x16x32xf32>
    "tpu.trace_stop"() : () -> ()
    %93 = vector.shape_cast %92 : vector<8x16x32xf32> to vector<128x32xf32>
    %94 = vector.extract_strided_slice %9 {offsets = [32, 0], sizes = [32, 64], strides = [1, 1]} : vector<64x64xf32> to vector<32x64xf32>
    %cst_30 = arith.constant dense<0.000000e+00> : vector<128x64xf32>
    %95 = tpu.matmul %93, %94, %cst_30 {dimension_numbers = #tpu.dot_dimension_numbers<[1], [0], [0], [1], [0, 0, 1, 1], [], []>} : vector<128x32xf32>, vector<32x64xf32>, vector<128x64xf32> -> vector<128x64xf32>
    %96 = arith.addf %52, %95 : vector<128x64xf32>
    %c0_31 = arith.constant 0 : index
    %c0_32 = arith.constant 0 : index
    %97 = vector.load %arg7[%c0_31, %c0_32] : memref<1x64xf32, #tpu.memory_space<vmem>>, vector<1x64xf32>
    %98 = vector.broadcast %97 : vector<1x64xf32> to vector<128x64xf32>
    %99 = arith.addf %96, %98 : vector<128x64xf32>
    %100 = vector.shape_cast %99 : vector<128x64xf32> to vector<8x16x64xf32>
    %c0_33 = arith.constant 0 : index
    %c0_34 = arith.constant 0 : index
    %c0_35 = arith.constant 0 : index
    %101 = vector.load %arg8[%c0_33, %c0_34, %c0_35] : memref<8x16x64xf32, #tpu.memory_space<vmem>>, vector<8x16x64xf32>
    tpu.vector_store %arg8[%c0_33, %c0_34, %c0_35], %100 {strides = array<i32>} : memref<8x16x64xf32, #tpu.memory_space<vmem>>, vector<8x16x64xf32>,
    return
  }
  func.func @transform_0(%arg0: i32) -> (i32, i32, i32) {
    %c0_i32 = arith.constant 0 : i32
    %c0_i32_0 = arith.constant 0 : i32
    %c0_i32_1 = arith.constant 0 : i32
    return %arg0, %c0_i32, %c0_i32_0 : i32, i32, i32
  }
  func.func @transform_1(%arg0: i32) -> (i32, i32) {
    %c0_i32 = arith.constant 0 : i32
    %c0_i32_0 = arith.constant 0 : i32
    %c0_i32_1 = arith.constant 0 : i32
    return %c0_i32, %c0_i32_0 : i32, i32
  }
  func.func @transform_2(%arg0: i32) -> (i32, i32) {
    %c0_i32 = arith.constant 0 : i32
    %c0_i32_0 = arith.constant 0 : i32
    %c0_i32_1 = arith.constant 0 : i32
    return %c0_i32, %c0_i32_0 : i32, i32
  }
  func.func @transform_3(%arg0: i32) -> i32 {
    %c0_i32 = arith.constant 0 : i32
    %c0_i32_0 = arith.constant 0 : i32
    return %c0_i32 : i32
  }
  func.func @transform_4(%arg0: i32) -> (i32, i32, i32, i32) {
    %c0_i32 = arith.constant 0 : i32
    %c0_i32_0 = arith.constant 0 : i32
    %c0_i32_1 = arith.constant 0 : i32
    %c0_i32_2 = arith.constant 0 : i32
    %c0_i32_3 = arith.constant 0 : i32
    return %c0_i32, %c0_i32_0, %c0_i32_1, %c0_i32_2 : i32, i32, i32, i32
  }
  func.func @transform_5(%arg0: i32) -> (i32, i32) {
    %c0_i32 = arith.constant 0 : i32
    %c0_i32_0 = arith.constant 0 : i32
    %c0_i32_1 = arith.constant 0 : i32
    return %c0_i32, %c0_i32_0 : i32, i32
  }
  func.func @transform_6(%arg0: i32) -> (i32, i32) {
    %c0_i32 = arith.constant 0 : i32
    %c0_i32_0 = arith.constant 0 : i32
    %c0_i32_1 = arith.constant 0 : i32
    return %c0_i32, %c0_i32_0 : i32, i32
  }
  func.func @transform_7(%arg0: i32) -> (i32, i32, i32) {
    %c0_i32 = arith.constant 0 : i32
    %c0_i32_0 = arith.constant 0 : i32
    %c0_i32_1 = arith.constant 0 : i32
    return %arg0, %c0_i32, %c0_i32_0 : i32, i32, i32
  }
}

</mosaic_0001>

<bundles_post_ra>
// kernel: tpu_custom_call.1
= control target key start
LH: loop header
LB: loop body
LE: loop exit
PB: predicated region body
PF: predicated region fallthrough
CT: control target
= control target key end

     0   :  { %s8254_s0 = inlined_call_operand.hbm [shape: f32[32,16,64], index: 0, kind: input, shape index: {}]   ;;  %s8255_s1 = inlined_call_operand.hbm [shape: f32[64,192], index: 1, kind: input, shape index: {}]   ;;  %s8256_s2 = inlined_call_operand.vmem [shape: f32[1,192], index: 2, kind: input, shape index: {}]   ;;  %s8257_s3 = inlined_call_operand.vmem [shape: f32[2], index: 3, kind: input, shape index: {}]   ;;  %s8258_s4 = inlined_call_operand.hbm [shape: f32[4,2,16,16], index: 4, kind: input, shape index: {}]   ;;  %s8259_s5 = inlined_call_operand.hbm [shape: f32[64,64], index: 5, kind: input, shape index: {}]   ;;  %s8260_s6 = inlined_call_operand.vmem [shape: f32[1,64], index: 6, kind: input, shape index: {}]   ;;  %s8261_s7 = inlined_call_operand.hbm [shape: f32[32,16,64], index: 7, kind: output, shape index: {}]  }
   0x1   :  { %8291 = sst [smem:[#allocation43_spill]] %s8255_s1 }
   0x2   :  { %12 = vsyncpa [#allocation3], 0 }
   0x3   :  { %14 = vsyncpa [#allocation3 + $0x1], 0 }
   0x4   :  { %15 = vsyncpa [#allocation7], 0 }
   0x5   :  { %16 = vsyncpa [#allocation5], 0 }
   0x6   :  { %17 = vsyncpa [#allocation11], 0 }
   0x7   :  { %18 = vsyncpa [#allocation4], 0 }
   0x8   :  { %20 = vsyncpa [#allocation4 + $0x1], 0  ;;  %s6600_s24 = smov 0   ;;  %s6602_s25 = smov 0  }
   0x9   :  { %s6604_s26 = smov 0   ;;  %s6606_s27 = smov 0  }
   0xa LB: > { %s6621_s28 = sadd.s32 4294967295, %s6542_s27   ;;  %s5020_s29 = sadd.s32 4294967294, %s6542_s27   ;;  %s6542_s27 = sphi %s6606_s27, %s8373_s27   ;;  %s6538_s26 = sphi %s6604_s26, %s8372_s26   ;;  %s6534_s25 = sphi %s6602_s25, %s8371_s25   ;;  %s6530_s24 = sphi %s6600_s24, %s8370_s24  }
   0xb   : > { %p46_p0 = scmp.ne.s32.totalorder %s6534_s25, %s6530_s24  ;;  %p8262_p1 = scmp.eq.s32.totalorder %s6621_s28, 0 }
   0xc   : > { %p202_p3 = scmp.eq.s32.totalorder %s5020_s29, 3  ;;  %p5021_p5 = scmp.ge.s32.totalorder %s6542_s27, 1 }
   0xd   : > { %p6630_p4 = por %p8262_p1, %p46_p0  ;;  %p209_p7 = scmp.lt.s32.totalorder %s6542_s27, 5 }
   0xe   : > { %p6635_p6 = por %p202_p3, %p46_p0  ;;  %s6544_s10 = smov [#allocation6]  }
   0xf   : > { %s8292_s30 = scalar_select %p6630_p4, 1, 0 }
  0x10   : > { %s8293_s8 = scalar_select %p6635_p6, 1, 0 }
  0x11   : > { %p6640_p8 = pnand %p5021_p5, %p209_p7  ;;  %s221_s11 = sshll.u32 %s6544_s10, 4  ;;  %s6644_s11 = int_to_ptr.vmem [resolvable:$true] %s221_s11 }
  0x12   : > { %s238_s14 = sshll.u32 %s8257_s3, 4  ;;  %s6545_s16 = smov [#allocation9]   ;;  %s6657_s14 = int_to_ptr.vmem [resolvable:$true] %s238_s14 }
  0x13   : > { %s8294_s9 = scalar_select %p6640_p8, 1, 0 }
  0x14   : > { %p5878_p9 = pneg %p6640_p8  ;;  %s6659_s17 = sshll.u32 %s6545_s16, 4  ;;  %s249_s17 = int_to_ptr.vmem [resolvable:$true] %s6659_s17 }
  0x15   : > { %s8296_s1 = sld [smem:[#allocation43_spill]] }
  0x16   : > { %p6653_p10 = pnand %p5878_p9, %p8262_p1 }
  0x18   : > { %p6669_p12 = pneg %p6653_p10 }
  0x1b   : > { %s6331_s20 = scalar_lea.hbm %s8296_s1, 2048 }
  0x1c   : > { %p6332_p11 = scmp.ne.s32.totalorder %s8296_s1, %s6331_s20  ;;  %p6338_p3 = scmp.lt.u32.totalorder %s6331_s20, %s8296_s1 }
  0x1e   : > { %p6334_p13 = pnand %p6669_p12, %p6332_p11 }
  0x20   : > { %p6335_p0 = pneg %p6334_p13 }
  0x22   : > { %p6340_p5 = pnand %p6338_p3, %p6335_p0 }
  0x24   : > { %6343 = shalt.err (!%p6340_p5)
}
  0x25   : > { %s6344_s12 = scalar_lea.vmem %s6644_s11, 2048  ;;  %p6352_p2 = scmp.lt.s32.totalorder %s6644_s11, %s6644_s11 }
  0x26   : > { %p6345_p7 = scmp.ne.s32.totalorder %s6644_s11, %s6344_s12  ;;  %p6353_p6 = scmp.lt.s32.totalorder %s6344_s12, %s6344_s12 }
  0x28   : > { %p6347_p9 = pnand %p6345_p7, %p6669_p12  ;;  %p6354_p11 = por %p6353_p6, %p6352_p2 }
  0x2a   : > { %p6348_p1 = pneg %p6347_p9 }
  0x2c   : > { %p6355_p13 = pnand %p6354_p11, %p6348_p1 }
  0x2e   : > { %6358 = shalt.err (!%p6355_p13)
}
  0x2f   : > { %s6546_s13 = smov 256   ;;  %s6547_s16 = smov 16  }
  0x30   : > { %5881 = dma.hbm_to_vmem [thread:$0]  (!%p6653_p10), %s8296_s1, 2048, %s6644_s11, [#allocation7], %s6546_s13, %s6546_s13, %s6547_s16  }
  0x31   : > { %s6359_s20 = scalar_lea.vmem %s6657_s14, 16  ;;  %p6367_p1 = scmp.lt.s32.totalorder %s6657_s14, %s6657_s14 }
  0x32   : > { %p6360_p0 = scmp.ne.s32.totalorder %s6657_s14, %s6359_s20  ;;  %p6368_p6 = scmp.lt.s32.totalorder %s6359_s20, %s6359_s20 }
  0x34   : > { %p6362_p3 = pnand %p6360_p0, %p6669_p12  ;;  %p6369_p5 = por %p6368_p6, %p6367_p1 }
  0x36   : > { %p6363_p2 = pneg %p6362_p3 }
  0x38   : > { %p6370_p7 = pnand %p6369_p5, %p6363_p2 }
  0x3a   : > { %6373 = shalt.err (!%p6370_p7)
}
  0x3b   : > { %s6548_s21 = smov [#allocation8]   ;;  %s6374_s29 = scalar_lea.hbm %s8258_s4, 2048 }
  0x3c   : > { %5884 = dma.vmem_to_smem (!%p6653_p10), %s6657_s14, 16, %s6548_s21, [#allocation5]  }
  0x3d   : > { %p6375_p9 = scmp.ne.s32.totalorder %s8258_s4, %s6374_s29  ;;  %p6381_p0 = scmp.lt.u32.totalorder %s6374_s29, %s8258_s4 }
  0x3f   : > { %p6377_p11 = pnand %p6375_p9, %p6669_p12 }
  0x41   : > { %p6378_p13 = pneg %p6377_p11 }
  0x43   : > { %p6383_p3 = pnand %p6381_p0, %p6378_p13 }
  0x45   : > { %6386 = shalt.err (!%p6383_p3)
}
  0x46   : > { %s6387_s18 = scalar_lea.vmem %s249_s17, 2048  ;;  %p6395_p5 = scmp.lt.s32.totalorder %s249_s17, %s249_s17 }
  0x47   : > { %p6388_p2 = scmp.ne.s32.totalorder %s249_s17, %s6387_s18  ;;  %p6396_p7 = scmp.lt.s32.totalorder %s6387_s18, %s6387_s18 }
  0x49   : > { %p6390_p1 = pnand %p6388_p2, %p6669_p12  ;;  %p6397_p4 = por %p6396_p7, %p6395_p5 }
  0x4b   : > { %p6391_p6 = pneg %p6390_p1 }
  0x4d   : > { %p6398_p8 = pnand %p6397_p4, %p6391_p6 }
  0x4f   : > { %6401 = shalt.err (!%p6398_p8)
}
  0x50   : > { %s6549_s14 = smov 128   ;;  %s6550_s19 = smov 8  }
  0x51   : > { %5887 = dma.hbm_to_vmem [thread:$0]  (!%p6653_p10), %s8258_s4, 2048, %s249_s17, [#allocation7], %s6549_s14, %s6549_s14, %s6550_s19  }
  0x52   : > { %s6551_s11 = smov [#allocation10]   ;;  %s6402_s12 = scalar_lea.hbm %s8259_s5, 1024 }
  0x53   : > { %s261_s22 = sshll.u32 %s6551_s11, 4  ;;  %p6403_p4 = scmp.ne.s32.totalorder %s8259_s5, %s6402_s12  ;;  %s262_s22 = int_to_ptr.vmem [resolvable:$true] %s261_s22 }
  0x54   : > { %p6409_p11 = scmp.lt.u32.totalorder %s6402_s12, %s8259_s5 }
  0x55   : > { %p6405_p8 = pnand %p6403_p4, %p6669_p12 }
  0x57   : > { %p6406_p9 = pneg %p6405_p8 }
  0x59   : > { %p6411_p13 = pnand %p6409_p11, %p6406_p9 }
  0x5b   : > { %6414 = shalt.err (!%p6411_p13)
}
  0x5c   : > { %s6415_s17 = scalar_lea.vmem %s262_s22, 1024  ;;  %p6423_p1 = scmp.lt.s32.totalorder %s262_s22, %s262_s22 }
  0x5d   : > { %p6416_p0 = scmp.ne.s32.totalorder %s262_s22, %s6415_s17  ;;  %p6424_p6 = scmp.lt.s32.totalorder %s6415_s17, %s6415_s17 }
  0x5f   : > { %p6418_p3 = pnand %p6416_p0, %p6669_p12  ;;  %p6425_p5 = por %p6424_p6, %p6423_p1 }
  0x61   : > { %p6419_p2 = pneg %p6418_p3 }
  0x63   : > { %p6426_p7 = pnand %p6425_p5, %p6419_p2 }
  0x65   : > { %6429 = shalt.err (!%p6426_p7)
}
  0x66   : > { %5890 = dma.hbm_to_vmem [thread:$0]  (!%p6653_p10), %s8259_s5, 1024, %s262_s22, [#allocation11], %s6549_s14, %s6549_s14, %s6550_s19  }
  0x67   : > { %s6743_s23 = sadd.s32 1, %s6542_s27   ;;  %s33_s15 = sadd.s32 1, %s6538_s26 }
  0x68   : > { %s30_s21 = ssub.s32 %s6542_s27, %s6743_s23  ;;  %p40_p12 = scmp.ne.s32.totalorder %s6538_s26, %s6534_s25 }
  0x69   : > { %p31_p4 = scmp.eq.s32.totalorder %s30_s21, 0  ;;  %p41_p8 = scmp.eq.s32.totalorder %s6542_s27, 0 }
  0x6a   : > { %p8298_p9 = scmp.eq.s32.totalorder %s6621_s28, 3  ;;  %p5903_p13 = scmp.lt.s32.totalorder %s6542_s27, 4 }
  0x6b   : > { %s6759_s29 = scalar_select %p31_p4, %s6538_s26, %s33_s15  }
  0x6c   : > { %p6753_p11 = por %p8298_p9, %p40_p12  ;;  %p42_p0 = por %p41_p8, %p40_p12 }
  0x6d   : > { %s278_s10 = sand.u32 1, %s6538_s26   ;;  %s5191_s22 = sshll.u32 %s6542_s27, 11 }
  0x6e   : > { %s5027_s12 = sshll.u32 %s278_s10, 7  ;;  %s6766_s18 = scalar_lea.hbm %s8254_s0, %s5191_s22 }
  0x6f   : > { %s282_s17 = scalar_lea.vmem [#allocation2], %s5027_s12  ;;  %p6770_p10 = pnand %p5903_p13, %p42_p0 }
  0x70   : > { %s290_s1 = sshll.u32 %s282_s17, 4  ;;  %s6774_s15 = scalar_lea.sflag [#allocation3], %s278_s10  ;;  %s6768_s1 = int_to_ptr.vmem [resolvable:$true] %s290_s1 }
  0x71   : > { %s6430_s21 = scalar_lea.hbm %s6766_s18, 2048  ;;  %p6432_p2 = pneg %p6770_p10 }
  0x72   : > { %p6431_p3 = scmp.ne.s32.totalorder %s6766_s18, %s6430_s21  ;;  %s6435_s13 = scalar_lea.hbm %s8254_s0, 8192 }
  0x73   : > { %p6436_p5 = scmp.lt.u32.totalorder %s6766_s18, %s8254_s0  ;;  %p6437_p7 = scmp.lt.u32.totalorder %s6435_s13, %s6430_s21 }
  0x74   : > { %p6433_p1 = pnand %p6432_p2, %p6431_p3  ;;  %p6439_p4 = scmp.lt.u32.totalorder %s6430_s21, %s6766_s18 }
  0x75   : > { %p6438_p12 = por %p6437_p7, %p6436_p5 }
  0x76   : > { %p6434_p6 = pneg %p6433_p1 }
  0x77   : > { %p6440_p8 = por %p6439_p4, %p6438_p12 }
  0x79   : > { %p6441_p9 = pnand %p6440_p8, %p6434_p6 }
  0x7b   : > { %6444 = shalt.err (!%p6441_p9)
}
  0x7c   : > { %s6445_s10 = scalar_lea.vmem %s6768_s1, 2048  ;;  %s6552_s12 = smov [#allocation2]  }
  0x7d   : > { %p6446_p13 = scmp.ne.s32.totalorder %s6768_s1, %s6445_s10  ;;  %s6450_s22 = sshll.u32 %s6552_s12, 4  ;;  %s6451_s22 = int_to_ptr.vmem [resolvable:$false] %s6450_s22 }
  0x7e   : > { %s6452_s16 = scalar_lea.vmem %s6451_s22, 4096  ;;  %p6453_p1 = scmp.lt.s32.totalorder %s6768_s1, %s6451_s22 }
  0x7f   : > { %p6448_p0 = pnand %p6446_p13, %p6432_p2  ;;  %p6454_p5 = scmp.lt.s32.totalorder %s6452_s16, %s6445_s10 }
  0x81   : > { %p6449_p3 = pneg %p6448_p0  ;;  %p6455_p7 = por %p6454_p5, %p6453_p1 }
  0x83   : > { %p6456_p12 = pnand %p6455_p7, %p6449_p3 }
  0x85   : > { %6459 = shalt.err (!%p6456_p12)
}
  0x86   : > { %5894 = dma.hbm_to_vmem [thread:$0]  (!%p6770_p10), %s6766_s18, 2048, %s6768_s1, %s6774_s15, %s6549_s14, %s6549_s14, %s6550_s19  }
  0x87   : > { %p8301_p2 = scmp.ne.s32.totalorder %s8294_s9, 0 }
  0x89   : > { %302 = sbr.rel (%p8301_p2) target bundleno = 2599 (0xa27), region = 48 }
  0x90   : > { %s6808_s21 = sand.u32 1, %s6534_s25   ;;  %p8302_p6 = scmp.ne.s32.totalorder %s8292_s30, 0 }
  0x91   : > { %s5032_s13 = sshll.u32 %s6808_s21, 7  ;;  %s305_s17 = scalar_lea.sflag [#allocation3], %s6808_s21 }
  0x92   : > { %s6814_s20 = scalar_lea.vmem [#allocation2], %s5032_s13 }
  0x93   : > { %6505 = dma.done.wait (%p8302_p6), %s305_s17, 2048  }
  0x94   : > { %6507 = vsyncadd (%p8302_p6), %s305_s17, 4294965248  ;;  %p8303_p10 = scmp.eq.s32.totalorder %s6621_s28, 0 }
  0x96   : > { %6509 = dma.done.wait (%p8303_p10), [#allocation7], 2048   ;;  %p8304_p4 = pmov %p8303_p10 }
  0x98   : > { %6511 = vsyncadd (%p8304_p4), [#allocation7], 4294965248  ;;  %p8305_p8 = pmov %p8304_p4 }
  0x99   : > { %p8306_p9 = pmov %p8304_p4 }
  0x9a   : > { %6513 = dma.done.wait (%p8305_p8), [#allocation5], 16  }
  0x9b   : > { %6515 = vsyncadd (%p8306_p9), [#allocation5], 4294967280  ;;  %p8307_p13 = pmov %p8304_p4 }
  0x9c   : > { %p8308_p0 = pmov %p8304_p4 }
  0x9d   : > { %6517 = dma.done.wait (%p8307_p13), [#allocation7], 2048  }
  0x9e   : > { %6519 = vsyncadd (%p8308_p0), [#allocation7], 4294965248  ;;  %p8309_p3 = pmov %p8308_p0 }
  0x9f   : > { %p8310_p1 = pmov %p8308_p0 }
  0xa0   : > { %6521 = dma.done.wait (%p8309_p3), [#allocation11], 1024  }
  0xa1   : > { %6523 = vsyncadd (%p8310_p1), [#allocation11], 4294966272 }
  0xa2   : > { %329 = sfence }
  0xa3   : > { %v375_v0 = vld [vmem:[#allocation6 + $0x8] sm:$0xff]  ;;  %v377_v1 = vld [vmem:[#allocation6 + $0x18] sm:$0xff]  ;;  %v374_v2 = vld [vmem:[#allocation6] sm:$0xff]  ;;  %v6553_v7 = vmov 0.0   ;;  %vm402_vm0 = vcmask 523264   ;;  %v392_v41 = vlaneseq  ;;  %vm652_vm1 = vcmask 261120  }
  0xa4   : > { %v5650_v3 = vpack.c.bf16 %v377_v1, %v375_v0  ;;  %v376_v4 = vld [vmem:[#allocation6 + $0x10] sm:$0xff]  ;;  %v379_v5 = vld [vmem:[#allocation6 + $0x28] sm:$0xff]  ;;  %v381_v6 = vld [vmem:[#allocation6 + $0x38] sm:$0xff]  ;;  %515 = vmatprep.mubr.f32.mxu0 %v6553_v7  ;;  %s6554_s14 = smov 64   ;;  %s6555_s19 = smov 32   ;;  %vm1671_vm3 = vcmask 130048  }
  0xa5   : > { %v5652_v8 = vpack.c.bf16 %v376_v4, %v374_v2  ;;  %v5654_v9 = vpack.c.bf16 %v381_v6, %v379_v5  ;;  %v378_v10 = vld [vmem:[#allocation6 + $0x20] sm:$0xff]  ;;  %v380_v11 = vld [vmem:[#allocation6 + $0x30] sm:$0xff]  ;;  %v383_v12 = vld [vmem:[#allocation6 + $0x48] sm:$0xff]  ;;  %v393_v42 = vshrl.u32 %v392_v41, 7  ;;  %s6556_s18 = smov 96   ;;  %s1637_s1 = sld [smem:[#allocation8]] }
  0xa6   : > { %5651 = vmatprep.subr.bf16.mxu0 %v5650_v3  ;;  %v385_v13 = vld [vmem:[#allocation6 + $0x58] sm:$0xff]  ;;  %v5656_v14 = vpack.c.bf16 %v380_v11, %v378_v10  ;;  %v382_v16 = vld [vmem:[#allocation6 + $0x40] sm:$0xff]  ;;  %v384_v17 = vld [vmem:[#allocation6 + $0x50] sm:$0xff]  ;;  %s5134_s15 = sld [smem:[#allocation8 + $0x1]]  ;;  %s8155_s22 = scalar_lea.vmem [#allocation12], %s5032_s13 }
  0xa7   : > { %5653 = vmatpush1.bf16.msra.mxu0 %v5652_v8  ;;  %v5658_v15 = vpack.c.bf16 %v385_v13, %v383_v12  ;;  %v387_v18 = vld [vmem:[#allocation6 + $0x68] sm:$0xff]  ;;  %v389_v19 = vld [vmem:[#allocation6 + $0x78] sm:$0xff]  ;;  %v5660_v20 = vpack.c.bf16 %v384_v17, %v382_v16  ;;  %v386_v22 = vld [vmem:[#allocation6 + $0x60] sm:$0xff]  ;;  %v394_v43 = vsub.s32 0, %v393_v42  ;;  %v398_v46 = vsub.s32 1, %v393_v42  ;;  %s5193_s16 = sshll.u32 %s6621_s28, 11 }
  0xa8   : > { %5655 = vmatprep.subr.bf16.mxu0 %v5654_v9  ;;  %v5662_v21 = vpack.c.bf16 %v389_v19, %v387_v18  ;;  %v388_v23 = vld [vmem:[#allocation6 + $0x70] sm:$0xff]  ;;  %v358_v25 = vld [vmem:[%s6814_s20] sm:$0xff]  ;;  %v359_v26 = vld [vmem:[%s6814_s20 + $0x8] sm:$0xff]  ;;  %s4906_s13 = sshll.u32 %s8155_s22, 4  ;;  %s8204_s30 = scalar_lea.hbm %s8261_s7, %s5193_s16  ;;  %s8206_s13 = int_to_ptr.vmem [resolvable:$true] %s4906_s13 }
  0xa9   : > { %v5664_v24 = vpack.c.bf16 %v388_v23, %v386_v22  ;;  %v360_v27 = vld [vmem:[%s6814_s20 + $0x10] sm:$0xff]  ;;  %v361_v28 = vld [vmem:[%s6814_s20 + $0x18] sm:$0xff]  ;;  %v362_v29 = vld [vmem:[%s6814_s20 + $0x20] sm:$0xff]  ;;  %s4892_s28 = scalar_lea.sflag [#allocation4], %s6808_s21  ;;  %s6460_s9 = scalar_lea.vmem %s8206_s13, 2048 }
  0xaa   : > { %v363_v30 = vld [vmem:[%s6814_s20 + $0x28] sm:$0xff]  ;;  %v364_v31 = vld [vmem:[%s6814_s20 + $0x30] sm:$0xff]  ;;  %v365_v32 = vld [vmem:[%s6814_s20 + $0x38] sm:$0xff]  ;;  %p6461_p5 = scmp.ne.s32.totalorder %s8206_s13, %s6460_s9 }
  0xab   : > { %5657 = vmatpush1.bf16.msra.mxu0 %v5656_v14  ;;  %v366_v33 = vld [vmem:[%s6814_s20 + $0x40] sm:$0xff]  ;;  %v367_v34 = vld [vmem:[%s6814_s20 + $0x48] sm:$0xff]  ;;  %v368_v35 = vld [vmem:[%s6814_s20 + $0x50] sm:$0xff] }
  0xac   : > { %5659 = vmatprep.subr.bf16.mxu0 %v5658_v15  ;;  %v369_v36 = vld [vmem:[%s6814_s20 + $0x58] sm:$0xff]  ;;  %v370_v37 = vld [vmem:[%s6814_s20 + $0x60] sm:$0xff]  ;;  %v371_v38 = vld [vmem:[%s6814_s20 + $0x68] sm:$0xff]  ;;  %p6462_p7 = pnand %p6461_p5, %p6753_p11 }
  0xad   : > { %v372_v39 = vld [vmem:[%s6814_s20 + $0x70] sm:$0xff]  ;;  %v373_v40 = vld [vmem:[%s6814_s20 + $0x78] sm:$0xff]  ;;  %v390_v44 = vld [vmem:[%s8256_s2] sm:$0x3] }
  0xae   : > { %v6887_v45 = vrot.slane %v390_v44, %v394_v43  ;;  %v6892_v50 = vrot.slane %v390_v44, %v398_v46  ;;  %vm7241_vm2 = vmpackc.low %vm652_vm1, %vm652_vm1  ;;  %p6463_p12 = pneg %p6462_p7 }
  0xaf   : > { %5661 = vmatpush1.bf16.msra.mxu0 %v5660_v20 }
  0xb0   : > { %5663 = vmatprep.subr.bf16.mxu0 %v5662_v21 }
  0xb3   : > { %5665 = vmatpush1.bf16.msra.mxu0 %v5664_v24 }
  0xb6   : > { %5038 = vmatmul.mubr.msk.f32.vlgmr.msra.gmra.mrb[0].mxu0 %vm402_vm0, %v358_v25 }
  0xb7   : > { %521 = vmatprep.mubr.f32.mxu0 %v6553_v7 }
  0xba   : > { %5039 = vmatmul.mubr.msk.f32.gmra.mrb[2].mxu0 %vm402_vm0, %v359_v26 }
  0xbb   : > { %527 = vmatprep.mubr.f32.mxu0 %v6553_v7 }
  0xbe   : > { %5040 = vmatmul.mubr.msk.f32.gmra.mrb[4].mxu0 %vm402_vm0, %v360_v27 }
  0xbf   : > { %533 = vmatprep.mubr.f32.mxu0 %v6553_v7 }
  0xc2   : > { %5041 = vmatmul.mubr.msk.f32.gmra.mrb[6].mxu0 %vm402_vm0, %v361_v28 }
  0xc3   : > { %539 = vmatprep.mubr.f32.mxu0 %v6553_v7 }
  0xc6   : > { %5042 = vmatmul.mubr.msk.f32.gmra.mrb[8].mxu0 %vm402_vm0, %v362_v29 }
  0xc7   : > { %545 = vmatprep.mubr.f32.mxu0 %v6553_v7 }
  0xca   : > { %5043 = vmatmul.mubr.msk.f32.gmra.mrb[10].mxu0 %vm402_vm0, %v363_v30 }
  0xcb   : > { %551 = vmatprep.mubr.f32.mxu0 %v6553_v7 }
  0xce   : > { %5044 = vmatmul.mubr.msk.f32.gmra.mrb[12].mxu0 %vm402_vm0, %v364_v31 }
  0xcf   : > { %557 = vmatprep.mubr.f32.mxu0 %v6553_v7 }
  0xd2   : > { %5045 = vmatmul.mubr.msk.f32.gmra.mrb[14].mxu0 %vm402_vm0, %v365_v32 }
  0xd3   : > { %563 = vmatprep.mubr.f32.mxu0 %v6553_v7 }
  0xd6   : > { %5046 = vmatmul.mubr.msk.f32.gmra.mrb[16].mxu0 %vm402_vm0, %v366_v33 }
  0xd7   : > { %569 = vmatprep.mubr.f32.mxu0 %v6553_v7 }
  0xda   : > { %5047 = vmatmul.mubr.msk.f32.gmra.mrb[18].mxu0 %vm402_vm0, %v367_v34 }
  0xdb   : > { %575 = vmatprep.mubr.f32.mxu0 %v6553_v7 }
  0xde   : > { %5048 = vmatmul.mubr.msk.f32.gmra.mrb[20].mxu0 %vm402_vm0, %v368_v35 }
  0xdf   : > { %581 = vmatprep.mubr.f32.mxu0 %v6553_v7 }
  0xe2   : > { %5049 = vmatmul.mubr.msk.f32.gmra.mrb[22].mxu0 %vm402_vm0, %v369_v36 }
  0xe3   : > { %587 = vmatprep.mubr.f32.mxu0 %v6553_v7 }
  0xe6   : > { %5050 = vmatmul.mubr.msk.f32.gmra.mrb[24].mxu0 %vm402_vm0, %v370_v37 }
  0xe7   : > { %593 = vmatprep.mubr.f32.mxu0 %v6553_v7 }
  0xea   : > { %5051 = vmatmul.mubr.msk.f32.gmra.mrb[26].mxu0 %vm402_vm0, %v371_v38 }
  0xeb   : > { %599 = vmatprep.mubr.f32.mxu0 %v6553_v7 }
  0xee   : > { %5052 = vmatmul.mubr.msk.f32.gmra.mrb[28].mxu0 %vm402_vm0, %v372_v39 }
  0xef   : > { %605 = vmatprep.mubr.f32.mxu0 %v6553_v7 }
  0xf2   : > { %5053 = vmatmul.mubr.msk.f32.gmra.mrb[30].mxu0 %vm402_vm0, %v373_v40 }
 0x189   : > { %v517_v47 = vpop.f32.mrb[0].mxu0 }
 0x18a   : > { %v6890_v48 = vadd.f32 %v517_v47, %v6887_v45  ;;  %v519_v49 = vpop.f32.mrb[1].mxu0 }
 0x18b   : > { %v6906_v56 = vadd.f32 %v519_v49, %v6892_v50 }
 0x18c   : > { %8311 = vst [vmem:[#allocation19_spill] sm:$0xff] %v6890_v48  ;;  %v6896_v51 = vmul.f32 %v6890_v48, %v6890_v48 }
 0x18d   : > { %v523_v52 = vpop.f32.mrb[2].mxu0  ;;  %8312 = vst [vmem:[#allocation20_spill] sm:$0xff] %v6906_v56 }
 0x18e   : > { %v6899_v53 = vadd.f32 %v523_v52, %v6887_v45  ;;  %v525_v54 = vpop.f32.mrb[3].mxu0  ;;  %765 = vrot.lane.b32.xlu0 %v6896_v51, %s6554_s14  ;;  %v653_v55 = vsel %vm652_vm1, %v6896_v51, 0.0 }
 0x18f   : > { %v6909_v57 = vadd.f32 %v525_v54, %v6892_v50  ;;  %654 = vadd.xlane.f32.xlu1 %v653_v55 }
 0x190   : > { %v6913_v58 = vmul.f32 %v6899_v53, %v6899_v53 }
 0x191   : > { %8313 = vst [vmem:[#allocation21_spill] sm:$0xff] %v6909_v57  ;;  %v6919_v60 = vpack.c.bf16 %v6909_v57, %v6906_v56  ;;  %v529_v61 = vpop.f32.mrb[4].mxu0 }
 0x192   : > { %767 = vrot.lane.b32.xlu0 %v6913_v58, %s6554_s14  ;;  %v531_v62 = vpop.f32.mrb[5].mxu0  ;;  %v6930_v3 = vadd.f32 %v529_v61, %v6887_v45  ;;  %v656_v36 = vsel %vm652_vm1, %v6913_v58, 0.0 }
 0x193   : > { %v6924_v63 = vadd.f32 %v531_v62, %v6892_v50 }
 0x194   : > { %v6942_v8 = vmul.f32 %v6930_v3, %v6930_v3 }
 0x195   : > { %8314 = vst [vmem:[#allocation22_spill] sm:$0xff] %v6924_v63  ;;  %v535_v0 = vpop.f32.mrb[6].mxu0 }
 0x196   : > { %v537_v1 = vpop.f32.mrb[7].mxu0  ;;  %v6978_v27 = vadd.f32 %v535_v0, %v6887_v45 }
 0x197   : > { %v6927_v2 = vadd.f32 %v537_v1, %v6892_v50 }
 0x198   : > { %v6988_v32 = vmul.f32 %v6978_v27, %v6978_v27 }
 0x199   : > { %8315 = vst [vmem:[#allocation23_spill] sm:$0xff] %v6927_v2  ;;  %v6936_v5 = vpack.c.bf16 %v6927_v2, %v6924_v63  ;;  %v6938_v6 = vpop.f32.mrb[8].mxu0 }
 0x19a   : > { %v543_v7 = vpop.f32.mrb[9].mxu0  ;;  %v662_v40 = vsel %vm652_vm1, %v6988_v32, 0.0 }
 0x19b   : > { %8316 = vst [vmem:[#allocation24_spill] sm:$0xff] %v6936_v5  ;;  %v6945_v9 = vadd.f32 %v543_v7, %v6892_v50 }
 0x19d   : > { %8317 = vst [vmem:[#allocation25_spill] sm:$0xff] %v6945_v9  ;;  %v547_v10 = vpop.f32.mrb[10].mxu0 }
 0x19e   : > { %v6948_v11 = vadd.f32 %v547_v10, %v6887_v45  ;;  %v549_v12 = vpop.f32.mrb[11].mxu0 }
 0x19f   : > { %v6951_v13 = vadd.f32 %v549_v12, %v6892_v50 }
 0x1a0   : > { %769 = vrot.lane.b32.xlu1 %v6942_v8, %s6554_s14 }
 0x1a1   : > { %8318 = vst [vmem:[#allocation26_spill] sm:$0xff] %v6951_v13  ;;  %v6959_v15 = vpack.c.bf16 %v6951_v13, %v6945_v9  ;;  %v553_v16 = vpop.f32.mrb[12].mxu0 }
 0x1a2   : > { %v6962_v17 = vadd.f32 %v553_v16, %v6887_v45  ;;  %v555_v18 = vpop.f32.mrb[13].mxu0 }
 0x1a3   : > { %8319 = vst [vmem:[#allocation27_spill] sm:$0xff] %v6959_v15  ;;  %v6965_v19 = vadd.f32 %v555_v18, %v6892_v50 }
 0x1a5   : > { %8320 = vst [vmem:[#allocation28_spill] sm:$0xff] %v6965_v19  ;;  %v559_v20 = vpop.f32.mrb[14].mxu0 }
 0x1a6   : > { %v6968_v21 = vadd.f32 %v559_v20, %v6887_v45  ;;  %v561_v22 = vpop.f32.mrb[15].mxu0 }
 0x1a7   : > { %v6971_v23 = vadd.f32 %v561_v22, %v6892_v50 }
 0x1a9   : > { %8321 = vst [vmem:[#allocation29_spill] sm:$0xff] %v6971_v23  ;;  %v5726_v25 = vpack.c.bf16 %v6971_v23, %v6965_v19  ;;  %v565_v26 = vpop.f32.mrb[16].mxu0 }
 0x1aa   : > { %v6981_v28 = vadd.f32 %v565_v26, %v6887_v45  ;;  %v567_v29 = vpop.f32.mrb[17].mxu0  ;;  %v7048_v26 = vadd.f32 %v6938_v6, %v6887_v45  ;;  %v7065_v6 = vmul.f32 %v6948_v11, %v6948_v11 }
 0x1ab   : > { %5727 = vmatprep.subr.bf16.mxu0 %v5726_v25  ;;  %v6984_v30 = vadd.f32 %v567_v29, %v6892_v50  ;;  %v659_v29 = vsel %vm652_vm1, %v6942_v8, 0.0 }
 0x1ac   : > { %5729 = vmatpush3.bf16.msra.mxu0 %v5726_v25 }
 0x1ad   : > { %8322 = vst [vmem:[#allocation30_spill] sm:$0xff] %v6984_v30  ;;  %v571_v31 = vpop.f32.mrb[18].mxu0 }
 0x1ae   : > { %v6991_v33 = vadd.f32 %v571_v31, %v6887_v45  ;;  %v573_v34 = vpop.f32.mrb[19].mxu0 }
 0x1af   : > { %v6994_v35 = vadd.f32 %v573_v34, %v6892_v50 }
 0x1b1   : > { %8323 = vst [vmem:[#allocation31_spill] sm:$0xff] %v6994_v35  ;;  %657 = vadd.xlane.f32.xlu0 %v656_v36  ;;  %v7002_v38 = vpack.c.bf16 %v6994_v35, %v6984_v30  ;;  %v577_v39 = vpop.f32.mrb[20].mxu0  ;;  %v7057_v36 = vmul.f32 %v7048_v26, %v7048_v26 }
 0x1b2   : > { %v7007_v41 = vadd.f32 %v577_v39, %v6887_v45  ;;  %v579_v42 = vpop.f32.mrb[21].mxu0 }
 0x1b3   : > { %8324 = vst [vmem:[#allocation32_spill] sm:$0xff] %v7002_v38  ;;  %v7010_v43 = vadd.f32 %v579_v42, %v6892_v50 }
 0x1b5   : > { %663 = vadd.xlane.f32.xlu0 %v662_v40  ;;  %8325 = vst [vmem:[#allocation33_spill] sm:$0xff] %v7010_v43  ;;  %v583_v44 = vpop.f32.mrb[22].mxu0 }
 0x1b6   : > { %v7013_v46 = vadd.f32 %v583_v44, %v6887_v45  ;;  %v585_v47 = vpop.f32.mrb[23].mxu0 }
 0x1b7   : > { %v7016_v49 = vadd.f32 %v585_v47, %v6892_v50 }
 0x1b9   : > { %8326 = vst [vmem:[#allocation34_spill] sm:$0xff] %v7016_v49  ;;  %v7022_v54 = vpack.c.bf16 %v7016_v49, %v7010_v43  ;;  %v589_v55 = vpop.f32.mrb[24].mxu0 }
 0x1ba   : > { %v7025_v61 = vadd.f32 %v589_v55, %v6887_v45  ;;  %v591_v62 = vpop.f32.mrb[25].mxu0  ;;  %v665_v55 = vsel %vm652_vm1, %v7057_v36, 0.0 }
 0x1bb   : > { %8327 = vst [vmem:[#allocation35_spill] sm:$0xff] %v7022_v54  ;;  %5735 = vmatprep.subr.bf16.mxu0 %v7022_v54  ;;  %v7029_v0 = vadd.f32 %v591_v62, %v6892_v50  ;;  %v7087_v62 = vmul.f32 %v6962_v17, %v6962_v17 }
 0x1bd   : > { %8328 = vst [vmem:[#allocation36_spill] sm:$0xff] %v7029_v0  ;;  %v595_v1 = vpop.f32.mrb[26].mxu0 }
 0x1be   : > { %v7032_v7 = vadd.f32 %v595_v1, %v6887_v45  ;;  %v597_v10 = vpop.f32.mrb[27].mxu0  ;;  %v7099_v1 = vmul.f32 %v6991_v33, %v6991_v33 }
 0x1bf   : > { %v7035_v12 = vadd.f32 %v597_v10, %v6892_v50  ;;  %v7105_v10 = vmul.f32 %v7013_v46, %v7013_v46 }
 0x1c1   : > { %8329 = vst [vmem:[#allocation37_spill] sm:$0xff] %v7035_v12  ;;  %v7041_v18 = vpack.c.bf16 %v7035_v12, %v7029_v0  ;;  %v601_v20 = vpop.f32.mrb[28].mxu0 }
 0x1c2   : > { %v7044_v22 = vadd.f32 %v601_v20, %v6887_v45  ;;  %v603_v25 = vpop.f32.mrb[29].mxu0  ;;  %v7111_v20 = vmul.f32 %v7032_v7, %v7032_v7 }
 0x1c3   : > { %8330 = vst [vmem:[#allocation38_spill] sm:$0xff] %v7041_v18  ;;  %v7072_v39 = vadd.f32 %v603_v25, %v6892_v50 }
 0x1c4   : > { %660 = vadd.xlane.f32.xlu1 %v659_v29  ;;  %v7150_v37 = vmul.f32 %v7044_v22, %v7044_v22 }
 0x1c5   : > { %v607_v31 = vpop.f32.mrb[30].mxu0  ;;  %8331 = vst [vmem:[#allocation39_spill] sm:$0xff] %v7072_v39 }
 0x1c6   : > { %v7053_v34 = vadd.f32 %v607_v31, %v6887_v45  ;;  %v668_v45 = vsel %vm652_vm1, %v7065_v6, 0.0  ;;  %v609_v40 = vpop.f32.mrb[31].mxu0 }
 0x1c7   : > { %v7075_v42 = vadd.f32 %v609_v40, %v6892_v50  ;;  %v7093_v50 = vmul.f32 %v6968_v21, %v6968_v21 }
 0x1c8   : > { %v7117_v25 = vmul.f32 %v7053_v34, %v7053_v34 }
 0x1c9   : > { %8332 = vst [vmem:[#allocation40_spill] sm:$0xff] %v7075_v42  ;;  %v7081_v47 = vpack.c.bf16 %v7075_v42, %v7072_v39  ;;  %v674_v40 = vsel %vm652_vm1, %v7093_v50, 0.0  ;;  %v680_v42 = vsel %vm652_vm1, %v7099_v1, 0.0 }
 0x1cb   : > { %773 = vrot.lane.b32.xlu0 %v7057_v36, %s6554_s14  ;;  %8333 = vst [vmem:[#allocation41_spill] sm:$0xff] %v7081_v47 }
 0x1d5   : > { %771 = vrot.lane.b32.xlu1 %v6988_v32, %s6554_s14 }
 0x1d9   : > { %775 = vrot.lane.b32.xlu1 %v7065_v6, %s6554_s14 }
 0x1ea   : > { %669 = vadd.xlane.f32.xlu0 %v668_v45  ;;  %v671_v45 = vsel %vm652_vm1, %v7087_v62, 0.0 }
 0x1fd   : > { %666 = vadd.xlane.f32.xlu1 %v665_v55 }
 0x200   : > { %777 = vrot.lane.b32.xlu0 %v7087_v62, %s6554_s14  ;;  %v766_v44 = vpop.permute.xlu0 %765 }
 0x201   : > { %v813_v0 = vsel %vm652_vm1, %v766_v44, 0.0 }
 0x20e   : > { %779 = vrot.lane.b32.xlu1 %v7093_v50, %s6554_s14 }
 0x212   : > { %783 = vrot.lane.b32.xlu1 %v7099_v1, %s6554_s14 }
 0x216   : > { %787 = vrot.lane.b32.xlu1 %v7105_v10, %s6554_s14 }
 0x21a   : > { %791 = vrot.lane.b32.xlu1 %v7111_v20, %s6554_s14 }
 0x21c   : > { %v655_v29 = vpop.xlane.xlu1 %654 }
 0x21d   : > { %v701_v31 = vmax.f32 %v655_v29, 1e-24  ;;  %v7129_v29 = vmul.f32 %v6981_v28, %v6981_v28 }
 0x21e   : > { %795 = vrot.lane.b32.xlu1 %v7117_v25, %s6554_s14 }
 0x21f   : > { %6075 = vrsqrt.f32 %v701_v31  ;;  %672 = vadd.xlane.f32.xlu0 %v671_v45  ;;  %v7135_v31 = vmul.f32 %v7007_v41, %v7007_v41  ;;  %v768_v45 = vpop.permute.xlu0 %767  ;;  %v677_v14 = vsel %vm652_vm1, %v7129_v29, 0.0 }
 0x220   : > { %v770_v4 = vpop.permute.xlu1 %769 }
 0x221   : > { %v819_v12 = vsel %vm652_vm1, %v770_v4, 0.0 }
 0x223   : > { %675 = vadd.xlane.f32.xlu0 %v674_v40  ;;  %v7141_v40 = vmul.f32 %v7025_v61, %v7025_v61 }
 0x229   : > { %v6076_v55 = vpop.eup %6075 }
 0x22a   : > { %v733_v16 = vmul.f32 %v6076_v55, %v6890_v48  ;;  %v816_v55 = vsel %vm652_vm1, %v768_v45, 0.0 }
 0x22c   : > { %5366 = vmatprep.mubr.msk.f32.mxu1 %vm652_vm1, %v733_v16 }
 0x239   : > { %781 = vrot.lane.b32.xlu0 %v7129_v29, %s6554_s14 }
 0x23d   : > { %785 = vrot.lane.b32.xlu0 %v7135_v31, %s6554_s14 }
 0x23e   : > { %v7143_v16 = vpop.xlane.xlu0 %657 }
 0x241   : > { %789 = vrot.lane.b32.xlu0 %v7141_v40, %s6554_s14 }
 0x242   : > { %v7152_v52 = vpop.xlane.xlu0 %663  ;;  %817 = vadd.xlane.f32.xlu1 %v816_v55 }
 0x245   : > { %793 = vrot.lane.b32.xlu0 %v7150_v37, %s6554_s14 }
 0x246   : > { %v774_v59 = vpop.permute.xlu0 %773  ;;  %678 = vadd.xlane.f32.xlu1 %v677_v14 }
 0x247   : > { %v825_v24 = vsel %vm652_vm1, %v774_v59, 0.0 }
 0x24a   : > { %826 = vadd.xlane.f32.xlu1 %v825_v24 }
 0x251   : > { %v7159_v45 = vpop.xlane.xlu1 %660 }
 0x255   : > { %v772_v55 = vpop.permute.xlu1 %771 }
 0x256   : > { %v822_v39 = vsel %vm652_vm1, %v772_v55, 0.0 }
 0x259   : > { %v776_v14 = vpop.permute.xlu1 %775 }
 0x25a   : > { %v828_v59 = vsel %vm652_vm1, %v776_v14, 0.0  ;;  %v686_v14 = vsel %vm652_vm1, %v7105_v10, 0.0 }
 0x264   : > { %814 = vadd.xlane.f32.xlu0 %v813_v0  ;;  %v683_v0 = vsel %vm652_vm1, %v7135_v31, 0.0 }
 0x268   : > { %820 = vadd.xlane.f32.xlu0 %v819_v12 }
 0x26c   : > { %823 = vadd.xlane.f32.xlu0 %v822_v39 }
 0x270   : > { %681 = vadd.xlane.f32.xlu0 %v680_v42 }
 0x274   : > { %829 = vadd.xlane.f32.xlu0 %v828_v59 }
 0x277   : > { %v7167_v24 = vpop.xlane.xlu0 %669 }
 0x278   : > { %684 = vadd.xlane.f32.xlu0 %v683_v0  ;;  %v689_v0 = vsel %vm652_vm1, %v7141_v40, 0.0 }
 0x27b   : > { %v778_v4 = vpop.permute.xlu0 %777 }
 0x27c   : > { %v831_v12 = vsel %vm652_vm1, %v778_v4, 0.0 }
 0x27d   : > { %832 = vadd.xlane.f32.xlu1 %v831_v12 }
 0x28a   : > { %v7172_v44 = vpop.xlane.xlu1 %666 }
 0x28e   : > { %v780_v39 = vpop.permute.xlu1 %779 }
 0x28f   : > { %v834_v55 = vsel %vm652_vm1, %v780_v39, 0.0 }
 0x290   : > { %835 = vadd.xlane.f32.xlu0 %v834_v55 }
 0x292   : > { %v784_v42 = vpop.permute.xlu1 %783 }
 0x293   : > { %v840_v59 = vsel %vm652_vm1, %v784_v42, 0.0 }
 0x294   : > { %687 = vadd.xlane.f32.xlu0 %v686_v14 }
 0x296   : > { %v788_v30 = vpop.permute.xlu1 %787 }
 0x297   : > { %v846_v12 = vsel %vm652_vm1, %v788_v30, 0.0  ;;  %v692_v30 = vsel %vm652_vm1, %v7111_v20, 0.0 }
 0x298   : > { %841 = vadd.xlane.f32.xlu0 %v840_v59 }
 0x29a   : > { %v792_v4 = vpop.permute.xlu1 %791 }
 0x29b   : > { %v852_v39 = vsel %vm652_vm1, %v792_v4, 0.0 }
 0x29c   : > { %690 = vadd.xlane.f32.xlu0 %v689_v0 }
 0x29e   : > { %v796_v55 = vpop.permute.xlu1 %795 }
 0x29f   : > { %v858_v35 = vsel %vm652_vm1, %v796_v55, 0.0 }
 0x2a0   : > { %847 = vadd.xlane.f32.xlu0 %v846_v12 }
 0x2a4   : > { %853 = vadd.xlane.f32.xlu0 %v852_v39 }
 0x2a8   : > { %859 = vadd.xlane.f32.xlu0 %v858_v35 }
 0x2ac   : > { %v7183_v14 = vpop.xlane.xlu0 %672 }
 0x2b0   : > { %v7185_v42 = vpop.xlane.xlu0 %675 }
 0x2b4   : > { %v782_v59 = vpop.permute.xlu0 %781 }
 0x2b5   : > { %v837_v43 = vsel %vm652_vm1, %v782_v59, 0.0 }
 0x2b6   : > { %838 = vadd.xlane.f32.xlu1 %v837_v43 }
 0x2b8   : > { %v786_v0 = vpop.permute.xlu0 %785 }
 0x2b9   : > { %v843_v4 = vsel %vm652_vm1, %v786_v0, 0.0 }
 0x2ba   : > { %693 = vadd.xlane.f32.xlu1 %v692_v30 }
 0x2bc   : > { %v790_v12 = vpop.permute.xlu0 %789 }
 0x2bd   : > { %v849_v39 = vsel %vm652_vm1, %v790_v12, 0.0 }
 0x2be   : > { %844 = vadd.xlane.f32.xlu1 %v843_v4 }
 0x2c0   : > { %v794_v35 = vpop.permute.xlu0 %793 }
 0x2c1   : > { %v855_v55 = vsel %vm652_vm1, %v794_v35, 0.0 }
 0x2c2   : > { %850 = vadd.xlane.f32.xlu1 %v849_v39 }
 0x2c6   : > { %856 = vadd.xlane.f32.xlu1 %v855_v55 }
 0x2cf   : > { %v818_v49 = vpop.xlane.xlu1 %817 }
 0x2d0   : > { %v862_v47 = vmax.f32 %v818_v49, 1e-24 }
 0x2d2   : > { %6077 = vrsqrt.f32 %v862_v47 }
 0x2d3   : > { %v7193_v54 = vpop.xlane.xlu1 %678 }
 0x2d7   : > { %v827_v38 = vpop.xlane.xlu1 %826 }
 0x2d8   : > { %v865_v55 = vmax.f32 %v827_v38, 1e-24 }
 0x2dc   : > { %v6078_v12 = vpop.eup %6077 }
 0x2dd   : > { %v894_v47 = vmul.f32 %v6078_v12, %v6899_v53 }
 0x2f1   : > { %v815_v59 = vpop.xlane.xlu0 %814 }
 0x2f2   : > { %v861_v43 = vmax.f32 %v815_v59, 1e-24 }
 0x2f4   : > { %6079 = vrsqrt.f32 %v861_v43 }
 0x2f5   : > { %v821_v30 = vpop.xlane.xlu0 %820 }
 0x2f6   : > { %v863_v18 = vmax.f32 %v821_v30, 1e-24 }
 0x2f8   : > { %6081 = vrsqrt.f32 %v863_v18 }
 0x2f9   : > { %v824_v0 = vpop.xlane.xlu0 %823 }
 0x2fa   : > { %v864_v4 = vmax.f32 %v824_v0, 1e-24 }
 0x2fc   : > { %6083 = vrsqrt.f32 %v864_v4 }
 0x2fd   : > { %v7195_v39 = vpop.xlane.xlu0 %681  ;;  %6085 = vrsqrt.f32 %v865_v55 }
 0x2fe   : > { %v6080_v35 = vpop.eup %6079 }
 0x2ff   : > { %v893_v49 = vmul.f32 %v6080_v35, %v6890_v48 }
 0x301   : > { %v830_v59 = vpop.xlane.xlu0 %829  ;;  %v5955_v43 = vpack.i.bf16 %v894_v47, %v893_v49 }
 0x302   : > { %v866_v15 = vmax.f32 %v830_v59, 1e-24  ;;  %v6082_v30 = vpop.eup %6081 }
 0x303   : > { %5956 = vrot.lane.b32.xlu1 %v5955_v43, %s6554_s14  ;;  %v895_v0 = vmul.f32 %v6082_v30, %v6930_v3 }
 0x304   : > { %6087 = vrsqrt.f32 %v866_v15 }
 0x305   : > { %v7206_v59 = vpop.xlane.xlu0 %684 }
 0x306   : > { %v6084_v18 = vpop.eup %6083 }
 0x307   : > { %v896_v4 = vmul.f32 %v6084_v18, %v6978_v27  ;;  %v6086_v38 = vpop.eup %6085 }
 0x308   : > { %v897_v12 = vmul.f32 %v6086_v38, %v7048_v26 }
 0x309   : > { %v5960_v9 = vpack.i.bf16 %v896_v4, %v895_v0 }
 0x30a   : > { %v833_v47 = vpop.xlane.xlu1 %832 }
 0x30b   : > { %5961 = vrot.lane.b32.xlu0 %v5960_v9, %s6554_s14  ;;  %v867_v15 = vmax.f32 %v833_v47, 1e-24 }
 0x30d   : > { %6089 = vrsqrt.f32 %v867_v15 }
 0x30e   : > { %v6088_v35 = vpop.eup %6087 }
 0x30f   : > { %v898_v49 = vmul.f32 %v6088_v35, %v6948_v11 }
 0x311   : > { %v5965_v55 = vpack.i.bf16 %v898_v49, %v897_v12 }
 0x313   : > { %5966 = vrot.lane.b32.xlu1 %v5965_v55, %s6554_s14 }
 0x317   : > { %v6090_v18 = vpop.eup %6089 }
 0x318   : > { %v899_v9 = vmul.f32 %v6090_v18, %v6962_v17 }
 0x31d   : > { %v836_v43 = vpop.xlane.xlu0 %835 }
 0x31e   : > { %v868_v30 = vmax.f32 %v836_v43, 1e-24 }
 0x320   : > { %6091 = vrsqrt.f32 %v868_v30 }
 0x321   : > { %v7211_v35 = vpop.xlane.xlu0 %687 }
 0x325   : > { %v842_v12 = vpop.xlane.xlu0 %841 }
 0x326   : > { %v870_v55 = vmax.f32 %v842_v12, 1e-24 }
 0x328   : > { %6093 = vrsqrt.f32 %v870_v55  ;;  %v698_v55 = vsel %vm652_vm1, %v7117_v25, 0.0 }
 0x329   : > { %v7213_v49 = vpop.xlane.xlu0 %690 }
 0x32a   : > { %v6092_v0 = vpop.eup %6091 }
 0x32b   : > { %v900_v4 = vmul.f32 %v6092_v0, %v6968_v21 }
 0x32d   : > { %v5970_v38 = vpack.i.bf16 %v900_v4, %v899_v9  ;;  %v848_v15 = vpop.xlane.xlu0 %847 }
 0x32e   : > { %v872_v9 = vmax.f32 %v848_v15, 1e-24 }
 0x32f   : > { %5971 = vrot.lane.b32.xlu1 %v5970_v38, %s6554_s14 }
 0x331   : > { %v854_v13 = vpop.xlane.xlu0 %853 }
 0x332   : > { %v6094_v0 = vpop.eup %6093 }
 0x333   : > { %v902_v12 = vmul.f32 %v6094_v0, %v6991_v33 }
 0x335   : > { %v860_v57 = vpop.xlane.xlu0 %859 }
 0x343   : > { %v839_v47 = vpop.xlane.xlu1 %838 }
 0x344   : > { %v869_v43 = vmax.f32 %v839_v47, 1e-24  ;;  %v876_v47 = vmax.f32 %v860_v57, 1e-24 }
 0x346   : > { %6095 = vrsqrt.f32 %v869_v43 }
 0x347   : > { %v7215_v30 = vpop.xlane.xlu1 %693 }
 0x34b   : > { %v845_v18 = vpop.xlane.xlu1 %844 }
 0x34c   : > { %v871_v56 = vmax.f32 %v845_v18, 1e-24 }
 0x34e   : > { %6097 = vrsqrt.f32 %v871_v56 }
 0x34f   : > { %v851_v4 = vpop.xlane.xlu1 %850  ;;  %6099 = vrsqrt.f32 %v872_v9 }
 0x350   : > { %v6096_v38 = vpop.eup %6095 }
 0x351   : > { %v901_v19 = vmul.f32 %v6096_v38, %v6981_v28 }
 0x353   : > { %699 = vadd.xlane.f32.xlu1 %v698_v55  ;;  %v857_v43 = vpop.xlane.xlu1 %856  ;;  %v5975_v23 = vpack.i.bf16 %v902_v12, %v901_v19  ;;  %v873_v12 = vmax.f32 %v851_v4, 1e-24  ;;  %v705_v4 = vmax.f32 %v7172_v44, 1e-24 }
 0x354   : > { %v875_v63 = vmax.f32 %v857_v43, 1e-24 }
 0x355   : > { %5976 = vrot.lane.b32.xlu0 %v5975_v23, %s6554_s14  ;;  %v703_v23 = vmax.f32 %v7159_v45, 1e-24  ;;  %v8334_v45 = vmov 0 }
 0x356   : > { %6101 = vrsqrt.f32 %v875_v63  ;;  %v702_v63 = vmax.f32 %v7143_v16, 1e-24  ;;  %v704_v16 = vmax.f32 %v7152_v52, 1e-24  ;;  %v8335_v45 = vsel %vm7241_vm2, 4294967295, %v8334_v45 }
 0x357   : > { %6103 = vrsqrt.f32 %v876_v47  ;;  %8336 = vst [vmem:[#allocation42_spill] sm:$0xff] %v8335_v45 }
 0x358   : > { %v6098_v15 = vpop.eup %6097  ;;  %6105 = vrsqrt.f32 %v702_v63 }
 0x359   : > { %v6100_v18 = vpop.eup %6099  ;;  %v903_v56 = vmul.f32 %v6098_v15, %v7007_v41  ;;  %6107 = vrsqrt.f32 %v703_v23 }
 0x35a   : > { %v904_v0 = vmul.f32 %v6100_v18, %v7013_v46  ;;  %6109 = vrsqrt.f32 %v873_v12 }
 0x35c   : > { %v5980_v48 = vpack.i.bf16 %v904_v0, %v903_v56 }
 0x360   : > { %v6102_v38 = vpop.eup %6101 }
 0x361   : > { %v6104_v2 = vpop.eup %6103  ;;  %v907_v9 = vmul.f32 %v6102_v38, %v7044_v22  ;;  %v706_v38 = vmax.f32 %v7167_v24, 1e-24 }
 0x362   : > { %v908_v57 = vmul.f32 %v6104_v2, %v7053_v34  ;;  %v874_v2 = vmax.f32 %v854_v13, 1e-24  ;;  %v6106_v13 = vpop.eup %6105 }
 0x363   : > { %v6108_v18 = vpop.eup %6107 }
 0x364   : > { %5981 = vrot.lane.b32.xlu1 %v5980_v48, %s6554_s14  ;;  %v5990_v19 = vpack.i.bf16 %v908_v57, %v907_v9  ;;  %v695_v48 = vsel %vm652_vm1, %v7150_v37, 0.0  ;;  %6111 = vrsqrt.f32 %v874_v2  ;;  %v734_v9 = vmul.f32 %v6106_v13, %v6899_v53  ;;  %v6110_v57 = vpop.eup %6109 }
 0x365   : > { %6113 = vrsqrt.f32 %v704_v16  ;;  %v735_v63 = vmul.f32 %v6108_v18, %v6930_v3 }
 0x366   : > { %6115 = vrsqrt.f32 %v705_v4 }
 0x367   : > { %6117 = vrsqrt.f32 %v706_v38 }
 0x368   : > { %5991 = vrot.lane.b32.xlu1 %v5990_v19, %s6554_s14  ;;  %v707_v19 = vmax.f32 %v7183_v14, 1e-24 }
 0x36a   : > { %6119 = vrsqrt.f32 %v707_v19 }
 0x36c   : > { %2640 = vrot.lane.b32.xlu1 %v6896_v51, %s6555_s19 }
 0x36e   : > { %v6112_v23 = vpop.eup %6111 }
 0x36f   : > { %v6114_v24 = vpop.eup %6113 }
 0x370   : > { %2642 = vrot.lane.b32.xlu1 %v6913_v58, %s6555_s19  ;;  %v6116_v12 = vpop.eup %6115  ;;  %v736_v16 = vmul.f32 %v6114_v24, %v6978_v27 }
 0x371   : > { %v737_v4 = vmul.f32 %v6116_v12, %v7048_v26 }
 0x374   : > { %696 = vadd.xlane.f32.xlu0 %v695_v48  ;;  %2644 = vrot.lane.b32.xlu1 %v6942_v8, %s6555_s19 }
 0x375   : > { %v5957_v55 = vpop.permute.xlu1 %5956 }
 0x376   : > { %v5959_v47 = vunpack.i.h.bf16 %v5957_v55  ;;  %v5958_v43 = vunpack.i.l.bf16 %v5957_v55  ;;  %v906_v55 = vmul.f32 %v6112_v23, %v7032_v7 }
 0x378   : > { %2646 = vrot.lane.b32.xlu1 %v6988_v32, %s6555_s19  ;;  %v5666_v15 = vpack.c.bf16 %v5959_v47, %v5958_v43 }
 0x37a   : > { %5668 = vmatprep.subr.msk.bf16.mxu1 %vm7241_vm2, %v5666_v15 }
 0x37b   : > { %5671 = vmatpush3.bf16.xpose.msk.msra.mxu1 %vm7241_vm2, %v5666_v15  ;;  %v6118_v15 = vpop.eup %6117 }
 0x37c   : > { %2650 = vrot.lane.b32.xlu1 %v7065_v6, %s6555_s19  ;;  %v6120_v13 = vpop.eup %6119 }
 0x37d   : > { %v5962_v52 = vpop.permute.xlu0 %5961  ;;  %v739_v18 = vmul.f32 %v6120_v13, %v6962_v17 }
 0x37e   : > { %v5964_v44 = vunpack.i.h.bf16 %v5962_v52  ;;  %v5963_v56 = vunpack.i.l.bf16 %v5962_v52  ;;  %v738_v52 = vmul.f32 %v6118_v15, %v6948_v11  ;;  %v714_v15 = vmax.f32 %v7215_v30, 1e-24 }
 0x380   : > { %v5672_v0 = vpack.c.bf16 %v5964_v44, %v5963_v56  ;;  %2498 = vrot.lane.b32.xlu1 %v6913_v58, %s6556_s18  ;;  %v905_v58 = vmul.f32 %v6110_v57, %v7025_v61 }
 0x382   : > { %5367 = vmatmul.mubr.msk.f32.vlgmr.msra.gmra.mrb[0].mxu1 %vm652_vm1, %v734_v9  ;;  %5674 = vmatprep.subr.msk.bf16.mxu1 %vm7241_vm2, %v5672_v0  ;;  %v5985_v43 = vpack.i.bf16 %v906_v55, %v905_v58 }
 0x383   : > { %5677 = vmatpush3.bf16.xpose.msk.msra.mxu1 %vm7241_vm2, %v5672_v0  ;;  %5373 = vmatprep.mubr.msk.f32.mxu1 %vm652_vm1, %v735_v63 }
 0x384   : > { %2652 = vrot.lane.b32.xlu1 %v7087_v62, %s6555_s19 }
 0x385   : > { %v5967_v14 = vpop.permute.xlu1 %5966 }
 0x386   : > { %v5969_v48 = vunpack.i.h.bf16 %v5967_v14  ;;  %v5968_v2 = vunpack.i.l.bf16 %v5967_v14 }
 0x388   : > { %v5678_v47 = vpack.c.bf16 %v5969_v48, %v5968_v2  ;;  %2654 = vrot.lane.b32.xlu1 %v7093_v50, %s6555_s19 }
 0x38a   : > { %5986 = vrot.lane.b32.xlu0 %v5985_v43, %s6554_s14  ;;  %5374 = vmatmul.mubr.msk.f32.vlgmr.msra.gmra.mrb[2].mxu1 %vm652_vm1, %v736_v16  ;;  %s6557_s14 = smov [#allocation12]  }
 0x38b   : > { %5680 = vmatprep.subr.msk.bf16.mxu1 %vm7241_vm2, %v5678_v47  ;;  %5380 = vmatprep.mubr.msk.f32.mxu1 %vm652_vm1, %v737_v4 }
 0x38c   : > { %5683 = vmatpush3.bf16.xpose.msk.msra.mxu1 %vm7241_vm2, %v5678_v47  ;;  %2502 = vrot.lane.b32.xlu1 %v6988_v32, %s6556_s18  ;;  %v709_v32 = vmax.f32 %v7193_v54, 1e-24 }
 0x38e   : > { %2648 = vrot.lane.b32.xlu0 %v7057_v36, %s6555_s19 }
 0x390   : > { %2656 = vrot.lane.b32.xlu1 %v7129_v29, %s6555_s19 }
 0x392   : > { %2496 = vrot.lane.b32.xlu0 %v6896_v51, %s6556_s18  ;;  %v708_v51 = vmax.f32 %v7185_v42, 1e-24 }
 0x393   : > { %5381 = vmatmul.mubr.msk.f32.vlgmr.msra.gmra.mrb[4].mxu1 %vm652_vm1, %v738_v52 }
 0x394   : > { %5387 = vmatprep.mubr.msk.f32.mxu1 %vm652_vm1, %v739_v18  ;;  %2658 = vrot.lane.b32.xlu1 %v7099_v1, %s6555_s19  ;;  %6121 = vrsqrt.f32 %v708_v51 }
 0x395   : > { %6123 = vrsqrt.f32 %v709_v32 }
 0x396   : > { %2500 = vrot.lane.b32.xlu0 %v6942_v8, %s6556_s18 }
 0x398   : > { %2506 = vrot.lane.b32.xlu1 %v7065_v6, %s6556_s18 }
 0x39a   : > { %2504 = vrot.lane.b32.xlu0 %v7057_v36, %s6556_s18 }
 0x39c   : > { %2660 = vrot.lane.b32.xlu1 %v7135_v31, %s6555_s19 }
 0x39e   : > { %2508 = vrot.lane.b32.xlu0 %v7087_v62, %s6556_s18  ;;  %v6122_v54 = vpop.eup %6121 }
 0x39f   : > { %v6124_v62 = vpop.eup %6123 }
 0x3a0   : > { %2662 = vrot.lane.b32.xlu1 %v7105_v10, %s6555_s19 }
 0x3a1   : > { %v5972_v8 = vpop.permute.xlu1 %5971 }
 0x3a2   : > { %v5974_v6 = vunpack.i.h.bf16 %v5972_v8  ;;  %v5973_v44 = vunpack.i.l.bf16 %v5972_v8  ;;  %2510 = vrot.lane.b32.xlu0 %v7093_v50, %s6556_s18  ;;  %v740_v50 = vmul.f32 %v6122_v54, %v6968_v21 }
 0x3a4   : > { %v5684_v36 = vpack.c.bf16 %v5974_v6, %v5973_v44  ;;  %2664 = vrot.lane.b32.xlu1 %v7141_v40, %s6555_s19 }
 0x3a6   : > { %2512 = vrot.lane.b32.xlu0 %v7129_v29, %s6556_s18  ;;  %5686 = vmatprep.subr.msk.bf16.mxu1 %vm7241_vm2, %v5684_v36  ;;  %v741_v29 = vmul.f32 %v6124_v62, %v6981_v28 }
 0x3a7   : > { %5689 = vmatpush3.bf16.xpose.msk.msra.mxu1 %vm7241_vm2, %v5684_v36 }
 0x3a8   : > { %2666 = vrot.lane.b32.xlu1 %v7111_v20, %s6555_s19 }
 0x3aa   : > { %2514 = vrot.lane.b32.xlu0 %v7099_v1, %s6556_s18  ;;  %v710_v1 = vmax.f32 %v7195_v39, 1e-24  ;;  %v712_v39 = vmax.f32 %v7211_v35, 1e-24 }
 0x3ac   : > { %2668 = vrot.lane.b32.xlu1 %v7150_v37, %s6555_s19  ;;  %6125 = vrsqrt.f32 %v710_v1 }
 0x3ae   : > { %2516 = vrot.lane.b32.xlu0 %v7135_v31, %s6556_s18  ;;  %5388 = vmatmul.mubr.msk.f32.vlgmr.msra.gmra.mrb[6].mxu1 %vm652_vm1, %v740_v50  ;;  %v711_v31 = vmax.f32 %v7206_v59, 1e-24  ;;  %v713_v59 = vmax.f32 %v7213_v49, 1e-24 }
 0x3af   : > { %5394 = vmatprep.mubr.msk.f32.mxu1 %vm652_vm1, %v741_v29 }
 0x3b0   : > { %2670 = vrot.lane.b32.xlu1 %v7117_v25, %s6555_s19  ;;  %6127 = vrsqrt.f32 %v711_v31 }
 0x3b1   : > { %6129 = vrsqrt.f32 %v712_v39 }
 0x3b2   : > { %2518 = vrot.lane.b32.xlu0 %v7105_v10, %s6556_s18  ;;  %6131 = vrsqrt.f32 %v713_v59 }
 0x3b3   : > { %6133 = vrsqrt.f32 %v714_v15 }
 0x3b4   : > { %2520 = vrot.lane.b32.xlu1 %v7141_v40, %s6556_s18 }
 0x3b6   : > { %2522 = vrot.lane.b32.xlu0 %v7111_v20, %s6556_s18 }
 0x3b8   : > { %2524 = vrot.lane.b32.xlu1 %v7150_v37, %s6556_s18  ;;  %v6126_v37 = vpop.eup %6125 }
 0x3ba   : > { %2526 = vrot.lane.b32.xlu0 %v7117_v25, %s6556_s18  ;;  %v6128_v20 = vpop.eup %6127  ;;  %v742_v25 = vmul.f32 %v6126_v37, %v6991_v33 }
 0x3bb   : > { %v743_v40 = vmul.f32 %v6128_v20, %v7007_v41  ;;  %v6130_v58 = vpop.eup %6129 }
 0x3bc   : > { %v6132_v14 = vpop.eup %6131  ;;  %v744_v49 = vmul.f32 %v6130_v58, %v7013_v46 }
 0x3bd   : > { %v745_v48 = vmul.f32 %v6132_v14, %v7025_v61 }
 0x3c7   : > { %v5977_v42 = vpop.permute.xlu0 %5976 }
 0x3c8   : > { %v5979_v10 = vunpack.i.h.bf16 %v5977_v42  ;;  %v5978_v56 = vunpack.i.l.bf16 %v5977_v42 }
 0x3ca   : > { %v5690_v38 = vpack.c.bf16 %v5979_v10, %v5978_v56  ;;  %v6134_v10 = vpop.eup %6133 }
 0x3cc   : > { %5692 = vmatprep.subr.msk.bf16.mxu1 %vm7241_vm2, %v5690_v38 }
 0x3cd   : > { %5695 = vmatpush3.bf16.xpose.msk.msra.mxu1 %vm7241_vm2, %v5690_v38 }
 0x3d4   : > { %5395 = vmatmul.mubr.msk.f32.vlgmr.msra.gmra.mrb[8].mxu1 %vm652_vm1, %v742_v25  ;;  %v746_v25 = vmul.f32 %v6134_v10, %v7032_v7 }
 0x3d5   : > { %5401 = vmatprep.mubr.msk.f32.mxu1 %vm652_vm1, %v743_v40 }
 0x3e0   : > { %v700_v0 = vpop.xlane.xlu1 %699 }
 0x3e1   : > { %v716_v62 = vmax.f32 %v700_v0, 1e-24 }
 0x3e4   : > { %v5982_v9 = vpop.permute.xlu1 %5981 }
 0x3e5   : > { %v5984_v57 = vunpack.i.h.bf16 %v5982_v9  ;;  %v5983_v19 = vunpack.i.l.bf16 %v5982_v9 }
 0x3e7   : > { %v5696_v63 = vpack.c.bf16 %v5984_v57, %v5983_v19 }
 0x3e8   : > { %v5992_v23 = vpop.permute.xlu1 %5991 }
 0x3e9   : > { %5698 = vmatprep.subr.msk.bf16.mxu1 %vm7241_vm2, %v5696_v63  ;;  %v5994_v6 = vunpack.i.h.bf16 %v5992_v23  ;;  %v5993_v44 = vunpack.i.l.bf16 %v5992_v23 }
 0x3ea   : > { %5701 = vmatpush3.bf16.xpose.msk.msra.mxu1 %vm7241_vm2, %v5696_v63 }
 0x3eb   : > { %v5708_v31 = vpack.c.bf16 %v5994_v6, %v5993_v44 }
 0x3ec   : > { %v2641_v24 = vpop.permute.xlu1 %2640 }
 0x3ed   : > { %v2688_v35 = vsel %vm652_vm1, %v2641_v24, 0.0 }
 0x3ee   : > { %2689 = vadd.xlane.f32.xlu0 %v2688_v35 }
 0x3f0   : > { %v2643_v12 = vpop.permute.xlu1 %2642 }
 0x3f1   : > { %5402 = vmatmul.mubr.msk.f32.vlgmr.msra.gmra.mrb[10].mxu1 %vm652_vm1, %v744_v49  ;;  %v2691_v2 = vsel %vm652_vm1, %v2643_v12, 0.0 }
 0x3f2   : > { %2692 = vadd.xlane.f32.xlu1 %v2691_v2  ;;  %5408 = vmatprep.mubr.msk.f32.mxu1 %vm652_vm1, %v745_v48 }
 0x3f4   : > { %v2645_v55 = vpop.permute.xlu1 %2644 }
 0x3f5   : > { %v2694_v47 = vsel %vm652_vm1, %v2645_v55, 0.0 }
 0x3f6   : > { %2695 = vadd.xlane.f32.xlu1 %v2694_v47 }
 0x3f8   : > { %v2647_v43 = vpop.permute.xlu1 %2646 }
 0x3f9   : > { %v2697_v16 = vsel %vm652_vm1, %v2647_v43, 0.0 }
 0x3fa   : > { %2698 = vadd.xlane.f32.xlu1 %v2697_v16 }
 0x3fc   : > { %v2651_v4 = vpop.permute.xlu1 %2650 }
 0x3fd   : > { %v2703_v38 = vsel %vm652_vm1, %v2651_v4, 0.0 }
 0x400   : > { %v2499_v13 = vpop.permute.xlu1 %2498 }
 0x401   : > { %v697_v52 = vpop.xlane.xlu0 %696  ;;  %v2547_v63 = vsel %vm652_vm1, %v2499_v13, 0.0 }
 0x402   : > { %v715_v18 = vmax.f32 %v697_v52, 1e-24 }
 0x404   : > { %v2653_v51 = vpop.permute.xlu1 %2652  ;;  %6135 = vrsqrt.f32 %v715_v18 }
 0x405   : > { %v5987_v32 = vpop.permute.xlu0 %5986  ;;  %v2706_v8 = vsel %vm652_vm1, %v2653_v51, 0.0  ;;  %6137 = vrsqrt.f32 %v716_v62 }
 0x406   : > { %v5989_v36 = vunpack.i.h.bf16 %v5987_v32  ;;  %v5988_v54 = vunpack.i.l.bf16 %v5987_v32  ;;  %2707 = vadd.xlane.f32.xlu0 %v2706_v8 }
 0x408   : > { %v5702_v50 = vpack.c.bf16 %v5989_v36, %v5988_v54  ;;  %v2655_v29 = vpop.permute.xlu1 %2654 }
 0x409   : > { %v2649_v1 = vpop.permute.xlu0 %2648  ;;  %v2709_v35 = vsel %vm652_vm1, %v2655_v29, 0.0 }
 0x40a   : > { %5704 = vmatprep.subr.msk.bf16.mxu1 %vm7241_vm2, %v5702_v50  ;;  %v2700_v30 = vsel %vm652_vm1, %v2649_v1, 0.0 }
 0x40b   : > { %2701 = vadd.xlane.f32.xlu1 %v2700_v30  ;;  %5707 = vmatpush3.bf16.xpose.msk.msra.mxu1 %vm7241_vm2, %v5702_v50 }
 0x40c   : > { %v2503_v42 = vpop.permute.xlu1 %2502  ;;  %5710 = vmatprep.subr.msk.bf16.mxu1 %vm7241_vm2, %v5708_v31 }
 0x40d   : > { %v2497_v56 = vpop.permute.xlu0 %2496  ;;  %v2553_v55 = vsel %vm652_vm1, %v2503_v42, 0.0 }
 0x40e   : > { %v6136_v37 = vpop.eup %6135  ;;  %v2544_v39 = vsel %vm652_vm1, %v2497_v56, 0.0 }
 0x40f   : > { %2704 = vadd.xlane.f32.xlu1 %v2703_v38  ;;  %v747_v0 = vmul.f32 %v6136_v37, %v7044_v22  ;;  %v6138_v19 = vpop.eup %6137 }
 0x410   : > { %v2657_v20 = vpop.permute.xlu1 %2656  ;;  %v748_v14 = vmul.f32 %v6138_v19, %v7053_v34 }
 0x411   : > { %v2501_v40 = vpop.permute.xlu0 %2500  ;;  %v2712_v23 = vsel %vm652_vm1, %v2657_v20, 0.0 }
 0x412   : > { %5409 = vmatmul.mubr.msk.f32.vlgmr.msra.gmra.mrb[12].mxu1 %vm652_vm1, %v746_v25  ;;  %v2550_v59 = vsel %vm652_vm1, %v2501_v40, 0.0 }
 0x413   : > { %2545 = vadd.xlane.f32.xlu1 %v2544_v39  ;;  %2551 = vadd.xlane.f32.xlu0 %v2550_v59  ;;  %v7413_v39 = vstv %s1637_s1  ;;  %v613_v59 = vld [vmem:[#allocation9 + $0x8] sm:$0xff] }
 0x414   : > { %5713 = vmatpush3.bf16.xpose.msk.msra.mxu1 %vm7241_vm2, %v5708_v31  ;;  %5415 = vmatprep.mubr.msk.f32.mxu1 %vm652_vm1, %v747_v0  ;;  %v2659_v9 = vpop.permute.xlu1 %2658 }
 0x415   : > { %5715 = vmatprep.subr.bf16.mxu1 %v6919_v60  ;;  %v2505_v57 = vpop.permute.xlu0 %2504  ;;  %v2715_v43 = vsel %vm652_vm1, %v2659_v9, 0.0 }
 0x416   : > { %v2556_v49 = vsel %vm652_vm1, %v2505_v57, 0.0  ;;  %v612_v57 = vld [vmem:[#allocation9] sm:$0xff] }
 0x417   : > { %2548 = vadd.xlane.f32.xlu1 %v2547_v63  ;;  %2713 = vadd.xlane.f32.xlu0 %v2712_v23 }
 0x418   : > { %v2507_v58 = vpop.permute.xlu1 %2506 }
 0x419   : > { %v2509_v24 = vpop.permute.xlu0 %2508  ;;  %v2559_v13 = vsel %vm652_vm1, %v2507_v58, 0.0 }
 0x41a   : > { %v2562_v16 = vsel %vm652_vm1, %v2509_v24, 0.0 }
 0x41b   : > { %5416 = vmatmul.mubr.msk.f32.vlgmr.msra.gmra.mrb[14].mxu1 %vm652_vm1, %v748_v14  ;;  %2710 = vadd.xlane.f32.xlu1 %v2709_v35  ;;  %v617_v35 = vld [vmem:[#allocation9 + $0x28] sm:$0xff] }
 0x41c   : > { %2557 = vadd.xlane.f32.xlu0 %v2556_v49  ;;  %5717 = vmatpush3.bf16.msra.mxu1 %v6919_v60  ;;  %v2661_v12 = vpop.permute.xlu1 %2660 }
 0x41d   : > { %5719 = vmatprep.subr.bf16.mxu1 %v6936_v5  ;;  %v2718_v48 = vsel %vm652_vm1, %v2661_v12, 0.0  ;;  %v2511_v2 = vpop.permute.xlu0 %2510 }
 0x41e   : > { %v2565_v44 = vsel %vm652_vm1, %v2511_v2, 0.0 }
 0x41f   : > { %2554 = vadd.xlane.f32.xlu1 %v2553_v55 }
 0x420   : > { %2719 = vadd.xlane.f32.xlu0 %v2718_v48  ;;  %v2663_v47 = vpop.permute.xlu1 %2662  ;;  %v616_v48 = vld [vmem:[#allocation9 + $0x20] sm:$0xff] }
 0x421   : > { %v2513_v4 = vpop.permute.xlu0 %2512  ;;  %v2721_v51 = vsel %vm652_vm1, %v2663_v47, 0.0 }
 0x422   : > { %v2568_v32 = vsel %vm652_vm1, %v2513_v4, 0.0 }
 0x423   : > { %2716 = vadd.xlane.f32.xlu1 %v2715_v43 }
 0x424   : > { %2563 = vadd.xlane.f32.xlu0 %v2562_v16  ;;  %v2665_v15 = vpop.permute.xlu1 %2664 }
 0x425   : > { %v2724_v60 = vsel %vm652_vm1, %v2665_v15, 0.0  ;;  %v2515_v18 = vpop.permute.xlu0 %2514  ;;  %v7435_v15 = vld [vmem:[#allocation9 + $0x48] sm:$0xff] }
 0x426   : > { %v2571_v31 = vsel %vm652_vm1, %v2515_v18, 0.0 }
 0x427   : > { %2560 = vadd.xlane.f32.xlu1 %v2559_v13 }
 0x428   : > { %2725 = vadd.xlane.f32.xlu0 %v2724_v60  ;;  %v2667_v52 = vpop.permute.xlu1 %2666 }
 0x429   : > { %v2517_v36 = vpop.permute.xlu0 %2516  ;;  %v2727_v62 = vsel %vm652_vm1, %v2667_v52, 0.0  ;;  %v620_v52 = vld [vmem:[#allocation9 + $0x40] sm:$0xff] }
 0x42a   : > { %v2574_v50 = vsel %vm652_vm1, %v2517_v36, 0.0  ;;  %v7448_v36 = vld [vmem:[#allocation9 + $0x68] sm:$0xff] }
 0x42b   : > { %2722 = vadd.xlane.f32.xlu1 %v2721_v51 }
 0x42c   : > { %2569 = vadd.xlane.f32.xlu0 %v2568_v32  ;;  %v2669_v8 = vpop.permute.xlu1 %2668 }
 0x42d   : > { %v2730_v6 = vsel %vm652_vm1, %v2669_v8, 0.0  ;;  %v2519_v30 = vpop.permute.xlu0 %2518 }
 0x42e   : > { %v2577_v37 = vsel %vm652_vm1, %v2519_v30, 0.0 }
 0x42f   : > { %2566 = vadd.xlane.f32.xlu1 %v2565_v44 }
 0x430   : > { %2731 = vadd.xlane.f32.xlu0 %v2730_v6  ;;  %v2671_v54 = vpop.permute.xlu1 %2670 }
 0x431   : > { %v2733_v56 = vsel %vm652_vm1, %v2671_v54, 0.0  ;;  %v2523_v38 = vpop.permute.xlu0 %2522 }
 0x432   : > { %v2583_v20 = vsel %vm652_vm1, %v2523_v38, 0.0 }
 0x433   : > { %2728 = vadd.xlane.f32.xlu1 %v2727_v62 }
 0x434   : > { %2575 = vadd.xlane.f32.xlu0 %v2574_v50  ;;  %v2521_v29 = vpop.permute.xlu1 %2520  ;;  %v7451_v50 = vld [vmem:[#allocation9 + $0x60] sm:$0xff] }
 0x435   : > { %v2580_v1 = vsel %vm652_vm1, %v2521_v29, 0.0  ;;  %v2527_v25 = vpop.permute.xlu0 %2526 }
 0x436   : > { %v2589_v40 = vsel %vm652_vm1, %v2527_v25, 0.0 }
 0x437   : > { %2572 = vadd.xlane.f32.xlu1 %v2571_v31 }
 0x438   : > { %2581 = vadd.xlane.f32.xlu0 %v2580_v1  ;;  %v2525_v42 = vpop.permute.xlu1 %2524 }
 0x439   : > { %v2586_v10 = vsel %vm652_vm1, %v2525_v42, 0.0 }
 0x43b   : > { %2734 = vadd.xlane.f32.xlu1 %v2733_v56 }
 0x43c   : > { %2587 = vadd.xlane.f32.xlu0 %v2586_v10 }
 0x43f   : > { %2578 = vadd.xlane.f32.xlu1 %v2577_v37 }
 0x443   : > { %2584 = vadd.xlane.f32.xlu1 %v2583_v20 }
 0x447   : > { %2590 = vadd.xlane.f32.xlu1 %v2589_v40 }
 0x455   : > { %v5368_v0 = vpop.f32.mrb[0].mxu1 }
 0x456   : > { %v1640_v9 = vmul.f32 %v5368_v0, %v7413_v39  ;;  %v991_v19 = vpop.f32.mrb[1].mxu1 }
 0x457   : > { %v1639_v63 = vmul.f32 %v7413_v39, %v991_v19 }
 0x458   : > { %v7417_v23 = vadd.f32 %v1640_v9, %v613_v59 }
 0x459   : > { %v7419_v58 = vadd.f32 %v1639_v63, %v612_v57 }
 0x45a   : > { %v1675_v24 = vsel %vm1671_vm3, %v7417_v23, -inf }
 0x45b   : > { %1676 = vmax.xlane.f32.xlu1 %v1675_v24  ;;  %v1672_v14 = vsel %vm1671_vm3, %v7419_v58, -inf }
 0x45c   : > { %1673 = vmax.xlane.f32.xlu0 %v1672_v14 }
 0x45d   : > { %v5375_v49 = vpop.f32.mrb[2].mxu1 }
 0x45e   : > { %v1642_v12 = vmul.f32 %v5375_v49, %v7413_v39  ;;  %v1082_v2 = vpop.f32.mrb[3].mxu1 }
 0x45f   : > { %v1641_v55 = vmul.f32 %v7413_v39, %v1082_v2 }
 0x460   : > { %v7427_v47 = vadd.f32 %v1642_v12, %v617_v35 }
 0x461   : > { %v7429_v43 = vadd.f32 %v1641_v55, %v616_v48 }
 0x462   : > { %v1681_v16 = vsel %vm1671_vm3, %v7427_v47, -inf }
 0x463   : > { %1682 = vmax.xlane.f32.xlu1 %v1681_v16  ;;  %v1678_v4 = vsel %vm1671_vm3, %v7429_v43, -inf }
 0x464   : > { %1679 = vmax.xlane.f32.xlu0 %v1678_v4 }
 0x466   : > { %v5382_v60 = vpop.f32.mrb[4].mxu1 }
 0x467   : > { %v1644_v13 = vmul.f32 %v5382_v60, %v7413_v39  ;;  %v1173_v18 = vpop.f32.mrb[5].mxu1 }
 0x468   : > { %v1643_v51 = vmul.f32 %v7413_v39, %v1173_v18 }
 0x469   : > { %v7440_v32 = vadd.f32 %v1644_v13, %v7435_v15 }
 0x46a   : > { %v7442_v8 = vadd.f32 %v1643_v51, %v620_v52 }
 0x46b   : > { %v1687_v6 = vsel %vm1671_vm3, %v7440_v32, -inf }
 0x46c   : > { %1688 = vmax.xlane.f32.xlu1 %v1687_v6  ;;  %v1684_v44 = vsel %vm1671_vm3, %v7442_v8, -inf }
 0x46d   : > { %1685 = vmax.xlane.f32.xlu0 %v1684_v44 }
 0x47b   : > { %v2690_v51 = vpop.xlane.xlu0 %2689 }
 0x47f   : > { %v7468_v40 = vpop.xlane.xlu1 %2692 }
 0x481   : > { %v5389_v54 = vpop.f32.mrb[6].mxu1 }
 0x482   : > { %v1646_v62 = vmul.f32 %v5389_v54, %v7413_v39  ;;  %v1264_v29 = vpop.f32.mrb[7].mxu1 }
 0x483   : > { %v1645_v1 = vmul.f32 %v7413_v39, %v1264_v29  ;;  %v2696_v63 = vpop.xlane.xlu1 %2695 }
 0x484   : > { %v7455_v31 = vadd.f32 %v1646_v62, %v7448_v36 }
 0x485   : > { %v7458_v30 = vadd.f32 %v1645_v1, %v7451_v50 }
 0x486   : > { %v1693_v42 = vsel %vm1671_vm3, %v7455_v31, -inf }
 0x487   : > { %1694 = vmax.xlane.f32.xlu1 %v1693_v42  ;;  %v1690_v10 = vsel %vm1671_vm3, %v7458_v30, -inf  ;;  %v2699_v24 = vpop.xlane.xlu1 %2698 }
 0x488   : > { %1691 = vmax.xlane.f32.xlu0 %v1690_v10 }
 0x493   : > { %v2708_v44 = vpop.xlane.xlu0 %2707 }
 0x498   : > { %v2702_v14 = vpop.xlane.xlu1 %2701 }
 0x49c   : > { %v2705_v49 = vpop.xlane.xlu1 %2704 }
 0x4a0   : > { %v7486_v54 = vpop.xlane.xlu0 %2551 }
 0x4a7   : > { %v5396_v56 = vpop.f32.mrb[8].mxu1 }
 0x4a8   : > { %v1648_v38 = vmul.f32 %v5396_v56, %v7413_v39  ;;  %v1355_v37 = vpop.f32.mrb[9].mxu1 }
 0x4a9   : > { %v1647_v20 = vmul.f32 %v7413_v39, %v1355_v37 }
 0x4aa   : > { %v7466_v25 = vadd.f32 %v1648_v38, %v613_v59 }
 0x4ab   : > { %v7470_v0 = vadd.f32 %v1647_v20, %v612_v57  ;;  %v2546_v57 = vpop.xlane.xlu1 %2545 }
 0x4ac   : > { %v1699_v9 = vsel %vm1671_vm3, %v7466_v25, -inf }
 0x4ad   : > { %1700 = vmax.xlane.f32.xlu0 %v1699_v9  ;;  %v1696_v19 = vsel %vm1671_vm3, %v7470_v0, -inf }
 0x4ae   : > { %1697 = vmax.xlane.f32.xlu1 %v1696_v19 }
 0x4af   : > { %v2549_v18 = vpop.xlane.xlu1 %2548 }
 0x4b3   : > { %v2711_v6 = vpop.xlane.xlu1 %2710 }
 0x4b7   : > { %v7488_v62 = vpop.xlane.xlu1 %2554 }
 0x4c4   : > { %v5403_v12 = vpop.f32.mrb[10].mxu1 }
 0x4c5   : > { %v1650_v59 = vmul.f32 %v5403_v12, %v7413_v39  ;;  %v1446_v2 = vpop.f32.mrb[11].mxu1 }
 0x4c6   : > { %v1649_v55 = vmul.f32 %v7413_v39, %v1446_v2  ;;  %v2739_v2 = vmax.f32 %v2699_v24, 1e-24  ;;  %v2737_v24 = vmax.f32 %v7468_v40, 1e-24  ;;  %v2743_v40 = vmax.f32 %v2711_v6, 1e-24 }
 0x4c7   : > { %v7478_v16 = vadd.f32 %v1650_v59, %v617_v35  ;;  %v7490_v35 = vpop.xlane.xlu0 %2713 }
 0x4c8   : > { %v7480_v4 = vadd.f32 %v1649_v55, %v616_v48  ;;  %v7492_v48 = vpop.xlane.xlu1 %2716  ;;  %6139 = vrsqrt.f32 %v2739_v2  ;;  %v2742_v2 = vmax.f32 %v2708_v44, 1e-24 }
 0x4c9   : > { %v1705_v60 = vsel %vm1671_vm3, %v7478_v16, -inf }
 0x4ca   : > { %1706 = vmax.xlane.f32.xlu1 %v1705_v60  ;;  %v1702_v13 = vsel %vm1671_vm3, %v7480_v4, -inf }
 0x4cb   : > { %1703 = vmax.xlane.f32.xlu0 %v1702_v13  ;;  %v7494_v29 = vpop.xlane.xlu0 %2557  ;;  %v2738_v13 = vmax.f32 %v2696_v63, 1e-24  ;;  %v2740_v63 = vmax.f32 %v2702_v14, 1e-24 }
 0x4cc   : > { %v7496_v1 = vpop.xlane.xlu1 %2560 }
 0x4cd   : > { %6141 = vrsqrt.f32 %v2738_v13 }
 0x4cf   : > { %v7507_v19 = vpop.xlane.xlu0 %2719 }
 0x4d0   : > { %v7509_v12 = vpop.xlane.xlu1 %2722 }
 0x4e5   : > { %v5410_v42 = vpop.f32.mrb[12].mxu1 }
 0x4e6   : > { %v1652_v10 = vmul.f32 %v5410_v42, %v7413_v39  ;;  %v1537_v56 = vpop.f32.mrb[13].mxu1  ;;  %v7515_v42 = vpop.xlane.xlu0 %2563 }
 0x4e7   : > { %v1651_v38 = vmul.f32 %v7413_v39, %v1537_v56 }
 0x4e8   : > { %v7501_v37 = vadd.f32 %v1652_v10, %v7435_v15  ;;  %v7517_v10 = vpop.xlane.xlu1 %2566 }
 0x4e9   : > { %v7503_v20 = vadd.f32 %v1651_v38, %v620_v52  ;;  %v2741_v38 = vmax.f32 %v2705_v49, 1e-24 }
 0x4ea   : > { %v1711_v9 = vsel %vm1671_vm3, %v7501_v37, -inf }
 0x4eb   : > { %1712 = vmax.xlane.f32.xlu1 %v1711_v9  ;;  %v1708_v59 = vsel %vm1671_vm3, %v7503_v20, -inf  ;;  %6143 = vrsqrt.f32 %v2741_v38 }
 0x4ec   : > { %1709 = vmax.xlane.f32.xlu0 %v1708_v59  ;;  %6145 = vrsqrt.f32 %v2737_v24  ;;  %v7532_v49 = vpop.xlane.xlu1 %2728  ;;  %v2594_v24 = vmax.f32 %v7486_v54, 1e-24 }
 0x4ed   : > { %6147 = vrsqrt.f32 %v2740_v63 }
 0x4ee   : > { %v5417_v55 = vpop.f32.mrb[14].mxu1 }
 0x4ef   : > { %v1654_v60 = vmul.f32 %v5417_v55, %v7413_v39  ;;  %v1628_v15 = vpop.f32.mrb[15].mxu1  ;;  %v2736_v55 = vmax.f32 %v2690_v51, 1e-24 }
 0x4f0   : > { %v1653_v52 = vmul.f32 %v7413_v39, %v1628_v15  ;;  %v2593_v15 = vmax.f32 %v2549_v18, 1e-24  ;;  %v7536_v13 = vpop.xlane.xlu1 %2572  ;;  %v2595_v18 = vmax.f32 %v7488_v62, 1e-24 }
 0x4f1   : > { %v7520_v56 = vadd.f32 %v1654_v60, %v7448_v36  ;;  %v7530_v36 = vpop.xlane.xlu0 %2725  ;;  %6149 = vrsqrt.f32 %v2736_v55  ;;  %v6140_v60 = vpop.eup %6139 }
 0x4f2   : > { %v7523_v9 = vadd.f32 %v1653_v52, %v7451_v50  ;;  %v2592_v50 = vmax.f32 %v2546_v57, 1e-24  ;;  %v6142_v52 = vpop.eup %6141  ;;  %v2771_v51 = vmul.f32 %v6140_v60, %v6978_v27 }
 0x4f3   : > { %v1717_v59 = vsel %vm1671_vm3, %v7520_v56, -inf  ;;  %v2770_v6 = vmul.f32 %v6142_v52, %v6930_v3 }
 0x4f4   : > { %1718 = vmax.xlane.f32.xlu1 %v1717_v59  ;;  %v1714_v39 = vsel %vm1671_vm3, %v7523_v9, -inf  ;;  %6151 = vrsqrt.f32 %v2592_v50  ;;  %v7544_v63 = vpop.xlane.xlu1 %2734 }
 0x4f5   : > { %1715 = vmax.xlane.f32.xlu0 %v1714_v39  ;;  %v7534_v14 = vpop.xlane.xlu0 %2569  ;;  %6153 = vrsqrt.f32 %v2743_v40  ;;  %v6144_v38 = vpop.eup %6143  ;;  %v6000_v39 = vpack.i.bf16 %v2771_v51, %v2770_v6 }
 0x4f6   : > { %6155 = vrsqrt.f32 %v2742_v2  ;;  %v6146_v57 = vpop.eup %6145  ;;  %v2773_v55 = vmul.f32 %v6144_v38, %v6948_v11 }
 0x4f7   : > { %6157 = vrsqrt.f32 %v2593_v15  ;;  %v6148_v44 = vpop.eup %6147  ;;  %v2769_v40 = vmul.f32 %v6146_v57, %v6899_v53  ;;  %v8337_v15 = vld [vmem:[#allocation19_spill] sm:$0xff] }
 0x4f8   : > { %6159 = vrsqrt.f32 %v2594_v24  ;;  %v2772_v54 = vmul.f32 %v6148_v44, %v7048_v26  ;;  %v7553_v51 = vpop.xlane.xlu1 %2578 }
 0x4f9   : > { %v7542_v59 = vpop.xlane.xlu0 %2731  ;;  %6161 = vrsqrt.f32 %v2595_v18 }
 0x4fa   : > { %v6005_v60 = vpack.i.bf16 %v2773_v55, %v2772_v54 }
 0x4fb   : > { %v6150_v50 = vpop.eup %6149 }
 0x4fc   : > { %v2768_v62 = vmul.f32 %v6150_v50, %v8337_v15  ;;  %v7564_v50 = vpop.xlane.xlu1 %2584 }
 0x4fd   : > { %v7551_v5 = vpop.xlane.xlu0 %2575 }
 0x4fe   : > { %v6152_v2 = vpop.eup %6151  ;;  %v5995_v38 = vpack.i.bf16 %v2769_v40, %v2768_v62 }
 0x4ff   : > { %v6154_v52 = vpop.eup %6153  ;;  %v2624_v6 = vmul.f32 %v6152_v2, %v8337_v15 }
 0x500   : > { %v6156_v45 = vpop.eup %6155  ;;  %v2775_v57 = vmul.f32 %v6154_v52, %v6968_v21 }
 0x501   : > { %v6158_v24 = vpop.eup %6157  ;;  %v2774_v18 = vmul.f32 %v6156_v45, %v6962_v17  ;;  %v7562_v55 = vpop.xlane.xlu0 %2581 }
 0x502   : > { %v2625_v44 = vmul.f32 %v6158_v24, %v6899_v53  ;;  %v7573_v45 = vpop.xlane.xlu1 %2590 }
 0x503   : > { %v6010_v54 = vpack.i.bf16 %v2775_v57, %v2774_v18 }
 0x505   : > { %6001 = vrot.lane.b32.xlu1 %v6000_v39, %s6555_s19  ;;  %v6160_v39 = vpop.eup %6159  ;;  %v7571_v53 = vpop.xlane.xlu0 %2587 }
 0x506   : > { %v6162_v40 = vpop.eup %6161  ;;  %v2626_v2 = vmul.f32 %v6160_v39, %v6930_v3  ;;  %v1677_v15 = vpop.xlane.xlu1 %1676 }
 0x507   : > { %v1721_v18 = vsub.f32 %v7417_v23, %v1677_v15 }
 0x509   : > { %6006 = vrot.lane.b32.xlu1 %v6005_v60, %s6555_s19  ;;  %v2627_v60 = vmul.f32 %v6162_v40, %v6978_v27  ;;  %v1674_v62 = vpop.xlane.xlu0 %1673  ;;  %v1738_v40 = vmul.f32 1.442695, %v1721_v18 }
 0x50a   : > { %v1720_v52 = vsub.f32 %v7419_v58, %v1674_v62 }
 0x50b   : > { %5996 = vrot.lane.b32.xlu0 %v5995_v38, %s6555_s19  ;;  %v1683_v38 = vpop.xlane.xlu1 %1682 }
 0x50d   : > { %2786 = vrot.lane.b32.xlu1 %v2624_v6, %s6556_s18  ;;  %v1680_v24 = vpop.xlane.xlu0 %1679  ;;  %v1736_v6 = vmul.f32 1.442695, %v1720_v52 }
 0x50e   : > { %v1722_v57 = vsub.f32 %v7429_v43, %v1680_v24 }
 0x50f   : > { %2788 = vrot.lane.b32.xlu0 %v2625_v44, %s6556_s18  ;;  %v1689_v3 = vpop.xlane.xlu1 %1688  ;;  %6163 = vpow2.f32 %v1736_v6 }
 0x510   : > { %v1740_v27 = vmul.f32 1.442695, %v1722_v57  ;;  %v1725_v43 = vsub.f32 %v7440_v32, %v1689_v3 }
 0x511   : > { %6011 = vrot.lane.b32.xlu1 %v6010_v54, %s6555_s19  ;;  %v1686_v44 = vpop.xlane.xlu0 %1685 }
 0x512   : > { %v1724_v39 = vsub.f32 %v7442_v8, %v1686_v44  ;;  %6165 = vpow2.f32 %v1740_v27  ;;  %v1746_v8 = vmul.f32 1.442695, %v1725_v43 }
 0x513   : > { %2881 = vrot.lane.b32.xlu0 %v2626_v2, %s6556_s18  ;;  %v1723_v2 = vsub.f32 %v7427_v47, %v1683_v38  ;;  %6167 = vpow2.f32 %v1738_v40 }
 0x514   : > { %v1695_v54 = vpop.xlane.xlu1 %1694 }
 0x515   : > { %2883 = vrot.lane.b32.xlu1 %v2627_v60, %s6556_s18  ;;  %v1744_v60 = vmul.f32 1.442695, %v1724_v39  ;;  %v1727_v58 = vsub.f32 %v7455_v31, %v1695_v54  ;;  %v1692_v62 = vpop.xlane.xlu0 %1691  ;;  %v1742_v52 = vmul.f32 1.442695, %v1723_v2 }
 0x516   : > { %v1726_v23 = vsub.f32 %v7458_v30, %v1692_v62 }
 0x517   : > { %6169 = vpow2.f32 %v1744_v60  ;;  %v1750_v24 = vmul.f32 1.442695, %v1727_v58 }
 0x518   : > { %6171 = vpow2.f32 %v1742_v52  ;;  %v1748_v6 = vmul.f32 1.442695, %v1726_v23 }
 0x519   : > { %v7584_v15 = vpop.eup %6163  ;;  %6173 = vpow2.f32 %v1750_v24 }
 0x51a   : > { %v1768_v47 = vsel %vm1671_vm3, %v7584_v15, 0.0  ;;  %6175 = vpow2.f32 %v1746_v8 }
 0x51b   : > { %6177 = vpow2.f32 %v1748_v6 }
 0x51c   : > { %v7588_v38 = vpop.eup %6165 }
 0x51d   : > { %v7590_v31 = vpop.eup %6167  ;;  %v1774_v32 = vsel %vm1671_vm3, %v7588_v38, 0.0 }
 0x51e   : > { %v1771_v57 = vsel %vm1671_vm3, %v7590_v31, 0.0 }
 0x521   : > { %v7594_v30 = vpop.eup %6169 }
 0x522   : > { %v7598_v3 = vpop.eup %6171  ;;  %v1780_v44 = vsel %vm1671_vm3, %v7594_v30, 0.0 }
 0x523   : > { %v7602_v18 = vpop.eup %6173  ;;  %v1777_v2 = vsel %vm1671_vm3, %v7598_v3, 0.0 }
 0x524   : > { %v7608_v60 = vpop.eup %6175  ;;  %v1789_v62 = vsel %vm1671_vm3, %v7602_v18, 0.0 }
 0x525   : > { %v7612_v52 = vpop.eup %6177 }
 0x532   : > { %1769 = vadd.xlane.f32.xlu0 %v1768_v47 }
 0x536   : > { %1775 = vadd.xlane.f32.xlu0 %v1774_v32 }
 0x539   : > { %1772 = vadd.xlane.f32.xlu1 %v1771_v57 }
 0x53a   : > { %1781 = vadd.xlane.f32.xlu0 %v1780_v44  ;;  %v1701_v27 = vpop.xlane.xlu0 %1700 }
 0x53b   : > { %v1729_v39 = vsub.f32 %v7466_v25, %v1701_v27  ;;  %v1698_v54 = vpop.xlane.xlu1 %1697  ;;  %v1783_v25 = vsel %vm1671_vm3, %v7608_v60, 0.0 }
 0x53c   : > { %v1728_v40 = vsub.f32 %v7470_v0, %v1698_v54  ;;  %v1786_v0 = vsel %vm1671_vm3, %v7612_v52, 0.0 }
 0x53d   : > { %v1754_v58 = vmul.f32 1.442695, %v1729_v39  ;;  %1778 = vadd.xlane.f32.xlu1 %v1777_v2 }
 0x53e   : > { %v1752_v43 = vmul.f32 1.442695, %v1728_v40  ;;  %1790 = vadd.xlane.f32.xlu0 %v1789_v62 }
 0x53f   : > { %6179 = vpow2.f32 %v1754_v58 }
 0x540   : > { %6181 = vpow2.f32 %v1752_v43 }
 0x541   : > { %1784 = vadd.xlane.f32.xlu1 %v1783_v25 }
 0x542   : > { %1787 = vadd.xlane.f32.xlu0 %v1786_v0 }
 0x549   : > { %v7618_v24 = vpop.eup %6179 }
 0x54a   : > { %v1795_v23 = vsel %vm1671_vm3, %v7618_v24, 0.0  ;;  %v7622_v8 = vpop.eup %6181 }
 0x54b   : > { %1796 = vadd.xlane.f32.xlu1 %v1795_v23  ;;  %v1792_v6 = vsel %vm1671_vm3, %v7622_v8, 0.0 }
 0x54f   : > { %1793 = vadd.xlane.f32.xlu1 %v1792_v6 }
 0x557   : > { %v1707_v47 = vpop.xlane.xlu1 %1706 }
 0x558   : > { %v1731_v32 = vsub.f32 %v7478_v16, %v1707_v47  ;;  %v1704_v57 = vpop.xlane.xlu0 %1703 }
 0x559   : > { %v1730_v44 = vsub.f32 %v7480_v4, %v1704_v57 }
 0x55a   : > { %v1758_v27 = vmul.f32 1.442695, %v1731_v32 }
 0x55b   : > { %v1756_v39 = vmul.f32 1.442695, %v1730_v44 }
 0x55c   : > { %6183 = vpow2.f32 %v1758_v27 }
 0x55d   : > { %6185 = vpow2.f32 %v1756_v39 }
 0x566   : > { %v7628_v54 = vpop.eup %6183 }
 0x567   : > { %v7630_v40 = vpop.eup %6185  ;;  %v1801_v2 = vsel %vm1671_vm3, %v7628_v54, 0.0 }
 0x568   : > { %1802 = vadd.xlane.f32.xlu1 %v1801_v2  ;;  %v1798_v58 = vsel %vm1671_vm3, %v7630_v40, 0.0 }
 0x569   : > { %1799 = vadd.xlane.f32.xlu0 %v1798_v58 }
 0x578   : > { %v1713_v16 = vpop.xlane.xlu1 %1712 }
 0x579   : > { %v1733_v62 = vsub.f32 %v7501_v37, %v1713_v16  ;;  %v1710_v4 = vpop.xlane.xlu0 %1709  ;;  %v2746_v16 = vmax.f32 %v7507_v19, 1e-24  ;;  %v2598_v19 = vmax.f32 %v7515_v42, 1e-24  ;;  %v2748_v42 = vmax.f32 %v7530_v36, 1e-24 }
 0x57a   : > { %v1732_v43 = vsub.f32 %v7503_v20, %v1710_v4  ;;  %v2745_v4 = vmax.f32 %v7492_v48, 1e-24  ;;  %v2600_v48 = vmax.f32 %v7534_v14, 1e-24 }
 0x57b   : > { %v1762_v25 = vmul.f32 1.442695, %v1733_v62 }
 0x57c   : > { %v1760_v0 = vmul.f32 1.442695, %v1732_v43 }
 0x57d   : > { %6187 = vpow2.f32 %v1762_v25  ;;  %v2597_v25 = vmax.f32 %v7496_v1, 1e-24 }
 0x57e   : > { %6189 = vpow2.f32 %v1760_v0  ;;  %v2751_v0 = vmax.f32 %v7544_v63, 1e-24 }
 0x581   : > { %v1719_v23 = vpop.xlane.xlu1 %1718 }
 0x582   : > { %v1735_v6 = vsub.f32 %v7520_v56, %v1719_v23  ;;  %v1716_v47 = vpop.xlane.xlu0 %1715  ;;  %v2596_v56 = vmax.f32 %v7494_v29, 1e-24  ;;  %v2744_v29 = vmax.f32 %v7490_v35, 1e-24 }
 0x583   : > { %v1734_v32 = vsub.f32 %v7523_v9, %v1716_v47  ;;  %v2747_v9 = vmax.f32 %v7509_v12, 1e-24  ;;  %v2599_v12 = vmax.f32 %v7517_v10, 1e-24  ;;  %v2749_v47 = vmax.f32 %v7532_v49, 1e-24 }
 0x584   : > { %v1766_v57 = vmul.f32 1.442695, %v1735_v6  ;;  %v2750_v6 = vmax.f32 %v7542_v59, 1e-24  ;;  %v2603_v49 = vmax.f32 %v7553_v51, 1e-24 }
 0x585   : > { %v1764_v44 = vmul.f32 1.442695, %v1734_v32 }
 0x586   : > { %6191 = vpow2.f32 %v1766_v57 }
 0x587   : > { %v7640_v27 = vpop.eup %6187  ;;  %6193 = vpow2.f32 %v1764_v44 }
 0x588   : > { %v7642_v37 = vpop.eup %6189  ;;  %v1807_v20 = vsel %vm1671_vm3, %v7640_v27, 0.0  ;;  %6195 = vrsqrt.f32 %v2596_v56 }
 0x589   : > { %1808 = vadd.xlane.f32.xlu1 %v1807_v20  ;;  %v1804_v39 = vsel %vm1671_vm3, %v7642_v37, 0.0  ;;  %6197 = vrsqrt.f32 %v2747_v9 }
 0x58a   : > { %1805 = vadd.xlane.f32.xlu0 %v1804_v39  ;;  %6199 = vrsqrt.f32 %v2746_v16  ;;  %v2601_v39 = vmax.f32 %v7536_v13, 1e-24  ;;  %v2605_v16 = vmax.f32 %v7564_v50, 1e-24  ;;  %v2607_v50 = vmax.f32 %v7573_v45, 1e-24 }
 0x58b   : > { %6201 = vrsqrt.f32 %v2745_v4 }
 0x58c   : > { %6203 = vrsqrt.f32 %v2744_v29  ;;  %v7682_v29 = vpop.permute.xlu1 %6001 }
 0x58d   : > { %6205 = vrsqrt.f32 %v2599_v12 }
 0x58e   : > { %6207 = vrsqrt.f32 %v2598_v19 }
 0x58f   : > { %6209 = vrsqrt.f32 %v2597_v25 }
 0x590   : > { %v7649_v2 = vpop.eup %6191  ;;  %6211 = vrsqrt.f32 %v2600_v48 }
 0x591   : > { %v7652_v58 = vpop.eup %6193  ;;  %v1813_v62 = vsel %vm1671_vm3, %v7649_v2, 0.0  ;;  %6213 = vrsqrt.f32 %v2751_v0  ;;  %v7691_v0 = vpop.permute.xlu0 %5996 }
 0x592   : > { %1814 = vadd.xlane.f32.xlu1 %v1813_v62  ;;  %v1810_v43 = vsel %vm1671_vm3, %v7652_v58, 0.0  ;;  %v6196_v23 = vpop.eup %6195  ;;  %6215 = vrsqrt.f32 %v2750_v6  ;;  %v7697_v6 = vpop.permute.xlu1 %6006 }
 0x593   : > { %1811 = vadd.xlane.f32.xlu0 %v1810_v43  ;;  %v6198_v35 = vpop.eup %6197  ;;  %v2628_v1 = vmul.f32 %v6196_v23, %v7048_v26  ;;  %6217 = vrsqrt.f32 %v2749_v47  ;;  %v2602_v43 = vmax.f32 %v7551_v5, 1e-24  ;;  %v2604_v5 = vmax.f32 %v7562_v55, 1e-24 }
 0x594   : > { %v6200_v32 = vpop.eup %6199  ;;  %v2779_v14 = vmul.f32 %v6198_v35, %v7013_v46  ;;  %6219 = vrsqrt.f32 %v2748_v42  ;;  %v2606_v55 = vmax.f32 %v7571_v53, 1e-24 }
 0x595   : > { %v6202_v10 = vpop.eup %6201  ;;  %v2778_v59 = vmul.f32 %v6200_v32, %v7007_v41  ;;  %6221 = vrsqrt.f32 %v2603_v49 }
 0x596   : > { %v6204_v63 = vpop.eup %6203  ;;  %v2777_v57 = vmul.f32 %v6202_v10, %v6991_v33  ;;  %6223 = vrsqrt.f32 %v2601_v39  ;;  %v7703_v10 = vpop.permute.xlu0 %2788 }
 0x597   : > { %v6020_v44 = vpack.i.bf16 %v2779_v14, %v2778_v59  ;;  %v2776_v36 = vmul.f32 %v6204_v63, %v6981_v28  ;;  %v6206_v20 = vpop.eup %6205  ;;  %6225 = vrsqrt.f32 %v2605_v16  ;;  %v7707_v14 = vpop.permute.xlu1 %2786 }
 0x598   : > { %v6208_v26 = vpop.eup %6207  ;;  %v2631_v4 = vmul.f32 %v6206_v20, %v6968_v21  ;;  %6227 = vrsqrt.f32 %v2602_v43 }
 0x599   : > { %v6015_v56 = vpack.i.bf16 %v2777_v57, %v2776_v36  ;;  %v6210_v9 = vpop.eup %6209  ;;  %6229 = vrsqrt.f32 %v2607_v50 }
 0x59a   : > { %v6212_v62 = vpop.eup %6211  ;;  %v2629_v12 = vmul.f32 %v6210_v9, %v6948_v11  ;;  %v2630_v11 = vmul.f32 %v6208_v26, %v6962_v17  ;;  %6231 = vrsqrt.f32 %v2604_v5  ;;  %v7713_v49 = vpop.permute.xlu0 %2881  ;;  %v8348_v5 = vld [vmem:[#allocation25_spill] sm:$0xff] }
 0x59b   : > { %v6214_v51 = vpop.eup %6213  ;;  %v2632_v25 = vmul.f32 %v6212_v62, %v6981_v28  ;;  %6233 = vrsqrt.f32 %v2606_v55  ;;  %v7717_v36 = vpop.permute.xlu1 %6011 }
 0x59c   : > { %v6216_v13 = vpop.eup %6215  ;;  %v2783_v21 = vmul.f32 %v6214_v51, %v7053_v34 }
 0x59d   : > { %v6218_v19 = vpop.eup %6217  ;;  %v2782_v23 = vmul.f32 %v6216_v13, %v7044_v22  ;;  %v8344_v13 = vld [vmem:[#allocation21_spill] sm:$0xff] }
 0x59e   : > { %v6220_v48 = vpop.eup %6219  ;;  %v2781_v45 = vmul.f32 %v6218_v19, %v7032_v7 }
 0x59f   : > { %v6030_v28 = vpack.i.bf16 %v2783_v21, %v2782_v23  ;;  %v2780_v35 = vmul.f32 %v6220_v48, %v7025_v61  ;;  %v6222_v47 = vpop.eup %6221  ;;  %v7724_v26 = vpop.permute.xlu1 %2883  ;;  %v8347_v48 = vld [vmem:[#allocation26_spill] sm:$0xff] }
 0x5a0   : > { %v6224_v17 = vpop.eup %6223  ;;  %v2635_v42 = vmul.f32 %v6222_v47, %v7013_v46 }
 0x5a1   : > { %v6025_v32 = vpack.i.bf16 %v2781_v45, %v2780_v35  ;;  %v2633_v63 = vmul.f32 %v6224_v17, %v6991_v33  ;;  %v8350_v17 = vld [vmem:[#allocation24_spill] sm:$0xff] }
 0x5a3   : > { %2976 = vrot.lane.b32.xlu1 %v2628_v1, %s6556_s18  ;;  %v6226_v1 = vpop.eup %6225 }
 0x5a4   : > { %v6228_v59 = vpop.eup %6227  ;;  %v2637_v53 = vmul.f32 %v6226_v1, %v7032_v7  ;;  %v8351_v1 = vld [vmem:[#allocation27_spill] sm:$0xff] }
 0x5a5   : > { %v6230_v57 = vpop.eup %6229  ;;  %v2634_v46 = vmul.f32 %v6228_v59, %v7007_v41  ;;  %v8338_v41 = vld [vmem:[#allocation23_spill] sm:$0xff] }
 0x5a6   : > { %v2639_v20 = vmul.f32 %v6230_v57, %v7053_v34 }
 0x5a7   : > { %6021 = vrot.lane.b32.xlu1 %v6020_v44, %s6555_s19  ;;  %v6232_v44 = vpop.eup %6231 }
 0x5a8   : > { %v2636_v39 = vmul.f32 %v6232_v44, %v7025_v61  ;;  %v6234_v7 = vpop.eup %6233  ;;  %v8341_v61 = vld [vmem:[#allocation29_spill] sm:$0xff] }
 0x5a9   : > { %6016 = vrot.lane.b32.xlu0 %v6015_v56, %s6555_s19  ;;  %v8339_v56 = vld [vmem:[#allocation22_spill] sm:$0xff]  ;;  %v2638_v62 = vmul.f32 %v6234_v7, %v7044_v22  ;;  %v5998_v7 = vunpack.i.l.bf16 %v7691_v0 }
 0x5aa   : > { %v8340_v9 = vpack.i.bf16 %v8338_v41, %v8339_v56 }
 0x5ab   : > { %3073 = vrot.lane.b32.xlu1 %v2631_v4, %s6556_s18  ;;  %v8342_v4 = vld [vmem:[#allocation28_spill] sm:$0xff] }
 0x5ac   : > { %v8343_v51 = vpack.i.bf16 %v8341_v61, %v8342_v4 }
 0x5ad   : > { %2978 = vrot.lane.b32.xlu0 %v2629_v12, %s6556_s18  ;;  %v8345_v12 = vld [vmem:[#allocation20_spill] sm:$0xff] }
 0x5ae   : > { %v8346_v19 = vpack.i.bf16 %v8344_v13, %v8345_v12 }
 0x5af   : > { %3166 = vrot.lane.b32.xlu1 %v2632_v25, %s6556_s18 }
 0x5b1   : > { %3071 = vrot.lane.b32.xlu0 %v2630_v11, %s6556_s18  ;;  %v8349_v11 = vpack.i.bf16 %v8347_v48, %v8348_v5 }
 0x5b3   : > { %6031 = vrot.lane.b32.xlu1 %v6030_v28, %s6555_s19 }
 0x5b5   : > { %6026 = vrot.lane.b32.xlu0 %v6025_v32, %s6555_s19  ;;  %s6464_s19 = sshll.u32 %s6557_s14, 4  ;;  %s6465_s19 = int_to_ptr.vmem [resolvable:$false] %s6464_s19 }
 0x5b6   : > { %p6467_p2 = scmp.lt.s32.totalorder %s8206_s13, %s6465_s19 }
 0x5b7   : > { %3263 = vrot.lane.b32.xlu1 %v2635_v42, %s6556_s18 }
 0x5b9   : > { %3168 = vrot.lane.b32.xlu0 %v2633_v63, %s6556_s18 }
 0x5bb   : > { %3358 = vrot.lane.b32.xlu1 %v2637_v53, %s6556_s18 }
 0x5bd   : > { %3261 = vrot.lane.b32.xlu0 %v2634_v46, %s6556_s18  ;;  %v8352_v46 = vld [vmem:[#allocation32_spill] sm:$0xff] }
 0x5bf   : > { %3453 = vrot.lane.b32.xlu1 %v2639_v20, %s6556_s18  ;;  %v1770_v33 = vpop.xlane.xlu0 %1769  ;;  %v8353_v20 = vld [vmem:[#allocation38_spill] sm:$0xff] }
 0x5c0   : > { %6235 = vrcp.f32 %v1770_v33  ;;  %v8355_v33 = vld [vmem:[#allocation41_spill] sm:$0xff] }
 0x5c1   : > { %3356 = vrot.lane.b32.xlu0 %v2636_v39, %s6556_s18 }
 0x5c3   : > { %6041 = vrot.lane.b32.xlu1 %v8340_v9, %s6556_s18  ;;  %v1776_v16 = vpop.xlane.xlu0 %1775 }
 0x5c4   : > { %6237 = vrcp.f32 %v1776_v16 }
 0x5c5   : > { %3451 = vrot.lane.b32.xlu0 %v2638_v62, %s6556_s18 }
 0x5c6   : > { %v1773_v34 = vpop.xlane.xlu1 %1772 }
 0x5c7   : > { %6239 = vrcp.f32 %v1773_v34  ;;  %6051 = vrot.lane.b32.xlu1 %v8343_v51, %s6556_s18  ;;  %v1782_v43 = vpop.xlane.xlu0 %1781 }
 0x5c8   : > { %6241 = vrcp.f32 %v1782_v43 }
 0x5c9   : > { %6036 = vrot.lane.b32.xlu0 %v8346_v19, %s6556_s18 }
 0x5ca   : > { %v6236_v50 = vpop.eup %6235  ;;  %v1779_v25 = vpop.xlane.xlu1 %1778 }
 0x5cb   : > { %6243 = vrcp.f32 %v1779_v25  ;;  %v1791_v22 = vpop.xlane.xlu0 %1790  ;;  %v1832_v21 = vmul.f32 %v6236_v50, %v7584_v15  ;;  %v6009_v50 = vunpack.i.h.bf16 %v7697_v6  ;;  %v6008_v25 = vunpack.i.l.bf16 %v7697_v6 }
 0x5cc   : > { %6245 = vrcp.f32 %v1791_v22 }
 0x5cd   : > { %6046 = vrot.lane.b32.xlu0 %v8349_v11, %s6556_s18  ;;  %5422 = vmatprep.mubr.msk.f32.mxu1 %vm1671_vm3, %v1832_v21  ;;  %v5758_v11 = vpack.c.bf16 %v6009_v50, %v6008_v25 }
 0x5ce   : > { %v1785_v23 = vpop.xlane.xlu1 %1784  ;;  %v6238_v28 = vpop.eup %6237 }
 0x5cf   : > { %6247 = vrcp.f32 %v1785_v23  ;;  %v1788_v45 = vpop.xlane.xlu0 %1787  ;;  %v1834_v55 = vmul.f32 %v6238_v28, %v7588_v38  ;;  %v6013_v28 = vunpack.i.l.bf16 %v7717_v36 }
 0x5d0   : > { %6249 = vrcp.f32 %v1788_v45 }
 0x5d1   : > { %v6240_v35 = vpop.eup %6239 }
 0x5d2   : > { %v1833_v47 = vmul.f32 %v6240_v35, %v7590_v31  ;;  %v6242_v32 = vpop.eup %6241 }
 0x5d3   : > { %v1836_v63 = vmul.f32 %v6242_v32, %v7594_v30 }
 0x5d4   : > { %5423 = vmatmul.mubr.msk.f32.vlgmr.msra.gmra.mrb[16].mxu1 %vm1671_vm3, %v1833_v47 }
 0x5d5   : > { %v6244_v15 = vpop.eup %6243  ;;  %5721 = vmatpush3.bf16.msra.mxu1 %v8350_v17  ;;  %5429 = vmatprep.mubr.msk.f32.mxu1 %vm1671_vm3, %v1834_v55 }
 0x5d6   : > { %v1835_v42 = vmul.f32 %v6244_v15, %v7598_v3  ;;  %5723 = vmatprep.subr.bf16.mxu1 %v8351_v1  ;;  %v6246_v59 = vpop.eup %6245 }
 0x5d7   : > { %v1839_v44 = vmul.f32 %v6246_v59, %v7602_v18  ;;  %v5999_v18 = vunpack.i.h.bf16 %v7691_v0 }
 0x5d8   : > { %5430 = vmatmul.mubr.msk.f32.vlgmr.msra.gmra.mrb[18].mxu1 %vm1671_vm3, %v1835_v42  ;;  %v1797_v31 = vpop.xlane.xlu1 %1796 }
 0x5d9   : > { %v6248_v53 = vpop.eup %6247  ;;  %5725 = vmatpush3.bf16.msra.mxu1 %v8351_v1  ;;  %5436 = vmatprep.mubr.msk.f32.mxu1 %vm1671_vm3, %v1836_v63  ;;  %6251 = vrcp.f32 %v1797_v31  ;;  %v5746_v9 = vpack.c.bf16 %v5999_v18, %v5998_v7 }
 0x5da   : > { %v6250_v38 = vpop.eup %6249  ;;  %v1837_v57 = vmul.f32 %v6248_v53, %v7608_v60  ;;  %5731 = vmatprep.subr.bf16.mxu1 %v8352_v46  ;;  %v8354_v60 = vld [vmem:[#allocation35_spill] sm:$0xff] }
 0x5db   : > { %v1838_v3 = vmul.f32 %v6250_v38, %v7612_v52 }
 0x5dc   : > { %5437 = vmatmul.mubr.msk.f32.vlgmr.msra.gmra.mrb[20].mxu1 %vm1671_vm3, %v1837_v57  ;;  %v1794_v30 = vpop.xlane.xlu1 %1793 }
 0x5dd   : > { %5733 = vmatpush3.bf16.msra.mxu1 %v8352_v46  ;;  %6253 = vrcp.f32 %v1794_v30  ;;  %5443 = vmatprep.mubr.msk.f32.mxu0 %vm1671_vm3, %v1838_v3 }
 0x5de   : > { %5739 = vmatprep.subr.bf16.mxu1 %v8353_v20  ;;  %5444 = vmatmul.mubr.msk.f32.vlgmr.msra.gmra.mrb[32].mxu0 %vm1671_vm3, %v1839_v44 }
 0x5df   : > { %5737 = vmatpush3.bf16.msra.mxu0 %v8354_v60 }
 0x5e0   : > { %5743 = vmatprep.subr.bf16.mxu0 %v8355_v33 }
 0x5e3   : > { %v6252_v52 = vpop.eup %6251 }
 0x5e4   : > { %v1841_v56 = vmul.f32 %v6252_v52, %v7618_v24  ;;  %v6003_v24 = vunpack.i.l.bf16 %v7682_v29 }
 0x5e7   : > { %v6254_v39 = vpop.eup %6253 }
 0x5e8   : > { %v1840_v41 = vmul.f32 %v6254_v39, %v7622_v8  ;;  %v6004_v8 = vunpack.i.h.bf16 %v7682_v29 }
 0x5ea   : > { %5450 = vmatprep.mubr.msk.f32.mxu1 %vm1671_vm3, %v1840_v41  ;;  %v5752_v43 = vpack.c.bf16 %v6004_v8, %v6003_v24 }
 0x5eb   : > { %5451 = vmatmul.mubr.msk.f32.vlgmr.msra.gmra.mrb[22].mxu1 %vm1671_vm3, %v1841_v56 }
 0x5ec   : > { %5741 = vmatpush3.bf16.msra.mxu1 %v8353_v20 }
 0x5ed   : > { %5748 = vmatprep.subr.msk.bf16.mxu1 %vm7241_vm2, %v5746_v9 }
 0x5f5   : > { %v1803_v62 = vpop.xlane.xlu1 %1802 }
 0x5f6   : > { %6255 = vrcp.f32 %v1803_v62  ;;  %v1800_v34 = vpop.xlane.xlu0 %1799 }
 0x5f7   : > { %6257 = vrcp.f32 %v1800_v34 }
 0x600   : > { %v6256_v61 = vpop.eup %6255 }
 0x601   : > { %v6258_v0 = vpop.eup %6257  ;;  %v1843_v51 = vmul.f32 %v6256_v61, %v7628_v54 }
 0x602   : > { %v1842_v4 = vmul.f32 %v6258_v0, %v7630_v40 }
 0x604   : > { %5457 = vmatprep.mubr.msk.f32.mxu0 %vm1671_vm3, %v1842_v4 }
 0x605   : > { %5458 = vmatmul.mubr.msk.f32.vlgmr.msra.gmra.mrb[34].mxu0 %vm1671_vm3, %v1843_v51 }
 0x606   : > { %5745 = vmatpush3.bf16.msra.mxu0 %v8355_v33 }
 0x607   : > { %5754 = vmatprep.subr.msk.bf16.mxu0 %vm7241_vm2, %v5752_v43 }
 0x616   : > { %v1809_v13 = vpop.xlane.xlu1 %1808 }
 0x617   : > { %6259 = vrcp.f32 %v1809_v13  ;;  %v1806_v12 = vpop.xlane.xlu0 %1805 }
 0x618   : > { %6261 = vrcp.f32 %v1806_v12 }
 0x61f   : > { %v1815_v19 = vpop.xlane.xlu1 %1814 }
 0x620   : > { %6263 = vrcp.f32 %v1815_v19  ;;  %v1812_v29 = vpop.xlane.xlu0 %1811 }
 0x621   : > { %v6260_v40 = vpop.eup %6259  ;;  %6265 = vrcp.f32 %v1812_v29 }
 0x622   : > { %v6262_v54 = vpop.eup %6261  ;;  %v1845_v48 = vmul.f32 %v6260_v40, %v7640_v27  ;;  %v6014_v27 = vunpack.i.h.bf16 %v7717_v36 }
 0x623   : > { %v2977_v22 = vpop.permute.xlu1 %2976  ;;  %v1844_v21 = vmul.f32 %v6262_v54, %v7642_v37 }
 0x624   : > { %v6017_v5 = vpop.permute.xlu0 %6016 }
 0x625   : > { %5464 = vmatprep.mubr.msk.f32.mxu1 %vm1671_vm3, %v1844_v21  ;;  %v6019_v47 = vunpack.i.h.bf16 %v6017_v5  ;;  %v6018_v55 = vunpack.i.l.bf16 %v6017_v5 }
 0x626   : > { %5465 = vmatmul.mubr.msk.f32.vlgmr.msra.gmra.mrb[24].mxu1 %vm1671_vm3, %v1845_v48 }
 0x627   : > { %v6022_v23 = vpop.permute.xlu1 %6021  ;;  %5751 = vmatpush3.bf16.xpose.msk.msra.mxu1 %vm7241_vm2, %v5746_v9  ;;  %5478 = vmatprep.mubr.msk.f32.mxu1 %vm652_vm1, %v7707_v14  ;;  %v5764_v14 = vpack.c.bf16 %v6014_v27, %v6013_v28  ;;  %v5770_v36 = vpack.c.bf16 %v6019_v47, %v6018_v55  ;;  %v614_v27 = vld [vmem:[#allocation9 + $0x10] sm:$0xff] }
 0x628   : > { %v2979_v45 = vpop.permute.xlu0 %2978  ;;  %5760 = vmatprep.subr.msk.bf16.mxu1 %vm7241_vm2, %v5758_v11 }
 0x62a   : > { %v6264_v37 = vpop.eup %6263 }
 0x62b   : > { %v6266_v6 = vpop.eup %6265  ;;  %v3074_v35 = vpop.permute.xlu1 %3073  ;;  %v1847_v17 = vmul.f32 %v6264_v37, %v7649_v2  ;;  %v6024_v2 = vunpack.i.h.bf16 %v6022_v23 }
 0x62c   : > { %v3072_v32 = vpop.permute.xlu0 %3071  ;;  %v1846_v15 = vmul.f32 %v6266_v6, %v7652_v58 }
 0x62e   : > { %5471 = vmatprep.mubr.msk.f32.mxu0 %vm1671_vm3, %v1846_v15  ;;  %5479 = vmatmul.mubr.msk.f32.vlgmr.msra.gmra.mrb[26].mxu1 %vm652_vm1, %v7703_v10  ;;  %v6023_v10 = vunpack.i.l.bf16 %v6022_v23  ;;  %v615_v23 = vld [vmem:[#allocation9 + $0x18] sm:$0xff] }
 0x62f   : > { %v3167_v42 = vpop.permute.xlu1 %3166  ;;  %5472 = vmatmul.mubr.msk.f32.vlgmr.msra.gmra.mrb[36].mxu0 %vm1671_vm3, %v1847_v17  ;;  %5763 = vmatpush3.bf16.xpose.msk.msra.mxu1 %vm7241_vm2, %v5758_v11  ;;  %v7880_v11 = vstv %s5134_s15 }
 0x630   : > { %5757 = vmatpush3.bf16.xpose.msk.msra.mxu0 %vm7241_vm2, %v5752_v43  ;;  %5492 = vmatprep.mubr.msk.f32.mxu1 %vm652_vm1, %v2977_v22  ;;  %v6027_v58 = vpop.permute.xlu0 %6026  ;;  %v5776_v53 = vpack.c.bf16 %v6024_v2, %v6023_v10 }
 0x631   : > { %5485 = vmatprep.mubr.msk.f32.mxu0 %vm652_vm1, %v7713_v49  ;;  %5766 = vmatprep.subr.msk.bf16.mxu0 %vm7241_vm2, %v5764_v14  ;;  %v6029_v63 = vunpack.i.h.bf16 %v6027_v58  ;;  %v6028_v59 = vunpack.i.l.bf16 %v6027_v58 }
 0x632   : > { %5772 = vmatprep.subr.msk.bf16.mxu1 %vm7241_vm2, %v5770_v36 }
 0x633   : > { %v6032_v1 = vpop.permute.xlu1 %6031  ;;  %v5782_v49 = vpack.c.bf16 %v6029_v63, %v6028_v59 }
 0x634   : > { %v3169_v31 = vpop.permute.xlu0 %3168  ;;  %v6033_v46 = vunpack.i.l.bf16 %v6032_v1 }
 0x636   : > { %5493 = vmatmul.mubr.msk.f32.vlgmr.msra.gmra.mrb[28].mxu1 %vm652_vm1, %v2979_v45 }
 0x637   : > { %5486 = vmatmul.mubr.msk.f32.vlgmr.msra.gmra.mrb[38].mxu0 %vm652_vm1, %v7724_v26  ;;  %v3264_v38 = vpop.permute.xlu1 %3263  ;;  %5775 = vmatpush3.bf16.xpose.msk.msra.mxu1 %vm7241_vm2, %v5770_v36  ;;  %v6034_v26 = vunpack.i.h.bf16 %v6032_v1  ;;  %v619_v36 = vld [vmem:[#allocation9 + $0x38] sm:$0xff] }
 0x638   : > { %5769 = vmatpush3.bf16.xpose.msk.msra.mxu0 %vm7241_vm2, %v5764_v14  ;;  %5499 = vmatprep.mubr.msk.f32.mxu0 %vm652_vm1, %v3072_v32  ;;  %v3262_v57 = vpop.permute.xlu0 %3261  ;;  %v623_v14 = vld [vmem:[#allocation9 + $0x58] sm:$0xff] }
 0x639   : > { %5506 = vmatprep.mubr.msk.f32.mxu1 %vm652_vm1, %v3167_v42  ;;  %5778 = vmatprep.subr.msk.bf16.mxu0 %vm7241_vm2, %v5776_v53  ;;  %v5788_v30 = vpack.c.bf16 %v6034_v26, %v6033_v46 }
 0x63a   : > { %5784 = vmatprep.subr.msk.bf16.mxu1 %vm7241_vm2, %v5782_v49 }
 0x63b   : > { %v3359_v3 = vpop.permute.xlu1 %3358 }
 0x63c   : > { %v3357_v44 = vpop.permute.xlu0 %3356 }
 0x63e   : > { %5507 = vmatmul.mubr.msk.f32.vlgmr.msra.gmra.mrb[30].mxu1 %vm652_vm1, %v3169_v31  ;;  %v618_v31 = vld [vmem:[#allocation9 + $0x30] sm:$0xff] }
 0x63f   : > { %5500 = vmatmul.mubr.msk.f32.vlgmr.msra.gmra.mrb[40].mxu0 %vm652_vm1, %v3074_v35  ;;  %v3454_v20 = vpop.permute.xlu1 %3453  ;;  %5787 = vmatpush3.bf16.xpose.msk.msra.mxu1 %vm7241_vm2, %v5782_v49 }
 0x640   : > { %5781 = vmatpush3.bf16.xpose.msk.msra.mxu0 %vm7241_vm2, %v5776_v53  ;;  %5513 = vmatprep.mubr.msk.f32.mxu0 %vm652_vm1, %v3262_v57  ;;  %v3452_v60 = vpop.permute.xlu0 %3451 }
 0x641   : > { %5520 = vmatprep.mubr.msk.f32.mxu1 %vm652_vm1, %v3357_v44  ;;  %5790 = vmatprep.subr.msk.bf16.mxu0 %vm7241_vm2, %v5788_v30 }
 0x643   : > { %v6042_v33 = vpop.permute.xlu1 %6041 }
 0x644   : > { %v6044_v52 = vunpack.i.h.bf16 %v6042_v33  ;;  %v6043_v39 = vunpack.i.l.bf16 %v6042_v33  ;;  %v6037_v18 = vpop.permute.xlu0 %6036 }
 0x645   : > { %v6039_v7 = vunpack.i.h.bf16 %v6037_v18  ;;  %v6038_v41 = vunpack.i.l.bf16 %v6037_v18 }
 0x646   : > { %v5798_v56 = vpack.c.bf16 %v6044_v52, %v6043_v39  ;;  %5521 = vmatmul.mubr.msk.f32.vlgmr.msra.gmra.mrb[32].mxu1 %vm652_vm1, %v3359_v3  ;;  %v622_v3 = vld [vmem:[#allocation9 + $0x50] sm:$0xff] }
 0x647   : > { %v5794_v9 = vpack.c.bf16 %v6039_v7, %v6038_v41  ;;  %5514 = vmatmul.mubr.msk.f32.vlgmr.msra.gmra.mrb[42].mxu0 %vm652_vm1, %v3264_v38  ;;  %v6052_v62 = vpop.permute.xlu1 %6051  ;;  %v626_v41 = vld [vmem:[#allocation9 + $0x70] sm:$0xff] }
 0x648   : > { %5793 = vmatpush3.bf16.xpose.msk.msra.mxu0 %vm7241_vm2, %v5788_v30  ;;  %5527 = vmatprep.mubr.msk.f32.mxu0 %vm652_vm1, %v3452_v60  ;;  %v6047_v34 = vpop.permute.xlu0 %6046  ;;  %v6054_v8 = vunpack.i.h.bf16 %v6052_v62  ;;  %v6053_v24 = vunpack.i.l.bf16 %v6052_v62  ;;  %v627_v30 = vld [vmem:[#allocation9 + $0x78] sm:$0xff] }
 0x649   : > { %5799 = vmatprep.subr.bf16.mxu0 %v5798_v56  ;;  %v6049_v61 = vunpack.i.h.bf16 %v6047_v34  ;;  %v6048_v0 = vunpack.i.l.bf16 %v6047_v34  ;;  %5795 = vmatprep.subr.bf16.mxu1 %v5794_v9 }
 0x64a   : > { %5797 = vmatpush3.bf16.msra.mxu1 %v5794_v9  ;;  %v7848_v51 = vpack.c.bf16 %v6054_v8, %v6053_v24 }
 0x64b   : > { %v7845_v4 = vpack.c.bf16 %v6049_v61, %v6048_v0 }
 0x64d   : > { %5803 = vmatprep.subr.bf16.mxu1 %v7845_v4 }
 0x64f   : > { %5528 = vmatmul.mubr.msk.f32.vlgmr.msra.gmra.mrb[44].mxu0 %vm652_vm1, %v3454_v20 }
 0x650   : > { %5801 = vmatpush3.bf16.msra.mxu0 %v5798_v56 }
 0x651   : > { %5807 = vmatprep.subr.bf16.mxu0 %v7848_v51 }
 0x6a7   : > { %v7852_v16 = vpop.f32.mrb[16].mxu1 }
 0x6a8   : > { %v7854_v43 = vpop.f32.mrb[17].mxu1 }
 0x6ab   : > { %v7856_v13 = vpop.f32.mrb[18].mxu1 }
 0x6ac   : > { %v7858_v12 = vpop.f32.mrb[19].mxu1 }
 0x6af   : > { %v7860_v19 = vpop.f32.mrb[20].mxu1 }
 0x6b0   : > { %v7862_v29 = vpop.f32.mrb[21].mxu1 }
 0x6b1   : > { %v7864_v40 = vpop.f32.mrb[32].mxu0 }
 0x6b2   : > { %v7866_v54 = vpop.f32.mrb[33].mxu0 }
 0x6be   : > { %v7868_v50 = vpop.f32.mrb[22].mxu1 }
 0x6bf   : > { %v7870_v25 = vpop.f32.mrb[23].mxu1 }
 0x6d8   : > { %v7872_v22 = vpop.f32.mrb[34].mxu0 }
 0x6d9   : > { %v7874_v21 = vpop.f32.mrb[35].mxu0 }
 0x6f9   : > { %v7876_v48 = vpop.f32.mrb[24].mxu1 }
 0x6fa   : > { %v7878_v5 = vpop.f32.mrb[25].mxu1 }
 0x701   : > { %v5480_v45 = vpop.f32.mrb[26].mxu1 }
 0x702   : > { %v3547_v37 = vmul.f32 %v5480_v45, %v7880_v11  ;;  %v7883_v6 = vpop.f32.mrb[36].mxu0  ;;  %v2870_v28 = vpop.f32.mrb[27].mxu1 }
 0x703   : > { %v3546_v35 = vmul.f32 %v7880_v11, %v2870_v28  ;;  %v7886_v47 = vpop.f32.mrb[37].mxu0 }
 0x704   : > { %v7888_v55 = vadd.f32 %v3547_v37, %v615_v23 }
 0x705   : > { %v7890_v32 = vadd.f32 %v3546_v35, %v614_v27 }
 0x706   : > { %v3581_v15 = vsel %vm1671_vm3, %v7888_v55, -inf }
 0x707   : > { %3582 = vmax.xlane.f32.xlu1 %v3581_v15  ;;  %v3578_v17 = vsel %vm1671_vm3, %v7890_v32, -inf }
 0x708   : > { %3579 = vmax.xlane.f32.xlu0 %v3578_v17 }
 0x709   : > { %v5494_v42 = vpop.f32.mrb[28].mxu1 }
 0x70a   : > { %v5487_v58 = vpop.f32.mrb[38].mxu0  ;;  %v3551_v2 = vmul.f32 %v5494_v42, %v7880_v11  ;;  %v3060_v10 = vpop.f32.mrb[29].mxu1 }
 0x70b   : > { %v3549_v1 = vmul.f32 %v5487_v58, %v7880_v11  ;;  %v2965_v63 = vpop.f32.mrb[39].mxu0  ;;  %v3550_v26 = vmul.f32 %v7880_v11, %v3060_v10 }
 0x70c   : > { %v7898_v59 = vadd.f32 %v3551_v2, %v623_v14  ;;  %v3548_v53 = vmul.f32 %v7880_v11, %v2965_v63 }
 0x70d   : > { %v7901_v38 = vadd.f32 %v3549_v1, %v619_v36  ;;  %v7910_v33 = vadd.f32 %v3550_v26, %v622_v3 }
 0x70e   : > { %v3593_v49 = vsel %vm1671_vm3, %v7898_v59, -inf  ;;  %v7905_v57 = vadd.f32 %v3548_v53, %v618_v31 }
 0x70f   : > { %v3587_v46 = vsel %vm1671_vm3, %v7901_v38, -inf  ;;  %3594 = vmax.xlane.f32.xlu1 %v3593_v49  ;;  %v3590_v8 = vsel %vm1671_vm3, %v7910_v33, -inf }
 0x710   : > { %3588 = vmax.xlane.f32.xlu0 %v3587_v46  ;;  %v3584_v7 = vsel %vm1671_vm3, %v7905_v57, -inf }
 0x711   : > { %v5508_v44 = vpop.f32.mrb[30].mxu1 }
 0x712   : > { %v5501_v20 = vpop.f32.mrb[40].mxu0  ;;  %v3250_v60 = vpop.f32.mrb[31].mxu1  ;;  %v3555_v39 = vmul.f32 %v5508_v44, %v7880_v11 }
 0x713   : > { %v3553_v52 = vmul.f32 %v5501_v20, %v7880_v11  ;;  %v3155_v18 = vpop.f32.mrb[41].mxu0  ;;  %v3554_v62 = vmul.f32 %v7880_v11, %v3250_v60 }
 0x714   : > { %v3552_v56 = vmul.f32 %v7880_v11, %v3155_v18  ;;  %3585 = vmax.xlane.f32.xlu0 %v3584_v7  ;;  %v7920_v34 = vadd.f32 %v3555_v39, %v615_v23  ;;  %v8358_v18 = vld [vmem:[#allocation33_spill] sm:$0xff] }
 0x715   : > { %v7917_v9 = vadd.f32 %v3553_v52, %v627_v30  ;;  %v7928_v45 = vadd.f32 %v3554_v62, %v614_v27 }
 0x716   : > { %v7922_v61 = vadd.f32 %v3552_v56, %v626_v41  ;;  %v3605_v42 = vsel %vm1671_vm3, %v7920_v34, -inf }
 0x717   : > { %v3599_v0 = vsel %vm1671_vm3, %v7917_v9, -inf  ;;  %v3602_v27 = vsel %vm1671_vm3, %v7928_v45, -inf }
 0x718   : > { %3600 = vmax.xlane.f32.xlu1 %v3599_v0  ;;  %3591 = vmax.xlane.f32.xlu0 %v3590_v8  ;;  %v3596_v17 = vsel %vm1671_vm3, %v7922_v61, -inf }
 0x719   : > { %v5522_v24 = vpop.f32.mrb[32].mxu1 }
 0x71a   : > { %v5515_v37 = vpop.f32.mrb[42].mxu0  ;;  %v3440_v28 = vpop.f32.mrb[33].mxu1  ;;  %v3559_v23 = vmul.f32 %v5522_v24, %v7880_v11 }
 0x71b   : > { %v3557_v35 = vmul.f32 %v5515_v37, %v7880_v11  ;;  %v3345_v15 = vpop.f32.mrb[43].mxu0  ;;  %v3558_v63 = vmul.f32 %v7880_v11, %v3440_v28 }
 0x71c   : > { %v3556_v58 = vmul.f32 %v7880_v11, %v3345_v15  ;;  %3597 = vmax.xlane.f32.xlu0 %v3596_v17  ;;  %3606 = vmax.xlane.f32.xlu1 %v3605_v42  ;;  %v7941_v10 = vadd.f32 %v3559_v23, %v623_v14 }
 0x71d   : > { %v7937_v2 = vadd.f32 %v3557_v35, %v619_v36  ;;  %v7948_v26 = vadd.f32 %v3558_v63, %v622_v3 }
 0x71e   : > { %v7943_v1 = vadd.f32 %v3556_v58, %v618_v31  ;;  %v3617_v14 = vsel %vm1671_vm3, %v7941_v10, -inf }
 0x71f   : > { %v3611_v53 = vsel %vm1671_vm3, %v7937_v2, -inf  ;;  %v3614_v52 = vsel %vm1671_vm3, %v7948_v26, -inf }
 0x720   : > { %3612 = vmax.xlane.f32.xlu1 %v3611_v53  ;;  %3603 = vmax.xlane.f32.xlu0 %v3602_v27  ;;  %v3608_v44 = vsel %vm1671_vm3, %v7943_v1, -inf }
 0x722   : > { %v5529_v49 = vpop.f32.mrb[44].mxu0 }
 0x723   : > { %v3561_v36 = vmul.f32 %v5529_v49, %v7880_v11  ;;  %v3535_v46 = vpop.f32.mrb[45].mxu0 }
 0x724   : > { %v3560_v31 = vmul.f32 %v7880_v11, %v3535_v46  ;;  %3609 = vmax.xlane.f32.xlu0 %v3608_v44  ;;  %3618 = vmax.xlane.f32.xlu1 %v3617_v14  ;;  %v8357_v11 = vld [vmem:[#allocation34_spill] sm:$0xff] }
 0x725   : > { %v7956_v20 = vadd.f32 %v3561_v36, %v627_v30  ;;  %v8359_v7 = vpack.i.bf16 %v8357_v11, %v8358_v18  ;;  %v8360_v30 = vld [vmem:[#allocation31_spill] sm:$0xff] }
 0x726   : > { %v7958_v60 = vadd.f32 %v3560_v31, %v626_v41  ;;  %v8361_v41 = vld [vmem:[#allocation30_spill] sm:$0xff] }
 0x727   : > { %v3623_v3 = vsel %vm1671_vm3, %v7956_v20, -inf  ;;  %v8362_v56 = vpack.i.bf16 %v8360_v30, %v8361_v41 }
 0x728   : > { %3624 = vmax.xlane.f32.xlu1 %v3623_v3  ;;  %3615 = vmax.xlane.f32.xlu0 %v3614_v52  ;;  %v3620_v39 = vsel %vm1671_vm3, %v7958_v60, -inf }
 0x72c   : > { %3621 = vmax.xlane.f32.xlu0 %v3620_v39 }
 0x739   : > { %6061 = vrot.lane.b32.xlu1 %v8359_v7, %s6556_s18 }
 0x742   : > { %6056 = vrot.lane.b32.xlu0 %v8362_v56, %s6556_s18 }
 0x794   : > { %v3583_v62 = vpop.xlane.xlu1 %3582 }
 0x795   : > { %v3627_v0 = vsub.f32 %v7888_v55, %v3583_v62  ;;  %v3580_v8 = vpop.xlane.xlu0 %3579 }
 0x796   : > { %v3626_v24 = vsub.f32 %v7890_v32, %v3580_v8 }
 0x797   : > { %v3644_v37 = vmul.f32 1.442695, %v3627_v0 }
 0x798   : > { %v3642_v28 = vmul.f32 1.442695, %v3626_v24 }
 0x799   : > { %6267 = vpow2.f32 %v3644_v37 }
 0x79a   : > { %6269 = vpow2.f32 %v3642_v28 }
 0x79c   : > { %v3595_v35 = vpop.xlane.xlu1 %3594 }
 0x79d   : > { %v3589_v23 = vpop.xlane.xlu0 %3588  ;;  %v3631_v15 = vsub.f32 %v7898_v59, %v3595_v35 }
 0x79e   : > { %v3629_v17 = vsub.f32 %v7901_v38, %v3589_v23 }
 0x79f   : > { %v3652_v58 = vmul.f32 1.442695, %v3631_v15 }
 0x7a0   : > { %v3648_v42 = vmul.f32 1.442695, %v3629_v17 }
 0x7a1   : > { %v3586_v27 = vpop.xlane.xlu0 %3585 }
 0x7a2   : > { %6271 = vpow2.f32 %v3648_v42  ;;  %v3628_v63 = vsub.f32 %v7905_v57, %v3586_v27 }
 0x7a3   : > { %v7979_v55 = vpop.eup %6267  ;;  %6273 = vpow2.f32 %v3652_v58 }
 0x7a4   : > { %v7981_v53 = vpop.eup %6269  ;;  %v3646_v32 = vmul.f32 1.442695, %v3628_v63  ;;  %v3677_v49 = vsel %vm1671_vm3, %v7979_v55, 0.0 }
 0x7a5   : > { %v3601_v36 = vpop.xlane.xlu1 %3600  ;;  %v3592_v46 = vpop.xlane.xlu0 %3591  ;;  %3678 = vadd.xlane.f32.xlu1 %v3677_v49  ;;  %v3674_v59 = vsel %vm1671_vm3, %v7981_v53, 0.0 }
 0x7a6   : > { %6275 = vpow2.f32 %v3646_v32  ;;  %v3633_v38 = vsub.f32 %v7917_v9, %v3601_v36  ;;  %v3630_v57 = vsub.f32 %v7910_v33, %v3592_v46  ;;  %3675 = vadd.xlane.f32.xlu0 %v3674_v59 }
 0x7a8   : > { %v3656_v44 = vmul.f32 1.442695, %v3633_v38  ;;  %v3650_v14 = vmul.f32 1.442695, %v3630_v57 }
 0x7a9   : > { %v3598_v31 = vpop.xlane.xlu0 %3597  ;;  %v3607_v3 = vpop.xlane.xlu1 %3606 }
 0x7aa   : > { %6277 = vpow2.f32 %v3656_v44  ;;  %v3632_v52 = vsub.f32 %v7922_v61, %v3598_v31  ;;  %v3635_v39 = vsub.f32 %v7920_v34, %v3607_v3 }
 0x7ab   : > { %6279 = vpow2.f32 %v3650_v14 }
 0x7ac   : > { %v7991_v11 = vpop.eup %6271  ;;  %v3654_v18 = vmul.f32 1.442695, %v3632_v52  ;;  %v3660_v7 = vmul.f32 1.442695, %v3635_v39 }
 0x7ad   : > { %v3613_v30 = vpop.xlane.xlu1 %3612  ;;  %v3604_v41 = vpop.xlane.xlu0 %3603  ;;  %v3683_v33 = vsel %vm1671_vm3, %v7991_v11, 0.0 }
 0x7ae   : > { %v7995_v9 = vpop.eup %6273  ;;  %6281 = vpow2.f32 %v3654_v18  ;;  %v3637_v56 = vsub.f32 %v7937_v2, %v3613_v30  ;;  %v3634_v62 = vsub.f32 %v7928_v45, %v3604_v41  ;;  %3684 = vadd.xlane.f32.xlu1 %v3683_v33 }
 0x7af   : > { %6283 = vpow2.f32 %v3660_v7  ;;  %v3689_v37 = vsel %vm1671_vm3, %v7995_v9, 0.0 }
 0x7b0   : > { %v7999_v34 = vpop.eup %6275  ;;  %v3664_v61 = vmul.f32 1.442695, %v3637_v56  ;;  %v3658_v0 = vmul.f32 1.442695, %v3634_v62 }
 0x7b1   : > { %v3610_v8 = vpop.xlane.xlu0 %3609  ;;  %v3619_v24 = vpop.xlane.xlu1 %3618  ;;  %v3680_v28 = vsel %vm1671_vm3, %v7999_v34, 0.0 }
 0x7b2   : > { %6285 = vpow2.f32 %v3664_v61  ;;  %v3636_v35 = vsub.f32 %v7943_v1, %v3610_v8  ;;  %v3639_v2 = vsub.f32 %v7941_v10, %v3619_v24  ;;  %3690 = vadd.xlane.f32.xlu1 %v3689_v37  ;;  %3681 = vadd.xlane.f32.xlu0 %v3680_v28  ;;  %v8363_v61 = vld [vmem:[#allocation40_spill] sm:$0xff]  ;;  %v8366_v24 = vld [vmem:[#allocation37_spill] sm:$0xff] }
 0x7b3   : > { %6287 = vpow2.f32 %v3658_v0  ;;  %v8364_v0 = vld [vmem:[#allocation39_spill] sm:$0xff]  ;;  %v8367_v37 = vld [vmem:[#allocation36_spill] sm:$0xff] }
 0x7b4   : > { %v8007_v45 = vpop.eup %6277  ;;  %v3662_v23 = vmul.f32 1.442695, %v3636_v35  ;;  %v3668_v15 = vmul.f32 1.442695, %v3639_v2  ;;  %v8365_v8 = vpack.i.bf16 %v8363_v61, %v8364_v0  ;;  %v8368_v28 = vpack.i.bf16 %v8366_v24, %v8367_v37 }
 0x7b5   : > { %v8009_v17 = vpop.eup %6279  ;;  %v3625_v42 = vpop.xlane.xlu1 %3624  ;;  %v3695_v27 = vsel %vm1671_vm3, %v8007_v45, 0.0 }
 0x7b6   : > { %v3616_v58 = vpop.xlane.xlu0 %3615  ;;  %6289 = vpow2.f32 %v3662_v23  ;;  %v3641_v63 = vsub.f32 %v7956_v20, %v3625_v42  ;;  %3696 = vadd.xlane.f32.xlu1 %v3695_v27  ;;  %v3686_v10 = vsel %vm1671_vm3, %v8009_v17, 0.0 }
 0x7b7   : > { %v3638_v1 = vsub.f32 %v7948_v26, %v3616_v58  ;;  %6291 = vpow2.f32 %v3668_v15  ;;  %3687 = vadd.xlane.f32.xlu0 %v3686_v10 }
 0x7b8   : > { %v8017_v32 = vpop.eup %6281  ;;  %v3672_v46 = vmul.f32 1.442695, %v3641_v63 }
 0x7b9   : > { %v3666_v49 = vmul.f32 1.442695, %v3638_v1  ;;  %v8019_v36 = vpop.eup %6283  ;;  %v3692_v38 = vsel %vm1671_vm3, %v8017_v32, 0.0  ;;  %v6062_v35 = vpop.permute.xlu1 %6061 }
 0x7ba   : > { %v3622_v59 = vpop.xlane.xlu0 %3621  ;;  %v3701_v26 = vsel %vm1671_vm3, %v8019_v36, 0.0 }
 0x7bb   : > { %v3640_v20 = vsub.f32 %v7958_v60, %v3622_v59  ;;  %6293 = vpow2.f32 %v3666_v49  ;;  %3693 = vadd.xlane.f32.xlu0 %v3692_v38  ;;  %3702 = vadd.xlane.f32.xlu1 %v3701_v26 }
 0x7bc   : > { %v8026_v57 = vpop.eup %6285  ;;  %6295 = vpow2.f32 %v3672_v46 }
 0x7bd   : > { %v3670_v44 = vmul.f32 1.442695, %v3640_v20  ;;  %v8028_v14 = vpop.eup %6287  ;;  %v3707_v31 = vsel %vm1671_vm3, %v8026_v57, 0.0 }
 0x7be   : > { %v3698_v3 = vsel %vm1671_vm3, %v8028_v14, 0.0  ;;  %v6057_v2 = vpop.permute.xlu0 %6056 }
 0x7bf   : > { %6297 = vpow2.f32 %v3670_v44  ;;  %3699 = vadd.xlane.f32.xlu0 %v3698_v3  ;;  %3708 = vadd.xlane.f32.xlu1 %v3707_v31  ;;  %v6059_v63 = vunpack.i.h.bf16 %v6057_v2  ;;  %v6058_v1 = vunpack.i.l.bf16 %v6057_v2  ;;  %v6064_v3 = vunpack.i.h.bf16 %v6062_v35 }
 0x7c0   : > { %v8034_v60 = vpop.eup %6289 }
 0x7c1   : > { %v8036_v52 = vpop.eup %6291  ;;  %v3704_v39 = vsel %vm1671_vm3, %v8034_v60, 0.0  ;;  %v5810_v38 = vpack.c.bf16 %v6059_v63, %v6058_v1  ;;  %v628_v63 = vld [vmem:[#allocation10] sm:$0xff]  ;;  %v629_v1 = vld [vmem:[#allocation10 + $0x8] sm:$0xff] }
 0x7c2   : > { %v3713_v18 = vsel %vm1671_vm3, %v8036_v52, 0.0 }
 0x7c3   : > { %3705 = vadd.xlane.f32.xlu0 %v3704_v39  ;;  %3714 = vadd.xlane.f32.xlu1 %v3713_v18  ;;  %v6063_v39 = vunpack.i.l.bf16 %v6062_v35 }
 0x7c5   : > { %v8042_v7 = vpop.eup %6293  ;;  %v5814_v0 = vpack.c.bf16 %v6064_v3, %v6063_v39  ;;  %v631_v3 = vld [vmem:[#allocation10 + $0x18] sm:$0xff] }
 0x7c6   : > { %v3710_v30 = vsel %vm1671_vm3, %v8042_v7, 0.0  ;;  %v8046_v41 = vpop.eup %6295 }
 0x7c7   : > { %3711 = vadd.xlane.f32.xlu1 %v3710_v30  ;;  %v3719_v62 = vsel %vm1671_vm3, %v8046_v41, 0.0 }
 0x7c9   : > { %v8048_v33 = vpop.eup %6297 }
 0x7ca   : > { %v3716_v56 = vsel %vm1671_vm3, %v8048_v33, 0.0 }
 0x7cb   : > { %3717 = vadd.xlane.f32.xlu0 %v3716_v56  ;;  %3720 = vadd.xlane.f32.xlu1 %v3719_v62 }
 0x7dc   : > { %6071 = vrot.lane.b32.xlu1 %v8365_v8, %s6556_s18 }
 0x7e1   : > { %6066 = vrot.lane.b32.xlu0 %v8368_v28, %s6556_s18  ;;  %s6466_s18 = scalar_lea.vmem %s6465_s19, 4096 }
 0x7e2   : > { %p6468_p6 = scmp.lt.s32.totalorder %s6466_s18, %s6460_s9 }
 0x7e4   : > { %p6469_p10 = por %p6468_p6, %p6467_p2 }
 0x7e6   : > { %p6470_p4 = pnand %p6469_p10, %p6463_p12 }
 0x832   : > { %v3679_v23 = vpop.xlane.xlu1 %3678 }
 0x833   : > { %6299 = vrcp.f32 %v3679_v23  ;;  %v3676_v15 = vpop.xlane.xlu0 %3675 }
 0x834   : > { %6301 = vrcp.f32 %v3676_v15 }
 0x83b   : > { %v3685_v42 = vpop.xlane.xlu1 %3684 }
 0x83c   : > { %6303 = vrcp.f32 %v3685_v42 }
 0x83d   : > { %v6300_v58 = vpop.eup %6299 }
 0x83e   : > { %v6302_v27 = vpop.eup %6301  ;;  %v3739_v59 = vmul.f32 %v6300_v58, %v7979_v55 }
 0x83f   : > { %v3691_v10 = vpop.xlane.xlu1 %3690  ;;  %v3682_v49 = vpop.xlane.xlu0 %3681  ;;  %v3738_v46 = vmul.f32 %v6302_v27, %v7981_v53 }
 0x840   : > { %6305 = vrcp.f32 %v3682_v49 }
 0x841   : > { %5534 = vmatprep.mubr.msk.f32.mxu1 %vm1671_vm3, %v3738_v46  ;;  %6307 = vrcp.f32 %v3691_v10 }
 0x842   : > { %5535 = vmatmul.mubr.msk.f32.vlgmr.msra.gmra.mrb[34].mxu1 %vm1671_vm3, %v3739_v59 }
 0x843   : > { %v3697_v20 = vpop.xlane.xlu1 %3696  ;;  %5805 = vmatpush3.bf16.msra.mxu1 %v7845_v4 }
 0x844   : > { %v3688_v26 = vpop.xlane.xlu0 %3687  ;;  %5811 = vmatprep.subr.bf16.mxu1 %v5810_v38 }
 0x845   : > { %6309 = vrcp.f32 %v3688_v26 }
 0x846   : > { %6311 = vrcp.f32 %v3697_v20  ;;  %v6304_v53 = vpop.eup %6303 }
 0x847   : > { %v3741_v56 = vmul.f32 %v6304_v53, %v7991_v11 }
 0x848   : > { %v3694_v44 = vpop.xlane.xlu0 %3693  ;;  %v3703_v31 = vpop.xlane.xlu1 %3702 }
 0x849   : > { %6313 = vrcp.f32 %v3694_v44 }
 0x84a   : > { %v6306_v55 = vpop.eup %6305  ;;  %6315 = vrcp.f32 %v3703_v31  ;;  %v5834_v31 = vpack.c.bf16 %v629_v1, %v628_v63 }
 0x84b   : > { %v3740_v30 = vmul.f32 %v6306_v55, %v7999_v34  ;;  %v6308_v4 = vpop.eup %6307  ;;  %v630_v55 = vld [vmem:[#allocation10 + $0x10] sm:$0xff] }
 0x84c   : > { %v3700_v18 = vpop.xlane.xlu0 %3699  ;;  %v3709_v62 = vpop.xlane.xlu1 %3708  ;;  %v3743_v37 = vmul.f32 %v6308_v4, %v7995_v9  ;;  %v634_v4 = vld [vmem:[#allocation10 + $0x30] sm:$0xff] }
 0x84d   : > { %6317 = vrcp.f32 %v3700_v18  ;;  %5541 = vmatprep.mubr.msk.f32.mxu0 %vm1671_vm3, %v3740_v30 }
 0x84e   : > { %5542 = vmatmul.mubr.msk.f32.vlgmr.msra.gmra.mrb[46].mxu0 %vm1671_vm3, %v3741_v56  ;;  %6319 = vrcp.f32 %v3709_v62  ;;  %v5838_v62 = vpack.c.bf16 %v631_v3, %v630_v55 }
 0x84f   : > { %v6310_v61 = vpop.eup %6309  ;;  %5809 = vmatpush3.bf16.msra.mxu0 %v7848_v51 }
 0x850   : > { %v3706_v8 = vpop.xlane.xlu0 %3705  ;;  %v3742_v24 = vmul.f32 %v6310_v61, %v8009_v17  ;;  %v3715_v34 = vpop.xlane.xlu1 %3714  ;;  %5815 = vmatprep.subr.bf16.mxu0 %v5814_v0  ;;  %v635_v61 = vld [vmem:[#allocation10 + $0x38] sm:$0xff] }
 0x851   : > { %6321 = vrcp.f32 %v3706_v8  ;;  %v6312_v11 = vpop.eup %6311 }
 0x852   : > { %5548 = vmatprep.mubr.msk.f32.mxu1 %vm1671_vm3, %v3742_v24  ;;  %v3745_v2 = vmul.f32 %v6312_v11, %v8007_v45  ;;  %6323 = vrcp.f32 %v3715_v34 }
 0x853   : > { %v6314_v28 = vpop.eup %6313  ;;  %5549 = vmatmul.mubr.msk.f32.vlgmr.msra.gmra.mrb[36].mxu1 %vm1671_vm3, %v3743_v37 }
 0x854   : > { %5813 = vmatpush3.bf16.msra.mxu1 %v5810_v38  ;;  %v3744_v35 = vmul.f32 %v6314_v28, %v8017_v32  ;;  %v3712_v51 = vpop.xlane.xlu1 %3711  ;;  %v6316_v23 = vpop.eup %6315  ;;  %v632_v38 = vld [vmem:[#allocation10 + $0x20] sm:$0xff] }
 0x855   : > { %6325 = vrcp.f32 %v3712_v51  ;;  %v3747_v42 = vmul.f32 %v6316_v23, %v8019_v36  ;;  %v633_v36 = vld [vmem:[#allocation10 + $0x28] sm:$0xff] }
 0x856   : > { %5555 = vmatprep.mubr.msk.f32.mxu0 %vm1671_vm3, %v3744_v35 }
 0x857   : > { %v6318_v9 = vpop.eup %6317  ;;  %5556 = vmatmul.mubr.msk.f32.vlgmr.msra.gmra.mrb[48].mxu0 %vm1671_vm3, %v3745_v2 }
 0x858   : > { %v3718_v17 = vpop.xlane.xlu0 %3717  ;;  %5817 = vmatpush3.bf16.msra.mxu0 %v5814_v0  ;;  %v3746_v15 = vmul.f32 %v6318_v9, %v8028_v14  ;;  %v3721_v58 = vpop.xlane.xlu1 %3720 }
 0x859   : > { %6327 = vrcp.f32 %v3718_v17  ;;  %v6320_v32 = vpop.eup %6319 }
 0x85a   : > { %6329 = vrcp.f32 %v3721_v58  ;;  %5562 = vmatprep.mubr.msk.f32.mxu1 %vm1671_vm3, %v3746_v15  ;;  %v3749_v59 = vmul.f32 %v6320_v32, %v8026_v57 }
 0x85b   : > { %v6322_v45 = vpop.eup %6321  ;;  %5563 = vmatmul.mubr.msk.f32.vlgmr.msra.gmra.mrb[38].mxu1 %vm1671_vm3, %v3747_v42 }
 0x85c   : > { %v6067_v27 = vpop.permute.xlu0 %6066  ;;  %v3748_v46 = vmul.f32 %v6322_v45, %v8034_v60  ;;  %v6072_v14 = vpop.permute.xlu1 %6071  ;;  %v5826_v60 = vpack.c.bf16 %v633_v36, %v632_v38  ;;  %v8149_v45 = vld [vmem:[%s8260_s6] ss:$0 sm:$0xff] }
 0x85d   : > { %v6069_v10 = vunpack.i.h.bf16 %v6067_v27  ;;  %v6068_v49 = vunpack.i.l.bf16 %v6067_v27  ;;  %v6074_v20 = vunpack.i.h.bf16 %v6072_v14  ;;  %v6073_v26 = vunpack.i.l.bf16 %v6072_v14  ;;  %v6324_v53 = vpop.eup %6323 }
 0x85e   : > { %5569 = vmatprep.mubr.msk.f32.mxu0 %vm1671_vm3, %v3748_v46  ;;  %v3751_v56 = vmul.f32 %v6324_v53, %v8036_v52  ;;  %v5830_v52 = vpack.c.bf16 %v635_v61, %v634_v4 }
 0x85f   : > { %v5818_v44 = vpack.c.bf16 %v6069_v10, %v6068_v49  ;;  %5570 = vmatmul.mubr.msk.f32.vlgmr.msra.gmra.mrb[50].mxu0 %vm1671_vm3, %v3749_v59  ;;  %v6326_v39 = vpop.eup %6325  ;;  %v5822_v18 = vpack.c.bf16 %v6074_v20, %v6073_v26 }
 0x860   : > { %v3750_v57 = vmul.f32 %v6326_v39, %v8042_v7 }
 0x861   : > { %5819 = vmatprep.subr.bf16.mxu1 %v5818_v44  ;;  %5823 = vmatprep.subr.bf16.mxu0 %v5822_v18 }
 0x862   : > { %5821 = vmatpush3.bf16.msra.mxu1 %v5818_v44  ;;  %5576 = vmatprep.mubr.msk.f32.mxu1 %vm1671_vm3, %v3750_v57 }
 0x863   : > { %v6328_v30 = vpop.eup %6327  ;;  %5835 = vmatprep.subr.bf16.mxu1 %v5834_v31  ;;  %5825 = vmatpush3.bf16.msra.mxu0 %v5822_v18 }
 0x864   : > { %v3752_v0 = vmul.f32 %v6328_v30, %v8048_v33  ;;  %v6330_v8 = vpop.eup %6329  ;;  %5827 = vmatprep.subr.bf16.mxu0 %v5826_v60 }
 0x865   : > { %5577 = vmatmul.mubr.msk.f32.vlgmr.msra.gmra.mrb[40].mxu1 %vm1671_vm3, %v3751_v56  ;;  %v3753_v24 = vmul.f32 %v6330_v8, %v8046_v41 }
 0x866   : > { %5583 = vmatprep.mubr.msk.f32.mxu0 %vm1671_vm3, %v3752_v0  ;;  %5837 = vmatpush3.bf16.msra.mxu1 %v5834_v31 }
 0x867   : > { %5626 = vmatprep.mubr.msk.f32.mxu1 %vm652_vm1, %v7854_v43  ;;  %5839 = vmatprep.subr.bf16.mxu1 %v5838_v62 }
 0x868   : > { %5584 = vmatmul.mubr.msk.f32.vlgmr.msra.gmra.mrb[52].mxu0 %vm1671_vm3, %v3753_v24 }
 0x869   : > { %5829 = vmatpush3.bf16.msra.mxu0 %v5826_v60 }
 0x86a   : > { %5841 = vmatpush3.bf16.msra.mxu1 %v5838_v62  ;;  %5831 = vmatprep.subr.bf16.mxu0 %v5830_v52 }
 0x86d   : > { %5627 = vmatmul.mubr.msk.f32.vlgmr.msra.gmra.mrb[42].mxu1 %vm652_vm1, %v7852_v16  ;;  %5833 = vmatpush3.bf16.msra.mxu0 %v5830_v52 }
 0x86e   : > { %5629 = vmatprep.mubr.msk.f32.mxu1 %vm652_vm1, %v7858_v12 }
 0x871   : > { %5630 = vmatmul.mubr.msk.f32.gmra.mrb[44].mxu1 %vm652_vm1, %v7856_v13 }
 0x872   : > { %5632 = vmatprep.mubr.msk.f32.mxu1 %vm652_vm1, %v7862_v29 }
 0x875   : > { %5633 = vmatmul.mubr.msk.f32.gmra.mrb[46].mxu1 %vm652_vm1, %v7860_v19 }
 0x876   : > { %5635 = vmatprep.mubr.msk.f32.mxu1 %vm652_vm1, %v7866_v54 }
 0x879   : > { %5636 = vmatmul.mubr.msk.f32.gmra.mrb[48].mxu1 %vm652_vm1, %v7864_v40 }
 0x87a   : > { %5638 = vmatprep.mubr.msk.f32.mxu1 %vm652_vm1, %v7870_v25 }
 0x87d   : > { %5639 = vmatmul.mubr.msk.f32.gmra.mrb[50].mxu1 %vm652_vm1, %v7868_v50 }
 0x87e   : > { %5641 = vmatprep.mubr.msk.f32.mxu1 %vm652_vm1, %v7874_v21 }
 0x881   : > { %5642 = vmatmul.mubr.msk.f32.gmra.mrb[52].mxu1 %vm652_vm1, %v7872_v22 }
 0x882   : > { %5644 = vmatprep.mubr.msk.f32.mxu1 %vm652_vm1, %v7878_v5 }
 0x885   : > { %5645 = vmatmul.mubr.msk.f32.gmra.mrb[54].mxu1 %vm652_vm1, %v7876_v48 }
 0x886   : > { %5647 = vmatprep.mubr.msk.f32.mxu1 %vm652_vm1, %v7886_v47 }
 0x889   : > { %5648 = vmatmul.mubr.msk.f32.gmra.mrb[56].mxu1 %vm652_vm1, %v7883_v6 }
 0x915   : > { %v5536_v16 = vpop.f32.mrb[34].mxu1 }
 0x916   : > { %v3834_v43 = vpop.f32.mrb[35].mxu1 }
 0x917   : > { %5594 = vmatprep.mubr.msk.f32.mxu0 %vm652_vm1, %v3834_v43 }
 0x918   : > { %5595 = vmatmul.mubr.msk.f32.vlgmr.msra.gmra.mrb[54].mxu0 %vm652_vm1, %v5536_v16 }
 0x921   : > { %v5543_v13 = vpop.f32.mrb[46].mxu0 }
 0x922   : > { %v3923_v12 = vpop.f32.mrb[47].mxu0 }
 0x923   : > { %5597 = vmatprep.mubr.msk.f32.mxu0 %vm652_vm1, %v3923_v12 }
 0x924   : > { %5598 = vmatmul.mubr.msk.f32.gmra.mrb[56].mxu0 %vm652_vm1, %v5543_v13 }
 0x926   : > { %v5550_v19 = vpop.f32.mrb[36].mxu1 }
 0x927   : > { %v4012_v29 = vpop.f32.mrb[37].mxu1 }
 0x928   : > { %5600 = vmatprep.mubr.msk.f32.mxu0 %vm652_vm1, %v4012_v29 }
 0x929   : > { %5601 = vmatmul.mubr.msk.f32.gmra.mrb[58].mxu0 %vm652_vm1, %v5550_v19 }
 0x92a   : > { %v5557_v40 = vpop.f32.mrb[48].mxu0 }
 0x92b   : > { %v4101_v54 = vpop.f32.mrb[49].mxu0 }
 0x92c   : > { %5603 = vmatprep.mubr.msk.f32.mxu0 %vm652_vm1, %v4101_v54 }
 0x92d   : > { %5604 = vmatmul.mubr.msk.f32.gmra.mrb[60].mxu0 %vm652_vm1, %v5557_v40 }
 0x92e   : > { %v5564_v50 = vpop.f32.mrb[38].mxu1 }
 0x92f   : > { %v4190_v25 = vpop.f32.mrb[39].mxu1 }
 0x930   : > { %5606 = vmatprep.mubr.msk.f32.mxu0 %vm652_vm1, %v4190_v25 }
 0x931   : > { %5607 = vmatmul.mubr.msk.f32.gmra.mrb[62].mxu0 %vm652_vm1, %v5564_v50 }
 0x932   : > { %v5571_v22 = vpop.f32.mrb[50].mxu0 }
 0x933   : > { %v4279_v21 = vpop.f32.mrb[51].mxu0 }
 0x934   : > { %5609 = vmatprep.mubr.msk.f32.mxu0 %vm652_vm1, %v4279_v21 }
 0x935   : > { %5610 = vmatmul.mubr.msk.f32.gmra.mrb[64].mxu0 %vm652_vm1, %v5571_v22 }
 0x938   : > { %v5578_v48 = vpop.f32.mrb[40].mxu1 }
 0x939   : > { %v4368_v5 = vpop.f32.mrb[41].mxu1 }
 0x93a   : > { %5612 = vmatprep.mubr.msk.f32.mxu0 %vm652_vm1, %v4368_v5 }
 0x93b   : > { %v5585_v6 = vpop.f32.mrb[52].mxu0  ;;  %5613 = vmatmul.mubr.msk.f32.gmra.mrb[66].mxu0 %vm652_vm1, %v5578_v48 }
 0x93c   : > { %v4457_v47 = vpop.f32.mrb[53].mxu0 }
 0x93d   : > { %5615 = vmatprep.mubr.msk.f32.mxu0 %vm652_vm1, %v4457_v47 }
 0x93f   : > { %5616 = vmatmul.mubr.msk.f32.gmra.mrb[68].mxu0 %vm652_vm1, %v5585_v6 }
 0x940   : > { %v5628_v7 = vpop.f32.mrb[42].mxu1 }
 0x941   : > { %v4773_v41 = vpop.f32.mrb[43].mxu1 }
 0x944   : > { %v5631_v33 = vpop.f32.mrb[44].mxu1 }
 0x945   : > { %v4783_v37 = vpop.f32.mrb[45].mxu1 }
 0x948   : > { %v5634_v34 = vpop.f32.mrb[46].mxu1 }
 0x949   : > { %v4793_v11 = vpop.f32.mrb[47].mxu1 }
 0x94c   : > { %v5637_v28 = vpop.f32.mrb[48].mxu1 }
 0x94d   : > { %v4803_v35 = vpop.f32.mrb[49].mxu1 }
 0x950   : > { %v5640_v2 = vpop.f32.mrb[50].mxu1 }
 0x951   : > { %v4813_v51 = vpop.f32.mrb[51].mxu1 }
 0x954   : > { %v5643_v23 = vpop.f32.mrb[52].mxu1 }
 0x955   : > { %v4823_v9 = vpop.f32.mrb[53].mxu1 }
 0x958   : > { %v5646_v17 = vpop.f32.mrb[54].mxu1 }
 0x959   : > { %v4833_v15 = vpop.f32.mrb[55].mxu1 }
 0x95c   : > { %v5649_v42 = vpop.f32.mrb[56].mxu1 }
 0x95d   : > { %v8144_v58 = vpop.f32.mrb[57].mxu1 }
 0x9eb   : > { %v5596_v32 = vpop.f32.mrb[54].mxu0 }
 0x9ec   : > { %v4779_v27 = vadd.f32 %v5628_v7, %v5596_v32  ;;  %v4580_v63 = vpop.f32.mrb[55].mxu0 }
 0x9ed   : > { %v4774_v1 = vadd.f32 %v4773_v41, %v4580_v63 }
 0x9ee   : > { %v4860_v10 = vadd.f32 %v8149_v45, %v4779_v27 }
 0x9ef   : > { %v4859_v49 = vadd.f32 %v8149_v45, %v4774_v1 }
 0x9f0   : > { %4876 = vst.msk [vmem:[%s8155_s22 + $0x8] sm:$0xff] %vm402_vm0, %v4860_v10 }
 0x9f1   : > { %4875 = vst.msk [vmem:[%s8155_s22] sm:$0xff] %vm402_vm0, %v4859_v49 }
 0x9f7   : > { %v5599_v46 = vpop.f32.mrb[56].mxu0 }
 0x9f8   : > { %v4789_v59 = vadd.f32 %v5631_v33, %v5599_v46  ;;  %v4590_v14 = vpop.f32.mrb[57].mxu0 }
 0x9f9   : > { %v4784_v38 = vadd.f32 %v4783_v37, %v4590_v14 }
 0x9fa   : > { %v4862_v36 = vadd.f32 %v8149_v45, %v4789_v59 }
 0x9fb   : > { %v4861_v20 = vadd.f32 %v8149_v45, %v4784_v38 }
 0x9fc   : > { %v5602_v26 = vpop.f32.mrb[58].mxu0  ;;  %4878 = vst.msk [vmem:[%s8155_s22 + $0x18] sm:$0xff] %vm402_vm0, %v4862_v36 }
 0x9fd   : > { %v4799_v44 = vadd.f32 %v5634_v34, %v5602_v26  ;;  %v4600_v31 = vpop.f32.mrb[59].mxu0  ;;  %4877 = vst.msk [vmem:[%s8155_s22 + $0x10] sm:$0xff] %vm402_vm0, %v4861_v20 }
 0x9fe   : > { %v4794_v53 = vadd.f32 %v4793_v11, %v4600_v31 }
 0x9ff   : > { %v4864_v55 = vadd.f32 %v8149_v45, %v4799_v44 }
 0xa00   : > { %v4863_v3 = vadd.f32 %v8149_v45, %v4794_v53  ;;  %v5605_v39 = vpop.f32.mrb[60].mxu0 }
 0xa01   : > { %4880 = vst.msk [vmem:[%s8155_s22 + $0x28] sm:$0xff] %vm402_vm0, %v4864_v55  ;;  %v4809_v18 = vadd.f32 %v5637_v28, %v5605_v39  ;;  %v4610_v60 = vpop.f32.mrb[61].mxu0 }
 0xa02   : > { %4879 = vst.msk [vmem:[%s8155_s22 + $0x20] sm:$0xff] %vm402_vm0, %v4863_v3  ;;  %v4804_v57 = vadd.f32 %v4803_v35, %v4610_v60 }
 0xa03   : > { %v4866_v30 = vadd.f32 %v8149_v45, %v4809_v18 }
 0xa04   : > { %v4865_v56 = vadd.f32 %v8149_v45, %v4804_v57  ;;  %v5608_v62 = vpop.f32.mrb[62].mxu0 }
 0xa05   : > { %4882 = vst.msk [vmem:[%s8155_s22 + $0x38] sm:$0xff] %vm402_vm0, %v4866_v30  ;;  %v4819_v4 = vadd.f32 %v5640_v2, %v5608_v62  ;;  %v4620_v61 = vpop.f32.mrb[63].mxu0 }
 0xa06   : > { %4881 = vst.msk [vmem:[%s8155_s22 + $0x30] sm:$0xff] %vm402_vm0, %v4865_v56  ;;  %v4814_v0 = vadd.f32 %v4813_v51, %v4620_v61 }
 0xa07   : > { %v4868_v8 = vadd.f32 %v8149_v45, %v4819_v4 }
 0xa08   : > { %v4867_v24 = vadd.f32 %v8149_v45, %v4814_v0  ;;  %v5611_v52 = vpop.f32.mrb[64].mxu0 }
 0xa09   : > { %4884 = vst.msk [vmem:[%s8155_s22 + $0x48] sm:$0xff] %vm402_vm0, %v4868_v8  ;;  %v4829_v16 = vadd.f32 %v5643_v23, %v5611_v52  ;;  %v4630_v43 = vpop.f32.mrb[65].mxu0 }
 0xa0a   : > { %4883 = vst.msk [vmem:[%s8155_s22 + $0x40] sm:$0xff] %vm402_vm0, %v4867_v24  ;;  %v4824_v13 = vadd.f32 %v4823_v9, %v4630_v43 }
 0xa0b   : > { %v4870_v12 = vadd.f32 %v8149_v45, %v4829_v16 }
 0xa0c   : > { %v4869_v19 = vadd.f32 %v8149_v45, %v4824_v13 }
 0xa0d   : > { %4886 = vst.msk [vmem:[%s8155_s22 + $0x58] sm:$0xff] %vm402_vm0, %v4870_v12 }
 0xa0e   : > { %v5614_v29 = vpop.f32.mrb[66].mxu0  ;;  %4885 = vst.msk [vmem:[%s8155_s22 + $0x50] sm:$0xff] %vm402_vm0, %v4869_v19 }
 0xa0f   : > { %v4839_v40 = vadd.f32 %v5646_v17, %v5614_v29  ;;  %v4640_v54 = vpop.f32.mrb[67].mxu0 }
 0xa10   : > { %v4834_v50 = vadd.f32 %v4833_v15, %v4640_v54 }
 0xa11   : > { %v4872_v25 = vadd.f32 %v8149_v45, %v4839_v40 }
 0xa12   : > { %v4871_v22 = vadd.f32 %v8149_v45, %v4834_v50  ;;  %v5617_v21 = vpop.f32.mrb[68].mxu0 }
 0xa13   : > { %4888 = vst.msk [vmem:[%s8155_s22 + $0x68] sm:$0xff] %vm402_vm0, %v4872_v25  ;;  %v4849_v48 = vadd.f32 %v5649_v42, %v5617_v21  ;;  %v4650_v5 = vpop.f32.mrb[69].mxu0 }
 0xa14   : > { %4887 = vst.msk [vmem:[%s8155_s22 + $0x60] sm:$0xff] %vm402_vm0, %v4871_v22  ;;  %v4844_v6 = vadd.f32 %v8144_v58, %v4650_v5 }
 0xa15   : > { %v4874_v47 = vadd.f32 %v8149_v45, %v4849_v48 }
 0xa16   : > { %v4873_v7 = vadd.f32 %v8149_v45, %v4844_v6 }
 0xa17   : > { %4890 = vst.msk [vmem:[%s8155_s22 + $0x78] sm:$0xff] %vm402_vm0, %v4874_v47 }
 0xa18   : > { %4889 = vst.msk [vmem:[%s8155_s22 + $0x70] sm:$0xff] %vm402_vm0, %v4873_v7 }
 0xa19   : > { %6473 = shalt.err (!%p6470_p4)
}
 0xa1a   : > { %s6474_s1 = scalar_lea.hbm %s8204_s30, 2048  ;;  %s6478_s12 = scalar_lea.hbm %s8261_s7, 8192 }
 0xa1b   : > { %p6475_p8 = scmp.ne.s32.totalorder %s8204_s30, %s6474_s1  ;;  %p6479_p0 = scmp.lt.u32.totalorder %s8204_s30, %s8261_s7 }
 0xa1c   : > { %p6480_p3 = scmp.lt.u32.totalorder %s6478_s12, %s6474_s1  ;;  %p6482_p5 = scmp.lt.u32.totalorder %s6474_s1, %s8204_s30 }
 0xa1d   : > { %p6476_p9 = pnand %p6475_p8, %p6753_p11 }
 0xa1e   : > { %p6481_p1 = por %p6480_p3, %p6479_p0 }
 0xa1f   : > { %p6477_p13 = pneg %p6476_p9 }
 0xa20   : > { %p6483_p7 = por %p6482_p5, %p6481_p1 }
 0xa22   : > { %p6484_p12 = pnand %p6483_p7, %p6477_p13 }
 0xa24   : > { %6487 = shalt.err (!%p6484_p12)
}
 0xa25   : > { %s6558_s17 = smov 128   ;;  %s6559_s20 = smov 8  }
 0xa26   : > { %5876 = dma.vmem_to_hbm [thread:$0]  (%p6753_p11), %s8206_s13, 2048, %s8204_s30, %s4892_s28, %s6558_s17, %s6558_s17, %s6559_s20  }
 0xa27 PF: > { %p5908_p2 = scmp.ge.s32.totalorder %s6542_s27, 2  ;;  %s4921_s9 = sand.u32 1, %s6530_s24  }
 0xa28   : > { %p8369_p6 = scmp.ne.s32.totalorder %s8293_s8, 0  ;;  %s4922_s14 = scalar_lea.sflag [#allocation4], %s4921_s9 }
 0xa2a   : > { %p5896_p10 = pnand %p5908_p2, %p8369_p6 }
 0xa2c   : > { %6525 = dma.done.wait (!%p5896_p10), %s4922_s14, 2048  }
 0xa2d   : > { %6527 = vsyncadd (!%p5896_p10), %s4922_s14, 4294965248  ;;  %p23_p4 = scmp.ge.s32.totalorder %s6743_s23, 6   ;;  %s8370_s24 = smov %s6534_s25 }
 0xa2e   : > { %s8371_s25 = smov %s6538_s26  ;;  %s8372_s26 = smov %s6759_s29 }
 0xa2f   : > { %s8373_s27 = smov %s6743_s23  ;;  %25 = sbr.rel (!%p23_p4) target bundleno = 10 (0xa), region = 110 }
 0xa36   :  { %4927 = vsyncpa [#allocation3], 1 }
 0xa37   :  { %4929 = vsyncpa [#allocation3 + $0x1], 1 }
 0xa38   :  { %4930 = vsyncpa [#allocation7], 1 }
 0xa39   :  { %4931 = vsyncpa [#allocation11], 1 }
 0xa3a   :  { %4932 = vsyncpa [#allocation4], 1 }
 0xa3b   :  { %4934 = vsyncpa [#allocation4 + $0x1], 1 }
 0xa3c   :  { %4935 = vsyncpa [#allocation5], 1 }
 0xa3d   :  { %4937 = vsyncpa [#allocation5 + $0x1], 1 }

</bundles_post_ra>
